<compile_context>
chip_gen: v6e
topology: v6e:2x2x1
jax: 0.10.0
libtpu: 0.0.40
codegen_flags: <defaults>
</compile_context>

<pallas_src>
import functools

import jax
import jax.numpy as jnp
from jax import lax
from jax.experimental import pallas as pl
from jax.experimental.pallas import tpu as pltpu


# ----------------------------------------------------------------------------
# Fused Pallas kernel (all LSTM layers + Linear + Softmax in one call)
# ----------------------------------------------------------------------------
def _make_fused_kernel(num_layers, hidden_dim, seq_len, t_pad):
    H = hidden_dim
    S = seq_len

    def kernel(*refs):
        # refs layout:
        #   [0]                       x_ref     (S, D_in)                   f32
        #   [1 .. 3L]                 per layer: W_ih^T (D_in, 4H) bf16,
        #                                        W_hh split (4, H, H) f32,
        #                                        bias (1, 4H) f32
        #   [3L+1 .. 3L+4]            W_out^T (H, Tpad) bf16, b_out (1, Tpad) f32,
        #                             h0 (L, H), c0 (L, H)
        #   [3L+5 .. 3L+7]            outputs: pred (S, Tpad), hN (L, H), cN (L, H)
        #   [-1]                      scratch : seq (S, H) VMEM f32
        n_in = 1 + 3 * num_layers + 4
        x_ref = refs[0]
        layer_refs = refs[1:1 + 3 * num_layers]
        wout_ref, bout_ref, h0_ref, c0_ref = refs[1 + 3 * num_layers:n_in]
        pred_ref, hN_ref, cN_ref, seq_scr = refs[n_in:]

        seq = x_ref[...]                                            # (S, D_in) f32
        h_fin, c_fin = [], []
        for l in range(num_layers):
            wih = layer_refs[3 * l + 0][...]                        # (D_in, 4H) bf16, gates i|f|g|o
            whh_ref = layer_refs[3 * l + 1]                         # ref (4, H, H)  f32
            b = layer_refs[3 * l + 2][...]                          # (1, 4H)       f32

            # Hoisted input projection (bf16 MXU inputs, f32 accumulate), sliced
            # per gate once per layer -> four lane-aligned (S, H) slabs.
            gates_x = jnp.dot(seq.astype(jnp.bfloat16), wih,
                              preferred_element_type=jnp.float32) + b      # (S, 4H)
            gx_i = gates_x[:, 0 * H:1 * H]
            gx_f = gates_x[:, 1 * H:2 * H]
            gx_g = gates_x[:, 2 * H:3 * H]
            gx_o = gates_x[:, 3 * H:4 * H]

            # Per-gate recurrent weights (H, H): each matvec result lands on
            # lanes [0:H], aligned with c/h -> no cross-lane relayout per step.
            w_i = whh_ref[0]
            w_f = whh_ref[1]
            w_g = whh_ref[2]
            w_o = whh_ref[3]

            h = h0_ref[l:l + 1, :]                                  # (1, H) f32
            c = c0_ref[l:l + 1, :]
            for t in range(S):                                      # fully unrolled (S <= 16)
                pre_i = gx_i[t:t + 1, :] + jnp.dot(h, w_i, preferred_element_type=jnp.float32)
                pre_f = gx_f[t:t + 1, :] + jnp.dot(h, w_f, preferred_element_type=jnp.float32)
                pre_g = gx_g[t:t + 1, :] + jnp.dot(h, w_g, preferred_element_type=jnp.float32)
                pre_o = gx_o[t:t + 1, :] + jnp.dot(h, w_o, preferred_element_type=jnp.float32)
                i_g = jax.nn.sigmoid(pre_i)
                f_g = jax.nn.sigmoid(pre_f)
                g_g = jnp.tanh(pre_g)
                o_g = jax.nn.sigmoid(pre_o)
                c = f_g * c + i_g * g_g
                h = o_g * jnp.tanh(c)
                seq_scr[t:t + 1, :] = h                              # row store, off h->h chain
            h_fin.append(h)
            c_fin.append(c)
            seq = seq_scr[...]                                       # (S, H) f32, next layer input

        # Batched final-state writes: one slab store per output.
        hN_ref[...] = jnp.concatenate(h_fin, axis=0)
        cN_ref[...] = jnp.concatenate(c_fin, axis=0)

        # TODO(synk): nn.Dropout training-mode RNG mask not implemented; eval-mode identity.
        # Lane-dense (Tpad = multiple of 128) output head; padded bias is -1e30
        # so padded lanes contribute exactly 0 to the softmax.
        logits = jnp.dot(seq.astype(jnp.bfloat16), wout_ref[...],
                         preferred_element_type=jnp.float32) + bout_ref[...]    # (S, Tpad)
        m = jnp.max(logits, axis=-1, keepdims=True)
        e = jnp.exp(logits - m)
        denom = jnp.sum(e, axis=-1, keepdims=True)
        pred_ref[...] = e / denom                                    # exact normalization

    return kernel


_VMEM = pl.BlockSpec(memory_space=pltpu.MemorySpace.VMEM)


@functools.partial(jax.jit, static_argnames=("num_layers", "target_size"))
def lstm_model_forward(x, h0, c0, kparams, num_layers, target_size):
    """Fused forward: LSTM stack -> (eval-mode) Dropout -> Linear -> Softmax(dim=1)."""
    S = x.shape[0]
    H = h0.shape[1]
    w_out_p, b_out_p = kparams["out"]
    t_pad = w_out_p.shape[1]

    layer_args = []
    for (wih_t, whh_s, b) in kparams["layers"]:
        layer_args += [wih_t, whh_s, b]

    n_inputs = 1 + 3 * num_layers + 4
    kernel = _make_fused_kernel(num_layers, H, S, t_pad)
    pred_p, hN, cN = pl.pallas_call(
        kernel,
        out_shape=(jax.ShapeDtypeStruct((S, t_pad), jnp.float32),
                   jax.ShapeDtypeStruct((num_layers, H), jnp.float32),
                   jax.ShapeDtypeStruct((num_layers, H), jnp.float32)),
        in_specs=[_VMEM] * n_inputs,
        out_specs=(_VMEM, _VMEM, _VMEM),
        scratch_shapes=[pltpu.VMEM((S, H), jnp.float32)],
    )(x, *layer_args, w_out_p, b_out_p, h0, c0)
    return pred_p[:, :target_size], (hN, cN)


# ----------------------------------------------------------------------------
# Parameters: PyTorch-native init + kernel-layout preparation
# ----------------------------------------------------------------------------
def init_params(key, input_dim, hidden_dim, target_size, num_layers):
    """Native PyTorch layout: W_ih (4H, D_in), W_hh (4H, H), gate order (i, f, g, o)."""
    k = 1.0 / jnp.sqrt(jnp.float32(hidden_dim))
    layers = []
    for l in range(num_layers):
        d_in = input_dim if l == 0 else hidden_dim
        key, k1, k2, k3, k4 = jax.random.split(key, 5)
        w_ih = jax.random.uniform(k1, (4 * hidden_dim, d_in), jnp.float32, -k, k)
        w_hh = jax.random.uniform(k2, (4 * hidden_dim, hidden_dim), jnp.float32, -k, k)
        b_ih = jax.random.uniform(k3, (4 * hidden_dim,), jnp.float32, -k, k)
        b_hh = jax.random.uniform(k4, (4 * hidden_dim,), jnp.float32, -k, k)
        layers.append((w_ih, w_hh, b_ih, b_hh))
    key, k5, k6 = jax.random.split(key, 3)
    w_out = jax.random.uniform(k5, (target_size, hidden_dim), jnp.float32, -k, k)
    b_out = jax.random.uniform(k6, (target_size,), jnp.float32, -k, k)
    return {"layers": layers, "out": (w_out, b_out)}


def prepare_kernel_params(params, hidden_dim):
    """Kernel layout: W_ih^T (D_in,4H) bf16, W_hh split per gate (4,H,H) f32,
    fused bias (1,4H) f32, and a lane-padded (Tpad=multiple of 128) output head."""
    H = hidden_dim
    kl = []
    for (w_ih, w_hh, b_ih, b_hh) in params["layers"]:
        wih_t = jnp.asarray(w_ih.T, jnp.bfloat16)                              # (D_in, 4H)
        whh_s = jnp.stack([w_hh[g * H:(g + 1) * H, :].T for g in range(4)])    # (4, H, H) f32
        b = (b_ih + b_hh)[None, :].astype(jnp.float32)                         # (1, 4H)
        kl.append((wih_t, whh_s, b))

    w_out, b_out = params["out"]
    T = w_out.shape[0]
    t_pad = ((T + 127) // 128) * 128
    w_out_p = jnp.zeros((H, t_pad), jnp.float32).at[:, :T].set(w_out.T).astype(jnp.bfloat16)
    b_out_p = jnp.full((1, t_pad), -1e30, jnp.float32).at[0, :T].set(b_out)
    return {"layers": kl, "out": (w_out_p, b_out_p)}


# ----------------------------------------------------------------------------
# Pure-JAX reference (uses the UNsplit PyTorch-native layout)
# ----------------------------------------------------------------------------
def lstm_model_ref(x, h0, c0, params, num_layers):
    seq = x
    for l in range(num_layers):
        w_ih, w_hh, b_ih, b_hh = params["layers"][l]
        H = w_hh.shape[1]

        def step(carry, x_t):
            h, c = carry
            gates = w_ih @ x_t + w_hh @ h + b_ih + b_hh
            i = jax.nn.sigmoid(gates[0:H])
            f = jax.nn.sigmoid(gates[H:2 * H])
            g = jnp.tanh(gates[2 * H:3 * H])
            o = jax.nn.sigmoid(gates[3 * H:4 * H])
            c2 = f * c + i * g
            h2 = o * jnp.tanh(c2)
            return (h2, c2), h2

        (_, _), out = lax.scan(step, (h0[l], c0[l]), seq)
        seq = out
    w_out, b_out = params["out"]
    logits = seq @ w_out.T + b_out
    return jax.nn.softmax(logits, axis=1)


# ----------------------------------------------------------------------------
if __name__ == "__main__":
    input_dim, hidden_dim, target_size, num_layers = 16, 32, 10, 2
    seq_len = 8

    key = jax.random.PRNGKey(0)
    key, kx = jax.random.split(key)
    x = jax.random.normal(kx, (seq_len, input_dim), jnp.float32)

    params = init_params(key, input_dim, hidden_dim, target_size, num_layers)
    kparams = prepare_kernel_params(params, hidden_dim)

    # init_hidden(): zeros of shape (num_layers, hidden_dim)
    h0 = jnp.zeros((num_layers, hidden_dim), jnp.float32)
    c0 = jnp.zeros((num_layers, hidden_dim), jnp.float32)

    pred, (hN, cN) = lstm_model_forward(x, h0, c0, kparams,
                                        num_layers=num_layers, target_size=target_size)
    pred = jax.block_until_ready(pred)

    ref = lstm_model_ref(x, h0, c0, params, num_layers)
    assert pred.shape == (seq_len, target_size)
    assert jnp.allclose(pred, ref, atol=2e-2, rtol=2e-2), "mismatch vs reference"
    assert jnp.allclose(jnp.sum(pred, axis=1), 1.0, atol=1e-4), "softmax rows must sum to ~1"

    print("KERNEL_OK")
</pallas_src>

<mosaic_0001>
module attributes {stable_mosaic.version = 11 : i64} {
  func.func @kernel(%arg0: memref<8x16xf32, #tpu.memory_space<vmem>>, %arg1: memref<16x128xbf16, #tpu.memory_space<vmem>>, %arg2: memref<4x32x32xf32, #tpu.memory_space<vmem>>, %arg3: memref<1x128xf32, #tpu.memory_space<vmem>>, %arg4: memref<32x128xbf16, #tpu.memory_space<vmem>>, %arg5: memref<4x32x32xf32, #tpu.memory_space<vmem>>, %arg6: memref<1x128xf32, #tpu.memory_space<vmem>>, %arg7: memref<32x128xbf16, #tpu.memory_space<vmem>>, %arg8: memref<1x128xf32, #tpu.memory_space<vmem>>, %arg9: memref<2x32xf32, #tpu.memory_space<vmem>>, %arg10: memref<2x32xf32, #tpu.memory_space<vmem>>, %arg11: memref<8x128xf32, #tpu.memory_space<vmem>>, %arg12: memref<2x32xf32, #tpu.memory_space<vmem>>, %arg13: memref<2x32xf32, #tpu.memory_space<vmem>>, %arg14: memref<8x32xf32, #tpu.memory_space<vmem>>) attributes {dimension_semantics = [], scalar_prefetch = 0 : i64, scratch_operands = 1 : i64, tpu.core_type = #tpu.core_type<tc>} {
    %c0 = arith.constant 0 : index
    %c0_0 = arith.constant 0 : index
    %0 = vector.load %arg0[%c0, %c0_0] : memref<8x16xf32, #tpu.memory_space<vmem>>, vector<8x16xf32>
    %c0_1 = arith.constant 0 : index
    %c0_2 = arith.constant 0 : index
    %1 = vector.load %arg1[%c0_1, %c0_2] : memref<16x128xbf16, #tpu.memory_space<vmem>>, vector<16x128xbf16>
    %c0_3 = arith.constant 0 : index
    %c0_4 = arith.constant 0 : index
    %2 = vector.load %arg3[%c0_3, %c0_4] : memref<1x128xf32, #tpu.memory_space<vmem>>, vector<1x128xf32>
    %3 = arith.truncf %0 : vector<8x16xf32> to vector<8x16xbf16>
    %cst = arith.constant dense<0.000000e+00> : vector<8x128xf32>
    %4 = tpu.matmul %3, %1, %cst {dimension_numbers = #tpu.dot_dimension_numbers<[1], [0], [0], [1], [0, 0, 1, 1], [], []>} : vector<8x16xbf16>, vector<16x128xbf16>, vector<8x128xf32> -> vector<8x128xf32>
    %5 = vector.broadcast %2 : vector<1x128xf32> to vector<8x128xf32>
    %6 = arith.addf %4, %5 : vector<8x128xf32>
    %7 = vector.extract_strided_slice %6 {offsets = [0, 0], sizes = [8, 32], strides = [1, 1]} : vector<8x128xf32> to vector<8x32xf32>
    %8 = vector.extract_strided_slice %6 {offsets = [0, 32], sizes = [8, 32], strides = [1, 1]} : vector<8x128xf32> to vector<8x32xf32>
    %9 = vector.extract_strided_slice %6 {offsets = [0, 64], sizes = [8, 32], strides = [1, 1]} : vector<8x128xf32> to vector<8x32xf32>
    %10 = vector.extract_strided_slice %6 {offsets = [0, 96], sizes = [8, 32], strides = [1, 1]} : vector<8x128xf32> to vector<8x32xf32>
    %c0_5 = arith.constant 0 : index
    %c0_6 = arith.constant 0 : index
    %c0_7 = arith.constant 0 : index
    %11 = vector.load %arg2[%c0_5, %c0_6, %c0_7] : memref<4x32x32xf32, #tpu.memory_space<vmem>>, vector<1x32x32xf32>
    %12 = vector.shape_cast %11 : vector<1x32x32xf32> to vector<32x32xf32>
    %c1 = arith.constant 1 : index
    %c0_8 = arith.constant 0 : index
    %c0_9 = arith.constant 0 : index
    %13 = vector.load %arg2[%c1, %c0_8, %c0_9] : memref<4x32x32xf32, #tpu.memory_space<vmem>>, vector<1x32x32xf32>
    %14 = vector.shape_cast %13 : vector<1x32x32xf32> to vector<32x32xf32>
    %c2 = arith.constant 2 : index
    %c0_10 = arith.constant 0 : index
    %c0_11 = arith.constant 0 : index
    %15 = vector.load %arg2[%c2, %c0_10, %c0_11] : memref<4x32x32xf32, #tpu.memory_space<vmem>>, vector<1x32x32xf32>
    %16 = vector.shape_cast %15 : vector<1x32x32xf32> to vector<32x32xf32>
    %c3 = arith.constant 3 : index
    %c0_12 = arith.constant 0 : index
    %c0_13 = arith.constant 0 : index
    %17 = vector.load %arg2[%c3, %c0_12, %c0_13] : memref<4x32x32xf32, #tpu.memory_space<vmem>>, vector<1x32x32xf32>
    %18 = vector.shape_cast %17 : vector<1x32x32xf32> to vector<32x32xf32>
    %c0_14 = arith.constant 0 : index
    %c0_15 = arith.constant 0 : index
    %19 = vector.load %arg9[%c0_14, %c0_15] : memref<2x32xf32, #tpu.memory_space<vmem>>, vector<1x32xf32>
    %c0_16 = arith.constant 0 : index
    %c0_17 = arith.constant 0 : index
    %20 = vector.load %arg10[%c0_16, %c0_17] : memref<2x32xf32, #tpu.memory_space<vmem>>, vector<1x32xf32>
    %21 = vector.extract_strided_slice %7 {offsets = [0, 0], sizes = [1, 32], strides = [1, 1]} : vector<8x32xf32> to vector<1x32xf32>
    %cst_18 = arith.constant dense<0.000000e+00> : vector<1x32xf32>
    %22 = tpu.matmul %19, %12, %cst_18 {dimension_numbers = #tpu.dot_dimension_numbers<[1], [0], [0], [1], [0, 0, 1, 1], [], []>} : vector<1x32xf32>, vector<32x32xf32>, vector<1x32xf32> -> vector<1x32xf32>
    %23 = arith.addf %21, %22 : vector<1x32xf32>
    %24 = vector.extract_strided_slice %8 {offsets = [0, 0], sizes = [1, 32], strides = [1, 1]} : vector<8x32xf32> to vector<1x32xf32>
    %cst_19 = arith.constant dense<0.000000e+00> : vector<1x32xf32>
    %25 = tpu.matmul %19, %14, %cst_19 {dimension_numbers = #tpu.dot_dimension_numbers<[1], [0], [0], [1], [0, 0, 1, 1], [], []>} : vector<1x32xf32>, vector<32x32xf32>, vector<1x32xf32> -> vector<1x32xf32>
    %26 = arith.addf %24, %25 : vector<1x32xf32>
    %27 = vector.extract_strided_slice %9 {offsets = [0, 0], sizes = [1, 32], strides = [1, 1]} : vector<8x32xf32> to vector<1x32xf32>
    %cst_20 = arith.constant dense<0.000000e+00> : vector<1x32xf32>
    %28 = tpu.matmul %19, %16, %cst_20 {dimension_numbers = #tpu.dot_dimension_numbers<[1], [0], [0], [1], [0, 0, 1, 1], [], []>} : vector<1x32xf32>, vector<32x32xf32>, vector<1x32xf32> -> vector<1x32xf32>
    %29 = arith.addf %27, %28 : vector<1x32xf32>
    %30 = vector.extract_strided_slice %10 {offsets = [0, 0], sizes = [1, 32], strides = [1, 1]} : vector<8x32xf32> to vector<1x32xf32>
    %cst_21 = arith.constant dense<0.000000e+00> : vector<1x32xf32>
    %31 = tpu.matmul %19, %18, %cst_21 {dimension_numbers = #tpu.dot_dimension_numbers<[1], [0], [0], [1], [0, 0, 1, 1], [], []>} : vector<1x32xf32>, vector<32x32xf32>, vector<1x32xf32> -> vector<1x32xf32>
    %32 = arith.addf %30, %31 : vector<1x32xf32>
    %33 = arith.negf %23 : vector<1x32xf32>
    %34 = math.exp %33 : vector<1x32xf32>
    %cst_22 = arith.constant 1.000000e+00 : f32
    %35 = vector.broadcast %cst_22 : f32 to vector<1x32xf32>
    %36 = arith.addf %35, %34 : vector<1x32xf32>
    %37 = arith.divf %35, %36 : vector<1x32xf32>
    %38 = arith.negf %26 : vector<1x32xf32>
    %39 = math.exp %38 : vector<1x32xf32>
    %cst_23 = arith.constant 1.000000e+00 : f32
    %40 = vector.broadcast %cst_23 : f32 to vector<1x32xf32>
    %41 = arith.addf %40, %39 : vector<1x32xf32>
    %42 = arith.divf %40, %41 : vector<1x32xf32>
    %43 = math.tanh %29 : vector<1x32xf32>
    %44 = arith.negf %32 : vector<1x32xf32>
    %45 = math.exp %44 : vector<1x32xf32>
    %cst_24 = arith.constant 1.000000e+00 : f32
    %46 = vector.broadcast %cst_24 : f32 to vector<1x32xf32>
    %47 = arith.addf %46, %45 : vector<1x32xf32>
    %48 = arith.divf %46, %47 : vector<1x32xf32>
    %49 = arith.mulf %42, %20 : vector<1x32xf32>
    %50 = arith.mulf %37, %43 : vector<1x32xf32>
    %51 = arith.addf %49, %50 : vector<1x32xf32>
    %52 = math.tanh %51 : vector<1x32xf32>
    %53 = arith.mulf %48, %52 : vector<1x32xf32>
    %c0_25 = arith.constant 0 : index
    %c0_26 = arith.constant 0 : index
    %54 = vector.load %arg14[%c0_25, %c0_26] : memref<8x32xf32, #tpu.memory_space<vmem>>, vector<1x32xf32>
    tpu.vector_store %arg14[%c0_25, %c0_26], %53 {strides = array<i32>} : memref<8x32xf32, #tpu.memory_space<vmem>>, vector<1x32xf32>,
    %55 = vector.extract_strided_slice %7 {offsets = [1, 0], sizes = [1, 32], strides = [1, 1]} : vector<8x32xf32> to vector<1x32xf32>
    %cst_27 = arith.constant dense<0.000000e+00> : vector<1x32xf32>
    %56 = tpu.matmul %53, %12, %cst_27 {dimension_numbers = #tpu.dot_dimension_numbers<[1], [0], [0], [1], [0, 0, 1, 1], [], []>} : vector<1x32xf32>, vector<32x32xf32>, vector<1x32xf32> -> vector<1x32xf32>
    %57 = arith.addf %55, %56 : vector<1x32xf32>
    %58 = vector.extract_strided_slice %8 {offsets = [1, 0], sizes = [1, 32], strides = [1, 1]} : vector<8x32xf32> to vector<1x32xf32>
    %cst_28 = arith.constant dense<0.000000e+00> : vector<1x32xf32>
    %59 = tpu.matmul %53, %14, %cst_28 {dimension_numbers = #tpu.dot_dimension_numbers<[1], [0], [0], [1], [0, 0, 1, 1], [], []>} : vector<1x32xf32>, vector<32x32xf32>, vector<1x32xf32> -> vector<1x32xf32>
    %60 = arith.addf %58, %59 : vector<1x32xf32>
    %61 = vector.extract_strided_slice %9 {offsets = [1, 0], sizes = [1, 32], strides = [1, 1]} : vector<8x32xf32> to vector<1x32xf32>
    %cst_29 = arith.constant dense<0.000000e+00> : vector<1x32xf32>
    %62 = tpu.matmul %53, %16, %cst_29 {dimension_numbers = #tpu.dot_dimension_numbers<[1], [0], [0], [1], [0, 0, 1, 1], [], []>} : vector<1x32xf32>, vector<32x32xf32>, vector<1x32xf32> -> vector<1x32xf32>
    %63 = arith.addf %61, %62 : vector<1x32xf32>
    %64 = vector.extract_strided_slice %10 {offsets = [1, 0], sizes = [1, 32], strides = [1, 1]} : vector<8x32xf32> to vector<1x32xf32>
    %cst_30 = arith.constant dense<0.000000e+00> : vector<1x32xf32>
    %65 = tpu.matmul %53, %18, %cst_30 {dimension_numbers = #tpu.dot_dimension_numbers<[1], [0], [0], [1], [0, 0, 1, 1], [], []>} : vector<1x32xf32>, vector<32x32xf32>, vector<1x32xf32> -> vector<1x32xf32>
    %66 = arith.addf %64, %65 : vector<1x32xf32>
    %67 = arith.negf %57 : vector<1x32xf32>
    %68 = math.exp %67 : vector<1x32xf32>
    %cst_31 = arith.constant 1.000000e+00 : f32
    %69 = vector.broadcast %cst_31 : f32 to vector<1x32xf32>
    %70 = arith.addf %69, %68 : vector<1x32xf32>
    %71 = arith.divf %69, %70 : vector<1x32xf32>
    %72 = arith.negf %60 : vector<1x32xf32>
    %73 = math.exp %72 : vector<1x32xf32>
    %cst_32 = arith.constant 1.000000e+00 : f32
    %74 = vector.broadcast %cst_32 : f32 to vector<1x32xf32>
    %75 = arith.addf %74, %73 : vector<1x32xf32>
    %76 = arith.divf %74, %75 : vector<1x32xf32>
    %77 = math.tanh %63 : vector<1x32xf32>
    %78 = arith.negf %66 : vector<1x32xf32>
    %79 = math.exp %78 : vector<1x32xf32>
    %cst_33 = arith.constant 1.000000e+00 : f32
    %80 = vector.broadcast %cst_33 : f32 to vector<1x32xf32>
    %81 = arith.addf %80, %79 : vector<1x32xf32>
    %82 = arith.divf %80, %81 : vector<1x32xf32>
    %83 = arith.mulf %76, %51 : vector<1x32xf32>
    %84 = arith.mulf %71, %77 : vector<1x32xf32>
    %85 = arith.addf %83, %84 : vector<1x32xf32>
    %86 = math.tanh %85 : vector<1x32xf32>
    %87 = arith.mulf %82, %86 : vector<1x32xf32>
    %c1_34 = arith.constant 1 : index
    %c0_35 = arith.constant 0 : index
    %88 = vector.load %arg14[%c1_34, %c0_35] : memref<8x32xf32, #tpu.memory_space<vmem>>, vector<1x32xf32>
    tpu.vector_store %arg14[%c1_34, %c0_35], %87 {strides = array<i32>} : memref<8x32xf32, #tpu.memory_space<vmem>>, vector<1x32xf32>,
    %89 = vector.extract_strided_slice %7 {offsets = [2, 0], sizes = [1, 32], strides = [1, 1]} : vector<8x32xf32> to vector<1x32xf32>
    %cst_36 = arith.constant dense<0.000000e+00> : vector<1x32xf32>
    %90 = tpu.matmul %87, %12, %cst_36 {dimension_numbers = #tpu.dot_dimension_numbers<[1], [0], [0], [1], [0, 0, 1, 1], [], []>} : vector<1x32xf32>, vector<32x32xf32>, vector<1x32xf32> -> vector<1x32xf32>
    %91 = arith.addf %89, %90 : vector<1x32xf32>
    %92 = vector.extract_strided_slice %8 {offsets = [2, 0], sizes = [1, 32], strides = [1, 1]} : vector<8x32xf32> to vector<1x32xf32>
    %cst_37 = arith.constant dense<0.000000e+00> : vector<1x32xf32>
    %93 = tpu.matmul %87, %14, %cst_37 {dimension_numbers = #tpu.dot_dimension_numbers<[1], [0], [0], [1], [0, 0, 1, 1], [], []>} : vector<1x32xf32>, vector<32x32xf32>, vector<1x32xf32> -> vector<1x32xf32>
    %94 = arith.addf %92, %93 : vector<1x32xf32>
    %95 = vector.extract_strided_slice %9 {offsets = [2, 0], sizes = [1, 32], strides = [1, 1]} : vector<8x32xf32> to vector<1x32xf32>
    %cst_38 = arith.constant dense<0.000000e+00> : vector<1x32xf32>
    %96 = tpu.matmul %87, %16, %cst_38 {dimension_numbers = #tpu.dot_dimension_numbers<[1], [0], [0], [1], [0, 0, 1, 1], [], []>} : vector<1x32xf32>, vector<32x32xf32>, vector<1x32xf32> -> vector<1x32xf32>
    %97 = arith.addf %95, %96 : vector<1x32xf32>
    %98 = vector.extract_strided_slice %10 {offsets = [2, 0], sizes = [1, 32], strides = [1, 1]} : vector<8x32xf32> to vector<1x32xf32>
    %cst_39 = arith.constant dense<0.000000e+00> : vector<1x32xf32>
    %99 = tpu.matmul %87, %18, %cst_39 {dimension_numbers = #tpu.dot_dimension_numbers<[1], [0], [0], [1], [0, 0, 1, 1], [], []>} : vector<1x32xf32>, vector<32x32xf32>, vector<1x32xf32> -> vector<1x32xf32>
    %100 = arith.addf %98, %99 : vector<1x32xf32>
    %101 = arith.negf %91 : vector<1x32xf32>
    %102 = math.exp %101 : vector<1x32xf32>
    %cst_40 = arith.constant 1.000000e+00 : f32
    %103 = vector.broadcast %cst_40 : f32 to vector<1x32xf32>
    %104 = arith.addf %103, %102 : vector<1x32xf32>
    %105 = arith.divf %103, %104 : vector<1x32xf32>
    %106 = arith.negf %94 : vector<1x32xf32>
    %107 = math.exp %106 : vector<1x32xf32>
    %cst_41 = arith.constant 1.000000e+00 : f32
    %108 = vector.broadcast %cst_41 : f32 to vector<1x32xf32>
    %109 = arith.addf %108, %107 : vector<1x32xf32>
    %110 = arith.divf %108, %109 : vector<1x32xf32>
    %111 = math.tanh %97 : vector<1x32xf32>
    %112 = arith.negf %100 : vector<1x32xf32>
    %113 = math.exp %112 : vector<1x32xf32>
    %cst_42 = arith.constant 1.000000e+00 : f32
    %114 = vector.broadcast %cst_42 : f32 to vector<1x32xf32>
    %115 = arith.addf %114, %113 : vector<1x32xf32>
    %116 = arith.divf %114, %115 : vector<1x32xf32>
    %117 = arith.mulf %110, %85 : vector<1x32xf32>
    %118 = arith.mulf %105, %111 : vector<1x32xf32>
    %119 = arith.addf %117, %118 : vector<1x32xf32>
    %120 = math.tanh %119 : vector<1x32xf32>
    %121 = arith.mulf %116, %120 : vector<1x32xf32>
    %c2_43 = arith.constant 2 : index
    %c0_44 = arith.constant 0 : index
    %122 = vector.load %arg14[%c2_43, %c0_44] : memref<8x32xf32, #tpu.memory_space<vmem>>, vector<1x32xf32>
    tpu.vector_store %arg14[%c2_43, %c0_44], %121 {strides = array<i32>} : memref<8x32xf32, #tpu.memory_space<vmem>>, vector<1x32xf32>,
    %123 = vector.extract_strided_slice %7 {offsets = [3, 0], sizes = [1, 32], strides = [1, 1]} : vector<8x32xf32> to vector<1x32xf32>
    %cst_45 = arith.constant dense<0.000000e+00> : vector<1x32xf32>
    %124 = tpu.matmul %121, %12, %cst_45 {dimension_numbers = #tpu.dot_dimension_numbers<[1], [0], [0], [1], [0, 0, 1, 1], [], []>} : vector<1x32xf32>, vector<32x32xf32>, vector<1x32xf32> -> vector<1x32xf32>
    %125 = arith.addf %123, %124 : vector<1x32xf32>
    %126 = vector.extract_strided_slice %8 {offsets = [3, 0], sizes = [1, 32], strides = [1, 1]} : vector<8x32xf32> to vector<1x32xf32>
    %cst_46 = arith.constant dense<0.000000e+00> : vector<1x32xf32>
    %127 = tpu.matmul %121, %14, %cst_46 {dimension_numbers = #tpu.dot_dimension_numbers<[1], [0], [0], [1], [0, 0, 1, 1], [], []>} : vector<1x32xf32>, vector<32x32xf32>, vector<1x32xf32> -> vector<1x32xf32>
    %128 = arith.addf %126, %127 : vector<1x32xf32>
    %129 = vector.extract_strided_slice %9 {offsets = [3, 0], sizes = [1, 32], strides = [1, 1]} : vector<8x32xf32> to vector<1x32xf32>
    %cst_47 = arith.constant dense<0.000000e+00> : vector<1x32xf32>
    %130 = tpu.matmul %121, %16, %cst_47 {dimension_numbers = #tpu.dot_dimension_numbers<[1], [0], [0], [1], [0, 0, 1, 1], [], []>} : vector<1x32xf32>, vector<32x32xf32>, vector<1x32xf32> -> vector<1x32xf32>
    %131 = arith.addf %129, %130 : vector<1x32xf32>
    %132 = vector.extract_strided_slice %10 {offsets = [3, 0], sizes = [1, 32], strides = [1, 1]} : vector<8x32xf32> to vector<1x32xf32>
    %cst_48 = arith.constant dense<0.000000e+00> : vector<1x32xf32>
    %133 = tpu.matmul %121, %18, %cst_48 {dimension_numbers = #tpu.dot_dimension_numbers<[1], [0], [0], [1], [0, 0, 1, 1], [], []>} : vector<1x32xf32>, vector<32x32xf32>, vector<1x32xf32> -> vector<1x32xf32>
    %134 = arith.addf %132, %133 : vector<1x32xf32>
    %135 = arith.negf %125 : vector<1x32xf32>
    %136 = math.exp %135 : vector<1x32xf32>
    %cst_49 = arith.constant 1.000000e+00 : f32
    %137 = vector.broadcast %cst_49 : f32 to vector<1x32xf32>
    %138 = arith.addf %137, %136 : vector<1x32xf32>
    %139 = arith.divf %137, %138 : vector<1x32xf32>
    %140 = arith.negf %128 : vector<1x32xf32>
    %141 = math.exp %140 : vector<1x32xf32>
    %cst_50 = arith.constant 1.000000e+00 : f32
    %142 = vector.broadcast %cst_50 : f32 to vector<1x32xf32>
    %143 = arith.addf %142, %141 : vector<1x32xf32>
    %144 = arith.divf %142, %143 : vector<1x32xf32>
    %145 = math.tanh %131 : vector<1x32xf32>
    %146 = arith.negf %134 : vector<1x32xf32>
    %147 = math.exp %146 : vector<1x32xf32>
    %cst_51 = arith.constant 1.000000e+00 : f32
    %148 = vector.broadcast %cst_51 : f32 to vector<1x32xf32>
    %149 = arith.addf %148, %147 : vector<1x32xf32>
    %150 = arith.divf %148, %149 : vector<1x32xf32>
    %151 = arith.mulf %144, %119 : vector<1x32xf32>
    %152 = arith.mulf %139, %145 : vector<1x32xf32>
    %153 = arith.addf %151, %152 : vector<1x32xf32>
    %154 = math.tanh %153 : vector<1x32xf32>
    %155 = arith.mulf %150, %154 : vector<1x32xf32>
    %c3_52 = arith.constant 3 : index
    %c0_53 = arith.constant 0 : index
    %156 = vector.load %arg14[%c3_52, %c0_53] : memref<8x32xf32, #tpu.memory_space<vmem>>, vector<1x32xf32>
    tpu.vector_store %arg14[%c3_52, %c0_53], %155 {strides = array<i32>} : memref<8x32xf32, #tpu.memory_space<vmem>>, vector<1x32xf32>,
    %157 = vector.extract_strided_slice %7 {offsets = [4, 0], sizes = [1, 32], strides = [1, 1]} : vector<8x32xf32> to vector<1x32xf32>
    %cst_54 = arith.constant dense<0.000000e+00> : vector<1x32xf32>
    %158 = tpu.matmul %155, %12, %cst_54 {dimension_numbers = #tpu.dot_dimension_numbers<[1], [0], [0], [1], [0, 0, 1, 1], [], []>} : vector<1x32xf32>, vector<32x32xf32>, vector<1x32xf32> -> vector<1x32xf32>
    %159 = arith.addf %157, %158 : vector<1x32xf32>
    %160 = vector.extract_strided_slice %8 {offsets = [4, 0], sizes = [1, 32], strides = [1, 1]} : vector<8x32xf32> to vector<1x32xf32>
    %cst_55 = arith.constant dense<0.000000e+00> : vector<1x32xf32>
    %161 = tpu.matmul %155, %14, %cst_55 {dimension_numbers = #tpu.dot_dimension_numbers<[1], [0], [0], [1], [0, 0, 1, 1], [], []>} : vector<1x32xf32>, vector<32x32xf32>, vector<1x32xf32> -> vector<1x32xf32>
    %162 = arith.addf %160, %161 : vector<1x32xf32>
    %163 = vector.extract_strided_slice %9 {offsets = [4, 0], sizes = [1, 32], strides = [1, 1]} : vector<8x32xf32> to vector<1x32xf32>
    %cst_56 = arith.constant dense<0.000000e+00> : vector<1x32xf32>
    %164 = tpu.matmul %155, %16, %cst_56 {dimension_numbers = #tpu.dot_dimension_numbers<[1], [0], [0], [1], [0, 0, 1, 1], [], []>} : vector<1x32xf32>, vector<32x32xf32>, vector<1x32xf32> -> vector<1x32xf32>
    %165 = arith.addf %163, %164 : vector<1x32xf32>
    %166 = vector.extract_strided_slice %10 {offsets = [4, 0], sizes = [1, 32], strides = [1, 1]} : vector<8x32xf32> to vector<1x32xf32>
    %cst_57 = arith.constant dense<0.000000e+00> : vector<1x32xf32>
    %167 = tpu.matmul %155, %18, %cst_57 {dimension_numbers = #tpu.dot_dimension_numbers<[1], [0], [0], [1], [0, 0, 1, 1], [], []>} : vector<1x32xf32>, vector<32x32xf32>, vector<1x32xf32> -> vector<1x32xf32>
    %168 = arith.addf %166, %167 : vector<1x32xf32>
    %169 = arith.negf %159 : vector<1x32xf32>
    %170 = math.exp %169 : vector<1x32xf32>
    %cst_58 = arith.constant 1.000000e+00 : f32
    %171 = vector.broadcast %cst_58 : f32 to vector<1x32xf32>
    %172 = arith.addf %171, %170 : vector<1x32xf32>
    %173 = arith.divf %171, %172 : vector<1x32xf32>
    %174 = arith.negf %162 : vector<1x32xf32>
    %175 = math.exp %174 : vector<1x32xf32>
    %cst_59 = arith.constant 1.000000e+00 : f32
    %176 = vector.broadcast %cst_59 : f32 to vector<1x32xf32>
    %177 = arith.addf %176, %175 : vector<1x32xf32>
    %178 = arith.divf %176, %177 : vector<1x32xf32>
    %179 = math.tanh %165 : vector<1x32xf32>
    %180 = arith.negf %168 : vector<1x32xf32>
    %181 = math.exp %180 : vector<1x32xf32>
    %cst_60 = arith.constant 1.000000e+00 : f32
    %182 = vector.broadcast %cst_60 : f32 to vector<1x32xf32>
    %183 = arith.addf %182, %181 : vector<1x32xf32>
    %184 = arith.divf %182, %183 : vector<1x32xf32>
    %185 = arith.mulf %178, %153 : vector<1x32xf32>
    %186 = arith.mulf %173, %179 : vector<1x32xf32>
    %187 = arith.addf %185, %186 : vector<1x32xf32>
    %188 = math.tanh %187 : vector<1x32xf32>
    %189 = arith.mulf %184, %188 : vector<1x32xf32>
    %c4 = arith.constant 4 : index
    %c0_61 = arith.constant 0 : index
    %190 = vector.load %arg14[%c4, %c0_61] : memref<8x32xf32, #tpu.memory_space<vmem>>, vector<1x32xf32>
    tpu.vector_store %arg14[%c4, %c0_61], %189 {strides = array<i32>} : memref<8x32xf32, #tpu.memory_space<vmem>>, vector<1x32xf32>,
    %191 = vector.extract_strided_slice %7 {offsets = [5, 0], sizes = [1, 32], strides = [1, 1]} : vector<8x32xf32> to vector<1x32xf32>
    %cst_62 = arith.constant dense<0.000000e+00> : vector<1x32xf32>
    %192 = tpu.matmul %189, %12, %cst_62 {dimension_numbers = #tpu.dot_dimension_numbers<[1], [0], [0], [1], [0, 0, 1, 1], [], []>} : vector<1x32xf32>, vector<32x32xf32>, vector<1x32xf32> -> vector<1x32xf32>
    %193 = arith.addf %191, %192 : vector<1x32xf32>
    %194 = vector.extract_strided_slice %8 {offsets = [5, 0], sizes = [1, 32], strides = [1, 1]} : vector<8x32xf32> to vector<1x32xf32>
    %cst_63 = arith.constant dense<0.000000e+00> : vector<1x32xf32>
    %195 = tpu.matmul %189, %14, %cst_63 {dimension_numbers = #tpu.dot_dimension_numbers<[1], [0], [0], [1], [0, 0, 1, 1], [], []>} : vector<1x32xf32>, vector<32x32xf32>, vector<1x32xf32> -> vector<1x32xf32>
    %196 = arith.addf %194, %195 : vector<1x32xf32>
    %197 = vector.extract_strided_slice %9 {offsets = [5, 0], sizes = [1, 32], strides = [1, 1]} : vector<8x32xf32> to vector<1x32xf32>
    %cst_64 = arith.constant dense<0.000000e+00> : vector<1x32xf32>
    %198 = tpu.matmul %189, %16, %cst_64 {dimension_numbers = #tpu.dot_dimension_numbers<[1], [0], [0], [1], [0, 0, 1, 1], [], []>} : vector<1x32xf32>, vector<32x32xf32>, vector<1x32xf32> -> vector<1x32xf32>
    %199 = arith.addf %197, %198 : vector<1x32xf32>
    %200 = vector.extract_strided_slice %10 {offsets = [5, 0], sizes = [1, 32], strides = [1, 1]} : vector<8x32xf32> to vector<1x32xf32>
    %cst_65 = arith.constant dense<0.000000e+00> : vector<1x32xf32>
    %201 = tpu.matmul %189, %18, %cst_65 {dimension_numbers = #tpu.dot_dimension_numbers<[1], [0], [0], [1], [0, 0, 1, 1], [], []>} : vector<1x32xf32>, vector<32x32xf32>, vector<1x32xf32> -> vector<1x32xf32>
    %202 = arith.addf %200, %201 : vector<1x32xf32>
    %203 = arith.negf %193 : vector<1x32xf32>
    %204 = math.exp %203 : vector<1x32xf32>
    %cst_66 = arith.constant 1.000000e+00 : f32
    %205 = vector.broadcast %cst_66 : f32 to vector<1x32xf32>
    %206 = arith.addf %205, %204 : vector<1x32xf32>
    %207 = arith.divf %205, %206 : vector<1x32xf32>
    %208 = arith.negf %196 : vector<1x32xf32>
    %209 = math.exp %208 : vector<1x32xf32>
    %cst_67 = arith.constant 1.000000e+00 : f32
    %210 = vector.broadcast %cst_67 : f32 to vector<1x32xf32>
    %211 = arith.addf %210, %209 : vector<1x32xf32>
    %212 = arith.divf %210, %211 : vector<1x32xf32>
    %213 = math.tanh %199 : vector<1x32xf32>
    %214 = arith.negf %202 : vector<1x32xf32>
    %215 = math.exp %214 : vector<1x32xf32>
    %cst_68 = arith.constant 1.000000e+00 : f32
    %216 = vector.broadcast %cst_68 : f32 to vector<1x32xf32>
    %217 = arith.addf %216, %215 : vector<1x32xf32>
    %218 = arith.divf %216, %217 : vector<1x32xf32>
    %219 = arith.mulf %212, %187 : vector<1x32xf32>
    %220 = arith.mulf %207, %213 : vector<1x32xf32>
    %221 = arith.addf %219, %220 : vector<1x32xf32>
    %222 = math.tanh %221 : vector<1x32xf32>
    %223 = arith.mulf %218, %222 : vector<1x32xf32>
    %c5 = arith.constant 5 : index
    %c0_69 = arith.constant 0 : index
    %224 = vector.load %arg14[%c5, %c0_69] : memref<8x32xf32, #tpu.memory_space<vmem>>, vector<1x32xf32>
    tpu.vector_store %arg14[%c5, %c0_69], %223 {strides = array<i32>} : memref<8x32xf32, #tpu.memory_space<vmem>>, vector<1x32xf32>,
    %225 = vector.extract_strided_slice %7 {offsets = [6, 0], sizes = [1, 32], strides = [1, 1]} : vector<8x32xf32> to vector<1x32xf32>
    %cst_70 = arith.constant dense<0.000000e+00> : vector<1x32xf32>
    %226 = tpu.matmul %223, %12, %cst_70 {dimension_numbers = #tpu.dot_dimension_numbers<[1], [0], [0], [1], [0, 0, 1, 1], [], []>} : vector<1x32xf32>, vector<32x32xf32>, vector<1x32xf32> -> vector<1x32xf32>
    %227 = arith.addf %225, %226 : vector<1x32xf32>
    %228 = vector.extract_strided_slice %8 {offsets = [6, 0], sizes = [1, 32], strides = [1, 1]} : vector<8x32xf32> to vector<1x32xf32>
    %cst_71 = arith.constant dense<0.000000e+00> : vector<1x32xf32>
    %229 = tpu.matmul %223, %14, %cst_71 {dimension_numbers = #tpu.dot_dimension_numbers<[1], [0], [0], [1], [0, 0, 1, 1], [], []>} : vector<1x32xf32>, vector<32x32xf32>, vector<1x32xf32> -> vector<1x32xf32>
    %230 = arith.addf %228, %229 : vector<1x32xf32>
    %231 = vector.extract_strided_slice %9 {offsets = [6, 0], sizes = [1, 32], strides = [1, 1]} : vector<8x32xf32> to vector<1x32xf32>
    %cst_72 = arith.constant dense<0.000000e+00> : vector<1x32xf32>
    %232 = tpu.matmul %223, %16, %cst_72 {dimension_numbers = #tpu.dot_dimension_numbers<[1], [0], [0], [1], [0, 0, 1, 1], [], []>} : vector<1x32xf32>, vector<32x32xf32>, vector<1x32xf32> -> vector<1x32xf32>
    %233 = arith.addf %231, %232 : vector<1x32xf32>
    %234 = vector.extract_strided_slice %10 {offsets = [6, 0], sizes = [1, 32], strides = [1, 1]} : vector<8x32xf32> to vector<1x32xf32>
    %cst_73 = arith.constant dense<0.000000e+00> : vector<1x32xf32>
    %235 = tpu.matmul %223, %18, %cst_73 {dimension_numbers = #tpu.dot_dimension_numbers<[1], [0], [0], [1], [0, 0, 1, 1], [], []>} : vector<1x32xf32>, vector<32x32xf32>, vector<1x32xf32> -> vector<1x32xf32>
    %236 = arith.addf %234, %235 : vector<1x32xf32>
    %237 = arith.negf %227 : vector<1x32xf32>
    %238 = math.exp %237 : vector<1x32xf32>
    %cst_74 = arith.constant 1.000000e+00 : f32
    %239 = vector.broadcast %cst_74 : f32 to vector<1x32xf32>
    %240 = arith.addf %239, %238 : vector<1x32xf32>
    %241 = arith.divf %239, %240 : vector<1x32xf32>
    %242 = arith.negf %230 : vector<1x32xf32>
    %243 = math.exp %242 : vector<1x32xf32>
    %cst_75 = arith.constant 1.000000e+00 : f32
    %244 = vector.broadcast %cst_75 : f32 to vector<1x32xf32>
    %245 = arith.addf %244, %243 : vector<1x32xf32>
    %246 = arith.divf %244, %245 : vector<1x32xf32>
    %247 = math.tanh %233 : vector<1x32xf32>
    %248 = arith.negf %236 : vector<1x32xf32>
    %249 = math.exp %248 : vector<1x32xf32>
    %cst_76 = arith.constant 1.000000e+00 : f32
    %250 = vector.broadcast %cst_76 : f32 to vector<1x32xf32>
    %251 = arith.addf %250, %249 : vector<1x32xf32>
    %252 = arith.divf %250, %251 : vector<1x32xf32>
    %253 = arith.mulf %246, %221 : vector<1x32xf32>
    %254 = arith.mulf %241, %247 : vector<1x32xf32>
    %255 = arith.addf %253, %254 : vector<1x32xf32>
    %256 = math.tanh %255 : vector<1x32xf32>
    %257 = arith.mulf %252, %256 : vector<1x32xf32>
    %c6 = arith.constant 6 : index
    %c0_77 = arith.constant 0 : index
    %258 = vector.load %arg14[%c6, %c0_77] : memref<8x32xf32, #tpu.memory_space<vmem>>, vector<1x32xf32>
    tpu.vector_store %arg14[%c6, %c0_77], %257 {strides = array<i32>} : memref<8x32xf32, #tpu.memory_space<vmem>>, vector<1x32xf32>,
    %259 = vector.extract_strided_slice %7 {offsets = [7, 0], sizes = [1, 32], strides = [1, 1]} : vector<8x32xf32> to vector<1x32xf32>
    %cst_78 = arith.constant dense<0.000000e+00> : vector<1x32xf32>
    %260 = tpu.matmul %257, %12, %cst_78 {dimension_numbers = #tpu.dot_dimension_numbers<[1], [0], [0], [1], [0, 0, 1, 1], [], []>} : vector<1x32xf32>, vector<32x32xf32>, vector<1x32xf32> -> vector<1x32xf32>
    %261 = arith.addf %259, %260 : vector<1x32xf32>
    %262 = vector.extract_strided_slice %8 {offsets = [7, 0], sizes = [1, 32], strides = [1, 1]} : vector<8x32xf32> to vector<1x32xf32>
    %cst_79 = arith.constant dense<0.000000e+00> : vector<1x32xf32>
    %263 = tpu.matmul %257, %14, %cst_79 {dimension_numbers = #tpu.dot_dimension_numbers<[1], [0], [0], [1], [0, 0, 1, 1], [], []>} : vector<1x32xf32>, vector<32x32xf32>, vector<1x32xf32> -> vector<1x32xf32>
    %264 = arith.addf %262, %263 : vector<1x32xf32>
    %265 = vector.extract_strided_slice %9 {offsets = [7, 0], sizes = [1, 32], strides = [1, 1]} : vector<8x32xf32> to vector<1x32xf32>
    %cst_80 = arith.constant dense<0.000000e+00> : vector<1x32xf32>
    %266 = tpu.matmul %257, %16, %cst_80 {dimension_numbers = #tpu.dot_dimension_numbers<[1], [0], [0], [1], [0, 0, 1, 1], [], []>} : vector<1x32xf32>, vector<32x32xf32>, vector<1x32xf32> -> vector<1x32xf32>
    %267 = arith.addf %265, %266 : vector<1x32xf32>
    %268 = vector.extract_strided_slice %10 {offsets = [7, 0], sizes = [1, 32], strides = [1, 1]} : vector<8x32xf32> to vector<1x32xf32>
    %cst_81 = arith.constant dense<0.000000e+00> : vector<1x32xf32>
    %269 = tpu.matmul %257, %18, %cst_81 {dimension_numbers = #tpu.dot_dimension_numbers<[1], [0], [0], [1], [0, 0, 1, 1], [], []>} : vector<1x32xf32>, vector<32x32xf32>, vector<1x32xf32> -> vector<1x32xf32>
    %270 = arith.addf %268, %269 : vector<1x32xf32>
    %271 = arith.negf %261 : vector<1x32xf32>
    %272 = math.exp %271 : vector<1x32xf32>
    %cst_82 = arith.constant 1.000000e+00 : f32
    %273 = vector.broadcast %cst_82 : f32 to vector<1x32xf32>
    %274 = arith.addf %273, %272 : vector<1x32xf32>
    %275 = arith.divf %273, %274 : vector<1x32xf32>
    %276 = arith.negf %264 : vector<1x32xf32>
    %277 = math.exp %276 : vector<1x32xf32>
    %cst_83 = arith.constant 1.000000e+00 : f32
    %278 = vector.broadcast %cst_83 : f32 to vector<1x32xf32>
    %279 = arith.addf %278, %277 : vector<1x32xf32>
    %280 = arith.divf %278, %279 : vector<1x32xf32>
    %281 = math.tanh %267 : vector<1x32xf32>
    %282 = arith.negf %270 : vector<1x32xf32>
    %283 = math.exp %282 : vector<1x32xf32>
    %cst_84 = arith.constant 1.000000e+00 : f32
    %284 = vector.broadcast %cst_84 : f32 to vector<1x32xf32>
    %285 = arith.addf %284, %283 : vector<1x32xf32>
    %286 = arith.divf %284, %285 : vector<1x32xf32>
    %287 = arith.mulf %280, %255 : vector<1x32xf32>
    %288 = arith.mulf %275, %281 : vector<1x32xf32>
    %289 = arith.addf %287, %288 : vector<1x32xf32>
    %290 = math.tanh %289 : vector<1x32xf32>
    %291 = arith.mulf %286, %290 : vector<1x32xf32>
    %c7 = arith.constant 7 : index
    %c0_85 = arith.constant 0 : index
    %292 = vector.load %arg14[%c7, %c0_85] : memref<8x32xf32, #tpu.memory_space<vmem>>, vector<1x32xf32>
    tpu.vector_store %arg14[%c7, %c0_85], %291 {strides = array<i32>} : memref<8x32xf32, #tpu.memory_space<vmem>>, vector<1x32xf32>,
    %c0_86 = arith.constant 0 : index
    %c0_87 = arith.constant 0 : index
    %293 = vector.load %arg14[%c0_86, %c0_87] : memref<8x32xf32, #tpu.memory_space<vmem>>, vector<8x32xf32>
    %c0_88 = arith.constant 0 : index
    %c0_89 = arith.constant 0 : index
    %294 = vector.load %arg4[%c0_88, %c0_89] : memref<32x128xbf16, #tpu.memory_space<vmem>>, vector<32x128xbf16>
    %c0_90 = arith.constant 0 : index
    %c0_91 = arith.constant 0 : index
    %295 = vector.load %arg6[%c0_90, %c0_91] : memref<1x128xf32, #tpu.memory_space<vmem>>, vector<1x128xf32>
    %296 = arith.truncf %293 : vector<8x32xf32> to vector<8x32xbf16>
    %cst_92 = arith.constant dense<0.000000e+00> : vector<8x128xf32>
    %297 = tpu.matmul %296, %294, %cst_92 {dimension_numbers = #tpu.dot_dimension_numbers<[1], [0], [0], [1], [0, 0, 1, 1], [], []>} : vector<8x32xbf16>, vector<32x128xbf16>, vector<8x128xf32> -> vector<8x128xf32>
    %298 = vector.broadcast %295 : vector<1x128xf32> to vector<8x128xf32>
    %299 = arith.addf %297, %298 : vector<8x128xf32>
    %300 = vector.extract_strided_slice %299 {offsets = [0, 0], sizes = [8, 32], strides = [1, 1]} : vector<8x128xf32> to vector<8x32xf32>
    %301 = vector.extract_strided_slice %299 {offsets = [0, 32], sizes = [8, 32], strides = [1, 1]} : vector<8x128xf32> to vector<8x32xf32>
    %302 = vector.extract_strided_slice %299 {offsets = [0, 64], sizes = [8, 32], strides = [1, 1]} : vector<8x128xf32> to vector<8x32xf32>
    %303 = vector.extract_strided_slice %299 {offsets = [0, 96], sizes = [8, 32], strides = [1, 1]} : vector<8x128xf32> to vector<8x32xf32>
    %c0_93 = arith.constant 0 : index
    %c0_94 = arith.constant 0 : index
    %c0_95 = arith.constant 0 : index
    %304 = vector.load %arg5[%c0_93, %c0_94, %c0_95] : memref<4x32x32xf32, #tpu.memory_space<vmem>>, vector<1x32x32xf32>
    %305 = vector.shape_cast %304 : vector<1x32x32xf32> to vector<32x32xf32>
    %c1_96 = arith.constant 1 : index
    %c0_97 = arith.constant 0 : index
    %c0_98 = arith.constant 0 : index
    %306 = vector.load %arg5[%c1_96, %c0_97, %c0_98] : memref<4x32x32xf32, #tpu.memory_space<vmem>>, vector<1x32x32xf32>
    %307 = vector.shape_cast %306 : vector<1x32x32xf32> to vector<32x32xf32>
    %c2_99 = arith.constant 2 : index
    %c0_100 = arith.constant 0 : index
    %c0_101 = arith.constant 0 : index
    %308 = vector.load %arg5[%c2_99, %c0_100, %c0_101] : memref<4x32x32xf32, #tpu.memory_space<vmem>>, vector<1x32x32xf32>
    %309 = vector.shape_cast %308 : vector<1x32x32xf32> to vector<32x32xf32>
    %c3_102 = arith.constant 3 : index
    %c0_103 = arith.constant 0 : index
    %c0_104 = arith.constant 0 : index
    %310 = vector.load %arg5[%c3_102, %c0_103, %c0_104] : memref<4x32x32xf32, #tpu.memory_space<vmem>>, vector<1x32x32xf32>
    %311 = vector.shape_cast %310 : vector<1x32x32xf32> to vector<32x32xf32>
    %c1_105 = arith.constant 1 : index
    %c0_106 = arith.constant 0 : index
    %312 = vector.load %arg9[%c1_105, %c0_106] : memref<2x32xf32, #tpu.memory_space<vmem>>, vector<1x32xf32>
    %c1_107 = arith.constant 1 : index
    %c0_108 = arith.constant 0 : index
    %313 = vector.load %arg10[%c1_107, %c0_108] : memref<2x32xf32, #tpu.memory_space<vmem>>, vector<1x32xf32>
    %314 = vector.extract_strided_slice %300 {offsets = [0, 0], sizes = [1, 32], strides = [1, 1]} : vector<8x32xf32> to vector<1x32xf32>
    %cst_109 = arith.constant dense<0.000000e+00> : vector<1x32xf32>
    %315 = tpu.matmul %312, %305, %cst_109 {dimension_numbers = #tpu.dot_dimension_numbers<[1], [0], [0], [1], [0, 0, 1, 1], [], []>} : vector<1x32xf32>, vector<32x32xf32>, vector<1x32xf32> -> vector<1x32xf32>
    %316 = arith.addf %314, %315 : vector<1x32xf32>
    %317 = vector.extract_strided_slice %301 {offsets = [0, 0], sizes = [1, 32], strides = [1, 1]} : vector<8x32xf32> to vector<1x32xf32>
    %cst_110 = arith.constant dense<0.000000e+00> : vector<1x32xf32>
    %318 = tpu.matmul %312, %307, %cst_110 {dimension_numbers = #tpu.dot_dimension_numbers<[1], [0], [0], [1], [0, 0, 1, 1], [], []>} : vector<1x32xf32>, vector<32x32xf32>, vector<1x32xf32> -> vector<1x32xf32>
    %319 = arith.addf %317, %318 : vector<1x32xf32>
    %320 = vector.extract_strided_slice %302 {offsets = [0, 0], sizes = [1, 32], strides = [1, 1]} : vector<8x32xf32> to vector<1x32xf32>
    %cst_111 = arith.constant dense<0.000000e+00> : vector<1x32xf32>
    %321 = tpu.matmul %312, %309, %cst_111 {dimension_numbers = #tpu.dot_dimension_numbers<[1], [0], [0], [1], [0, 0, 1, 1], [], []>} : vector<1x32xf32>, vector<32x32xf32>, vector<1x32xf32> -> vector<1x32xf32>
    %322 = arith.addf %320, %321 : vector<1x32xf32>
    %323 = vector.extract_strided_slice %303 {offsets = [0, 0], sizes = [1, 32], strides = [1, 1]} : vector<8x32xf32> to vector<1x32xf32>
    %cst_112 = arith.constant dense<0.000000e+00> : vector<1x32xf32>
    %324 = tpu.matmul %312, %311, %cst_112 {dimension_numbers = #tpu.dot_dimension_numbers<[1], [0], [0], [1], [0, 0, 1, 1], [], []>} : vector<1x32xf32>, vector<32x32xf32>, vector<1x32xf32> -> vector<1x32xf32>
    %325 = arith.addf %323, %324 : vector<1x32xf32>
    %326 = arith.negf %316 : vector<1x32xf32>
    %327 = math.exp %326 : vector<1x32xf32>
    %cst_113 = arith.constant 1.000000e+00 : f32
    %328 = vector.broadcast %cst_113 : f32 to vector<1x32xf32>
    %329 = arith.addf %328, %327 : vector<1x32xf32>
    %330 = arith.divf %328, %329 : vector<1x32xf32>
    %331 = arith.negf %319 : vector<1x32xf32>
    %332 = math.exp %331 : vector<1x32xf32>
    %cst_114 = arith.constant 1.000000e+00 : f32
    %333 = vector.broadcast %cst_114 : f32 to vector<1x32xf32>
    %334 = arith.addf %333, %332 : vector<1x32xf32>
    %335 = arith.divf %333, %334 : vector<1x32xf32>
    %336 = math.tanh %322 : vector<1x32xf32>
    %337 = arith.negf %325 : vector<1x32xf32>
    %338 = math.exp %337 : vector<1x32xf32>
    %cst_115 = arith.constant 1.000000e+00 : f32
    %339 = vector.broadcast %cst_115 : f32 to vector<1x32xf32>
    %340 = arith.addf %339, %338 : vector<1x32xf32>
    %341 = arith.divf %339, %340 : vector<1x32xf32>
    %342 = arith.mulf %335, %313 : vector<1x32xf32>
    %343 = arith.mulf %330, %336 : vector<1x32xf32>
    %344 = arith.addf %342, %343 : vector<1x32xf32>
    %345 = math.tanh %344 : vector<1x32xf32>
    %346 = arith.mulf %341, %345 : vector<1x32xf32>
    %c0_116 = arith.constant 0 : index
    %c0_117 = arith.constant 0 : index
    %347 = vector.load %arg14[%c0_116, %c0_117] : memref<8x32xf32, #tpu.memory_space<vmem>>, vector<1x32xf32>
    tpu.vector_store %arg14[%c0_116, %c0_117], %346 {strides = array<i32>} : memref<8x32xf32, #tpu.memory_space<vmem>>, vector<1x32xf32>,
    %348 = vector.extract_strided_slice %300 {offsets = [1, 0], sizes = [1, 32], strides = [1, 1]} : vector<8x32xf32> to vector<1x32xf32>
    %cst_118 = arith.constant dense<0.000000e+00> : vector<1x32xf32>
    %349 = tpu.matmul %346, %305, %cst_118 {dimension_numbers = #tpu.dot_dimension_numbers<[1], [0], [0], [1], [0, 0, 1, 1], [], []>} : vector<1x32xf32>, vector<32x32xf32>, vector<1x32xf32> -> vector<1x32xf32>
    %350 = arith.addf %348, %349 : vector<1x32xf32>
    %351 = vector.extract_strided_slice %301 {offsets = [1, 0], sizes = [1, 32], strides = [1, 1]} : vector<8x32xf32> to vector<1x32xf32>
    %cst_119 = arith.constant dense<0.000000e+00> : vector<1x32xf32>
    %352 = tpu.matmul %346, %307, %cst_119 {dimension_numbers = #tpu.dot_dimension_numbers<[1], [0], [0], [1], [0, 0, 1, 1], [], []>} : vector<1x32xf32>, vector<32x32xf32>, vector<1x32xf32> -> vector<1x32xf32>
    %353 = arith.addf %351, %352 : vector<1x32xf32>
    %354 = vector.extract_strided_slice %302 {offsets = [1, 0], sizes = [1, 32], strides = [1, 1]} : vector<8x32xf32> to vector<1x32xf32>
    %cst_120 = arith.constant dense<0.000000e+00> : vector<1x32xf32>
    %355 = tpu.matmul %346, %309, %cst_120 {dimension_numbers = #tpu.dot_dimension_numbers<[1], [0], [0], [1], [0, 0, 1, 1], [], []>} : vector<1x32xf32>, vector<32x32xf32>, vector<1x32xf32> -> vector<1x32xf32>
    %356 = arith.addf %354, %355 : vector<1x32xf32>
    %357 = vector.extract_strided_slice %303 {offsets = [1, 0], sizes = [1, 32], strides = [1, 1]} : vector<8x32xf32> to vector<1x32xf32>
    %cst_121 = arith.constant dense<0.000000e+00> : vector<1x32xf32>
    %358 = tpu.matmul %346, %311, %cst_121 {dimension_numbers = #tpu.dot_dimension_numbers<[1], [0], [0], [1], [0, 0, 1, 1], [], []>} : vector<1x32xf32>, vector<32x32xf32>, vector<1x32xf32> -> vector<1x32xf32>
    %359 = arith.addf %357, %358 : vector<1x32xf32>
    %360 = arith.negf %350 : vector<1x32xf32>
    %361 = math.exp %360 : vector<1x32xf32>
    %cst_122 = arith.constant 1.000000e+00 : f32
    %362 = vector.broadcast %cst_122 : f32 to vector<1x32xf32>
    %363 = arith.addf %362, %361 : vector<1x32xf32>
    %364 = arith.divf %362, %363 : vector<1x32xf32>
    %365 = arith.negf %353 : vector<1x32xf32>
    %366 = math.exp %365 : vector<1x32xf32>
    %cst_123 = arith.constant 1.000000e+00 : f32
    %367 = vector.broadcast %cst_123 : f32 to vector<1x32xf32>
    %368 = arith.addf %367, %366 : vector<1x32xf32>
    %369 = arith.divf %367, %368 : vector<1x32xf32>
    %370 = math.tanh %356 : vector<1x32xf32>
    %371 = arith.negf %359 : vector<1x32xf32>
    %372 = math.exp %371 : vector<1x32xf32>
    %cst_124 = arith.constant 1.000000e+00 : f32
    %373 = vector.broadcast %cst_124 : f32 to vector<1x32xf32>
    %374 = arith.addf %373, %372 : vector<1x32xf32>
    %375 = arith.divf %373, %374 : vector<1x32xf32>
    %376 = arith.mulf %369, %344 : vector<1x32xf32>
    %377 = arith.mulf %364, %370 : vector<1x32xf32>
    %378 = arith.addf %376, %377 : vector<1x32xf32>
    %379 = math.tanh %378 : vector<1x32xf32>
    %380 = arith.mulf %375, %379 : vector<1x32xf32>
    %c1_125 = arith.constant 1 : index
    %c0_126 = arith.constant 0 : index
    %381 = vector.load %arg14[%c1_125, %c0_126] : memref<8x32xf32, #tpu.memory_space<vmem>>, vector<1x32xf32>
    tpu.vector_store %arg14[%c1_125, %c0_126], %380 {strides = array<i32>} : memref<8x32xf32, #tpu.memory_space<vmem>>, vector<1x32xf32>,
    %382 = vector.extract_strided_slice %300 {offsets = [2, 0], sizes = [1, 32], strides = [1, 1]} : vector<8x32xf32> to vector<1x32xf32>
    %cst_127 = arith.constant dense<0.000000e+00> : vector<1x32xf32>
    %383 = tpu.matmul %380, %305, %cst_127 {dimension_numbers = #tpu.dot_dimension_numbers<[1], [0], [0], [1], [0, 0, 1, 1], [], []>} : vector<1x32xf32>, vector<32x32xf32>, vector<1x32xf32> -> vector<1x32xf32>
    %384 = arith.addf %382, %383 : vector<1x32xf32>
    %385 = vector.extract_strided_slice %301 {offsets = [2, 0], sizes = [1, 32], strides = [1, 1]} : vector<8x32xf32> to vector<1x32xf32>
    %cst_128 = arith.constant dense<0.000000e+00> : vector<1x32xf32>
    %386 = tpu.matmul %380, %307, %cst_128 {dimension_numbers = #tpu.dot_dimension_numbers<[1], [0], [0], [1], [0, 0, 1, 1], [], []>} : vector<1x32xf32>, vector<32x32xf32>, vector<1x32xf32> -> vector<1x32xf32>
    %387 = arith.addf %385, %386 : vector<1x32xf32>
    %388 = vector.extract_strided_slice %302 {offsets = [2, 0], sizes = [1, 32], strides = [1, 1]} : vector<8x32xf32> to vector<1x32xf32>
    %cst_129 = arith.constant dense<0.000000e+00> : vector<1x32xf32>
    %389 = tpu.matmul %380, %309, %cst_129 {dimension_numbers = #tpu.dot_dimension_numbers<[1], [0], [0], [1], [0, 0, 1, 1], [], []>} : vector<1x32xf32>, vector<32x32xf32>, vector<1x32xf32> -> vector<1x32xf32>
    %390 = arith.addf %388, %389 : vector<1x32xf32>
    %391 = vector.extract_strided_slice %303 {offsets = [2, 0], sizes = [1, 32], strides = [1, 1]} : vector<8x32xf32> to vector<1x32xf32>
    %cst_130 = arith.constant dense<0.000000e+00> : vector<1x32xf32>
    %392 = tpu.matmul %380, %311, %cst_130 {dimension_numbers = #tpu.dot_dimension_numbers<[1], [0], [0], [1], [0, 0, 1, 1], [], []>} : vector<1x32xf32>, vector<32x32xf32>, vector<1x32xf32> -> vector<1x32xf32>
    %393 = arith.addf %391, %392 : vector<1x32xf32>
    %394 = arith.negf %384 : vector<1x32xf32>
    %395 = math.exp %394 : vector<1x32xf32>
    %cst_131 = arith.constant 1.000000e+00 : f32
    %396 = vector.broadcast %cst_131 : f32 to vector<1x32xf32>
    %397 = arith.addf %396, %395 : vector<1x32xf32>
    %398 = arith.divf %396, %397 : vector<1x32xf32>
    %399 = arith.negf %387 : vector<1x32xf32>
    %400 = math.exp %399 : vector<1x32xf32>
    %cst_132 = arith.constant 1.000000e+00 : f32
    %401 = vector.broadcast %cst_132 : f32 to vector<1x32xf32>
    %402 = arith.addf %401, %400 : vector<1x32xf32>
    %403 = arith.divf %401, %402 : vector<1x32xf32>
    %404 = math.tanh %390 : vector<1x32xf32>
    %405 = arith.negf %393 : vector<1x32xf32>
    %406 = math.exp %405 : vector<1x32xf32>
    %cst_133 = arith.constant 1.000000e+00 : f32
    %407 = vector.broadcast %cst_133 : f32 to vector<1x32xf32>
    %408 = arith.addf %407, %406 : vector<1x32xf32>
    %409 = arith.divf %407, %408 : vector<1x32xf32>
    %410 = arith.mulf %403, %378 : vector<1x32xf32>
    %411 = arith.mulf %398, %404 : vector<1x32xf32>
    %412 = arith.addf %410, %411 : vector<1x32xf32>
    %413 = math.tanh %412 : vector<1x32xf32>
    %414 = arith.mulf %409, %413 : vector<1x32xf32>
    %c2_134 = arith.constant 2 : index
    %c0_135 = arith.constant 0 : index
    %415 = vector.load %arg14[%c2_134, %c0_135] : memref<8x32xf32, #tpu.memory_space<vmem>>, vector<1x32xf32>
    tpu.vector_store %arg14[%c2_134, %c0_135], %414 {strides = array<i32>} : memref<8x32xf32, #tpu.memory_space<vmem>>, vector<1x32xf32>,
    %416 = vector.extract_strided_slice %300 {offsets = [3, 0], sizes = [1, 32], strides = [1, 1]} : vector<8x32xf32> to vector<1x32xf32>
    %cst_136 = arith.constant dense<0.000000e+00> : vector<1x32xf32>
    %417 = tpu.matmul %414, %305, %cst_136 {dimension_numbers = #tpu.dot_dimension_numbers<[1], [0], [0], [1], [0, 0, 1, 1], [], []>} : vector<1x32xf32>, vector<32x32xf32>, vector<1x32xf32> -> vector<1x32xf32>
    %418 = arith.addf %416, %417 : vector<1x32xf32>
    %419 = vector.extract_strided_slice %301 {offsets = [3, 0], sizes = [1, 32], strides = [1, 1]} : vector<8x32xf32> to vector<1x32xf32>
    %cst_137 = arith.constant dense<0.000000e+00> : vector<1x32xf32>
    %420 = tpu.matmul %414, %307, %cst_137 {dimension_numbers = #tpu.dot_dimension_numbers<[1], [0], [0], [1], [0, 0, 1, 1], [], []>} : vector<1x32xf32>, vector<32x32xf32>, vector<1x32xf32> -> vector<1x32xf32>
    %421 = arith.addf %419, %420 : vector<1x32xf32>
    %422 = vector.extract_strided_slice %302 {offsets = [3, 0], sizes = [1, 32], strides = [1, 1]} : vector<8x32xf32> to vector<1x32xf32>
    %cst_138 = arith.constant dense<0.000000e+00> : vector<1x32xf32>
    %423 = tpu.matmul %414, %309, %cst_138 {dimension_numbers = #tpu.dot_dimension_numbers<[1], [0], [0], [1], [0, 0, 1, 1], [], []>} : vector<1x32xf32>, vector<32x32xf32>, vector<1x32xf32> -> vector<1x32xf32>
    %424 = arith.addf %422, %423 : vector<1x32xf32>
    %425 = vector.extract_strided_slice %303 {offsets = [3, 0], sizes = [1, 32], strides = [1, 1]} : vector<8x32xf32> to vector<1x32xf32>
    %cst_139 = arith.constant dense<0.000000e+00> : vector<1x32xf32>
    %426 = tpu.matmul %414, %311, %cst_139 {dimension_numbers = #tpu.dot_dimension_numbers<[1], [0], [0], [1], [0, 0, 1, 1], [], []>} : vector<1x32xf32>, vector<32x32xf32>, vector<1x32xf32> -> vector<1x32xf32>
    %427 = arith.addf %425, %426 : vector<1x32xf32>
    %428 = arith.negf %418 : vector<1x32xf32>
    %429 = math.exp %428 : vector<1x32xf32>
    %cst_140 = arith.constant 1.000000e+00 : f32
    %430 = vector.broadcast %cst_140 : f32 to vector<1x32xf32>
    %431 = arith.addf %430, %429 : vector<1x32xf32>
    %432 = arith.divf %430, %431 : vector<1x32xf32>
    %433 = arith.negf %421 : vector<1x32xf32>
    %434 = math.exp %433 : vector<1x32xf32>
    %cst_141 = arith.constant 1.000000e+00 : f32
    %435 = vector.broadcast %cst_141 : f32 to vector<1x32xf32>
    %436 = arith.addf %435, %434 : vector<1x32xf32>
    %437 = arith.divf %435, %436 : vector<1x32xf32>
    %438 = math.tanh %424 : vector<1x32xf32>
    %439 = arith.negf %427 : vector<1x32xf32>
    %440 = math.exp %439 : vector<1x32xf32>
    %cst_142 = arith.constant 1.000000e+00 : f32
    %441 = vector.broadcast %cst_142 : f32 to vector<1x32xf32>
    %442 = arith.addf %441, %440 : vector<1x32xf32>
    %443 = arith.divf %441, %442 : vector<1x32xf32>
    %444 = arith.mulf %437, %412 : vector<1x32xf32>
    %445 = arith.mulf %432, %438 : vector<1x32xf32>
    %446 = arith.addf %444, %445 : vector<1x32xf32>
    %447 = math.tanh %446 : vector<1x32xf32>
    %448 = arith.mulf %443, %447 : vector<1x32xf32>
    %c3_143 = arith.constant 3 : index
    %c0_144 = arith.constant 0 : index
    %449 = vector.load %arg14[%c3_143, %c0_144] : memref<8x32xf32, #tpu.memory_space<vmem>>, vector<1x32xf32>
    tpu.vector_store %arg14[%c3_143, %c0_144], %448 {strides = array<i32>} : memref<8x32xf32, #tpu.memory_space<vmem>>, vector<1x32xf32>,
    %450 = vector.extract_strided_slice %300 {offsets = [4, 0], sizes = [1, 32], strides = [1, 1]} : vector<8x32xf32> to vector<1x32xf32>
    %cst_145 = arith.constant dense<0.000000e+00> : vector<1x32xf32>
    %451 = tpu.matmul %448, %305, %cst_145 {dimension_numbers = #tpu.dot_dimension_numbers<[1], [0], [0], [1], [0, 0, 1, 1], [], []>} : vector<1x32xf32>, vector<32x32xf32>, vector<1x32xf32> -> vector<1x32xf32>
    %452 = arith.addf %450, %451 : vector<1x32xf32>
    %453 = vector.extract_strided_slice %301 {offsets = [4, 0], sizes = [1, 32], strides = [1, 1]} : vector<8x32xf32> to vector<1x32xf32>
    %cst_146 = arith.constant dense<0.000000e+00> : vector<1x32xf32>
    %454 = tpu.matmul %448, %307, %cst_146 {dimension_numbers = #tpu.dot_dimension_numbers<[1], [0], [0], [1], [0, 0, 1, 1], [], []>} : vector<1x32xf32>, vector<32x32xf32>, vector<1x32xf32> -> vector<1x32xf32>
    %455 = arith.addf %453, %454 : vector<1x32xf32>
    %456 = vector.extract_strided_slice %302 {offsets = [4, 0], sizes = [1, 32], strides = [1, 1]} : vector<8x32xf32> to vector<1x32xf32>
    %cst_147 = arith.constant dense<0.000000e+00> : vector<1x32xf32>
    %457 = tpu.matmul %448, %309, %cst_147 {dimension_numbers = #tpu.dot_dimension_numbers<[1], [0], [0], [1], [0, 0, 1, 1], [], []>} : vector<1x32xf32>, vector<32x32xf32>, vector<1x32xf32> -> vector<1x32xf32>
    %458 = arith.addf %456, %457 : vector<1x32xf32>
    %459 = vector.extract_strided_slice %303 {offsets = [4, 0], sizes = [1, 32], strides = [1, 1]} : vector<8x32xf32> to vector<1x32xf32>
    %cst_148 = arith.constant dense<0.000000e+00> : vector<1x32xf32>
    %460 = tpu.matmul %448, %311, %cst_148 {dimension_numbers = #tpu.dot_dimension_numbers<[1], [0], [0], [1], [0, 0, 1, 1], [], []>} : vector<1x32xf32>, vector<32x32xf32>, vector<1x32xf32> -> vector<1x32xf32>
    %461 = arith.addf %459, %460 : vector<1x32xf32>
    %462 = arith.negf %452 : vector<1x32xf32>
    %463 = math.exp %462 : vector<1x32xf32>
    %cst_149 = arith.constant 1.000000e+00 : f32
    %464 = vector.broadcast %cst_149 : f32 to vector<1x32xf32>
    %465 = arith.addf %464, %463 : vector<1x32xf32>
    %466 = arith.divf %464, %465 : vector<1x32xf32>
    %467 = arith.negf %455 : vector<1x32xf32>
    %468 = math.exp %467 : vector<1x32xf32>
    %cst_150 = arith.constant 1.000000e+00 : f32
    %469 = vector.broadcast %cst_150 : f32 to vector<1x32xf32>
    %470 = arith.addf %469, %468 : vector<1x32xf32>
    %471 = arith.divf %469, %470 : vector<1x32xf32>
    %472 = math.tanh %458 : vector<1x32xf32>
    %473 = arith.negf %461 : vector<1x32xf32>
    %474 = math.exp %473 : vector<1x32xf32>
    %cst_151 = arith.constant 1.000000e+00 : f32
    %475 = vector.broadcast %cst_151 : f32 to vector<1x32xf32>
    %476 = arith.addf %475, %474 : vector<1x32xf32>
    %477 = arith.divf %475, %476 : vector<1x32xf32>
    %478 = arith.mulf %471, %446 : vector<1x32xf32>
    %479 = arith.mulf %466, %472 : vector<1x32xf32>
    %480 = arith.addf %478, %479 : vector<1x32xf32>
    %481 = math.tanh %480 : vector<1x32xf32>
    %482 = arith.mulf %477, %481 : vector<1x32xf32>
    %c4_152 = arith.constant 4 : index
    %c0_153 = arith.constant 0 : index
    %483 = vector.load %arg14[%c4_152, %c0_153] : memref<8x32xf32, #tpu.memory_space<vmem>>, vector<1x32xf32>
    tpu.vector_store %arg14[%c4_152, %c0_153], %482 {strides = array<i32>} : memref<8x32xf32, #tpu.memory_space<vmem>>, vector<1x32xf32>,
    %484 = vector.extract_strided_slice %300 {offsets = [5, 0], sizes = [1, 32], strides = [1, 1]} : vector<8x32xf32> to vector<1x32xf32>
    %cst_154 = arith.constant dense<0.000000e+00> : vector<1x32xf32>
    %485 = tpu.matmul %482, %305, %cst_154 {dimension_numbers = #tpu.dot_dimension_numbers<[1], [0], [0], [1], [0, 0, 1, 1], [], []>} : vector<1x32xf32>, vector<32x32xf32>, vector<1x32xf32> -> vector<1x32xf32>
    %486 = arith.addf %484, %485 : vector<1x32xf32>
    %487 = vector.extract_strided_slice %301 {offsets = [5, 0], sizes = [1, 32], strides = [1, 1]} : vector<8x32xf32> to vector<1x32xf32>
    %cst_155 = arith.constant dense<0.000000e+00> : vector<1x32xf32>
    %488 = tpu.matmul %482, %307, %cst_155 {dimension_numbers = #tpu.dot_dimension_numbers<[1], [0], [0], [1], [0, 0, 1, 1], [], []>} : vector<1x32xf32>, vector<32x32xf32>, vector<1x32xf32> -> vector<1x32xf32>
    %489 = arith.addf %487, %488 : vector<1x32xf32>
    %490 = vector.extract_strided_slice %302 {offsets = [5, 0], sizes = [1, 32], strides = [1, 1]} : vector<8x32xf32> to vector<1x32xf32>
    %cst_156 = arith.constant dense<0.000000e+00> : vector<1x32xf32>
    %491 = tpu.matmul %482, %309, %cst_156 {dimension_numbers = #tpu.dot_dimension_numbers<[1], [0], [0], [1], [0, 0, 1, 1], [], []>} : vector<1x32xf32>, vector<32x32xf32>, vector<1x32xf32> -> vector<1x32xf32>
    %492 = arith.addf %490, %491 : vector<1x32xf32>
    %493 = vector.extract_strided_slice %303 {offsets = [5, 0], sizes = [1, 32], strides = [1, 1]} : vector<8x32xf32> to vector<1x32xf32>
    %cst_157 = arith.constant dense<0.000000e+00> : vector<1x32xf32>
    %494 = tpu.matmul %482, %311, %cst_157 {dimension_numbers = #tpu.dot_dimension_numbers<[1], [0], [0], [1], [0, 0, 1, 1], [], []>} : vector<1x32xf32>, vector<32x32xf32>, vector<1x32xf32> -> vector<1x32xf32>
    %495 = arith.addf %493, %494 : vector<1x32xf32>
    %496 = arith.negf %486 : vector<1x32xf32>
    %497 = math.exp %496 : vector<1x32xf32>
    %cst_158 = arith.constant 1.000000e+00 : f32
    %498 = vector.broadcast %cst_158 : f32 to vector<1x32xf32>
    %499 = arith.addf %498, %497 : vector<1x32xf32>
    %500 = arith.divf %498, %499 : vector<1x32xf32>
    %501 = arith.negf %489 : vector<1x32xf32>
    %502 = math.exp %501 : vector<1x32xf32>
    %cst_159 = arith.constant 1.000000e+00 : f32
    %503 = vector.broadcast %cst_159 : f32 to vector<1x32xf32>
    %504 = arith.addf %503, %502 : vector<1x32xf32>
    %505 = arith.divf %503, %504 : vector<1x32xf32>
    %506 = math.tanh %492 : vector<1x32xf32>
    %507 = arith.negf %495 : vector<1x32xf32>
    %508 = math.exp %507 : vector<1x32xf32>
    %cst_160 = arith.constant 1.000000e+00 : f32
    %509 = vector.broadcast %cst_160 : f32 to vector<1x32xf32>
    %510 = arith.addf %509, %508 : vector<1x32xf32>
    %511 = arith.divf %509, %510 : vector<1x32xf32>
    %512 = arith.mulf %505, %480 : vector<1x32xf32>
    %513 = arith.mulf %500, %506 : vector<1x32xf32>
    %514 = arith.addf %512, %513 : vector<1x32xf32>
    %515 = math.tanh %514 : vector<1x32xf32>
    %516 = arith.mulf %511, %515 : vector<1x32xf32>
    %c5_161 = arith.constant 5 : index
    %c0_162 = arith.constant 0 : index
    %517 = vector.load %arg14[%c5_161, %c0_162] : memref<8x32xf32, #tpu.memory_space<vmem>>, vector<1x32xf32>
    tpu.vector_store %arg14[%c5_161, %c0_162], %516 {strides = array<i32>} : memref<8x32xf32, #tpu.memory_space<vmem>>, vector<1x32xf32>,
    %518 = vector.extract_strided_slice %300 {offsets = [6, 0], sizes = [1, 32], strides = [1, 1]} : vector<8x32xf32> to vector<1x32xf32>
    %cst_163 = arith.constant dense<0.000000e+00> : vector<1x32xf32>
    %519 = tpu.matmul %516, %305, %cst_163 {dimension_numbers = #tpu.dot_dimension_numbers<[1], [0], [0], [1], [0, 0, 1, 1], [], []>} : vector<1x32xf32>, vector<32x32xf32>, vector<1x32xf32> -> vector<1x32xf32>
    %520 = arith.addf %518, %519 : vector<1x32xf32>
    %521 = vector.extract_strided_slice %301 {offsets = [6, 0], sizes = [1, 32], strides = [1, 1]} : vector<8x32xf32> to vector<1x32xf32>
    %cst_164 = arith.constant dense<0.000000e+00> : vector<1x32xf32>
    %522 = tpu.matmul %516, %307, %cst_164 {dimension_numbers = #tpu.dot_dimension_numbers<[1], [0], [0], [1], [0, 0, 1, 1], [], []>} : vector<1x32xf32>, vector<32x32xf32>, vector<1x32xf32> -> vector<1x32xf32>
    %523 = arith.addf %521, %522 : vector<1x32xf32>
    %524 = vector.extract_strided_slice %302 {offsets = [6, 0], sizes = [1, 32], strides = [1, 1]} : vector<8x32xf32> to vector<1x32xf32>
    %cst_165 = arith.constant dense<0.000000e+00> : vector<1x32xf32>
    %525 = tpu.matmul %516, %309, %cst_165 {dimension_numbers = #tpu.dot_dimension_numbers<[1], [0], [0], [1], [0, 0, 1, 1], [], []>} : vector<1x32xf32>, vector<32x32xf32>, vector<1x32xf32> -> vector<1x32xf32>
    %526 = arith.addf %524, %525 : vector<1x32xf32>
    %527 = vector.extract_strided_slice %303 {offsets = [6, 0], sizes = [1, 32], strides = [1, 1]} : vector<8x32xf32> to vector<1x32xf32>
    %cst_166 = arith.constant dense<0.000000e+00> : vector<1x32xf32>
    %528 = tpu.matmul %516, %311, %cst_166 {dimension_numbers = #tpu.dot_dimension_numbers<[1], [0], [0], [1], [0, 0, 1, 1], [], []>} : vector<1x32xf32>, vector<32x32xf32>, vector<1x32xf32> -> vector<1x32xf32>
    %529 = arith.addf %527, %528 : vector<1x32xf32>
    %530 = arith.negf %520 : vector<1x32xf32>
    %531 = math.exp %530 : vector<1x32xf32>
    %cst_167 = arith.constant 1.000000e+00 : f32
    %532 = vector.broadcast %cst_167 : f32 to vector<1x32xf32>
    %533 = arith.addf %532, %531 : vector<1x32xf32>
    %534 = arith.divf %532, %533 : vector<1x32xf32>
    %535 = arith.negf %523 : vector<1x32xf32>
    %536 = math.exp %535 : vector<1x32xf32>
    %cst_168 = arith.constant 1.000000e+00 : f32
    %537 = vector.broadcast %cst_168 : f32 to vector<1x32xf32>
    %538 = arith.addf %537, %536 : vector<1x32xf32>
    %539 = arith.divf %537, %538 : vector<1x32xf32>
    %540 = math.tanh %526 : vector<1x32xf32>
    %541 = arith.negf %529 : vector<1x32xf32>
    %542 = math.exp %541 : vector<1x32xf32>
    %cst_169 = arith.constant 1.000000e+00 : f32
    %543 = vector.broadcast %cst_169 : f32 to vector<1x32xf32>
    %544 = arith.addf %543, %542 : vector<1x32xf32>
    %545 = arith.divf %543, %544 : vector<1x32xf32>
    %546 = arith.mulf %539, %514 : vector<1x32xf32>
    %547 = arith.mulf %534, %540 : vector<1x32xf32>
    %548 = arith.addf %546, %547 : vector<1x32xf32>
    %549 = math.tanh %548 : vector<1x32xf32>
    %550 = arith.mulf %545, %549 : vector<1x32xf32>
    %c6_170 = arith.constant 6 : index
    %c0_171 = arith.constant 0 : index
    %551 = vector.load %arg14[%c6_170, %c0_171] : memref<8x32xf32, #tpu.memory_space<vmem>>, vector<1x32xf32>
    tpu.vector_store %arg14[%c6_170, %c0_171], %550 {strides = array<i32>} : memref<8x32xf32, #tpu.memory_space<vmem>>, vector<1x32xf32>,
    %552 = vector.extract_strided_slice %300 {offsets = [7, 0], sizes = [1, 32], strides = [1, 1]} : vector<8x32xf32> to vector<1x32xf32>
    %cst_172 = arith.constant dense<0.000000e+00> : vector<1x32xf32>
    %553 = tpu.matmul %550, %305, %cst_172 {dimension_numbers = #tpu.dot_dimension_numbers<[1], [0], [0], [1], [0, 0, 1, 1], [], []>} : vector<1x32xf32>, vector<32x32xf32>, vector<1x32xf32> -> vector<1x32xf32>
    %554 = arith.addf %552, %553 : vector<1x32xf32>
    %555 = vector.extract_strided_slice %301 {offsets = [7, 0], sizes = [1, 32], strides = [1, 1]} : vector<8x32xf32> to vector<1x32xf32>
    %cst_173 = arith.constant dense<0.000000e+00> : vector<1x32xf32>
    %556 = tpu.matmul %550, %307, %cst_173 {dimension_numbers = #tpu.dot_dimension_numbers<[1], [0], [0], [1], [0, 0, 1, 1], [], []>} : vector<1x32xf32>, vector<32x32xf32>, vector<1x32xf32> -> vector<1x32xf32>
    %557 = arith.addf %555, %556 : vector<1x32xf32>
    %558 = vector.extract_strided_slice %302 {offsets = [7, 0], sizes = [1, 32], strides = [1, 1]} : vector<8x32xf32> to vector<1x32xf32>
    %cst_174 = arith.constant dense<0.000000e+00> : vector<1x32xf32>
    %559 = tpu.matmul %550, %309, %cst_174 {dimension_numbers = #tpu.dot_dimension_numbers<[1], [0], [0], [1], [0, 0, 1, 1], [], []>} : vector<1x32xf32>, vector<32x32xf32>, vector<1x32xf32> -> vector<1x32xf32>
    %560 = arith.addf %558, %559 : vector<1x32xf32>
    %561 = vector.extract_strided_slice %303 {offsets = [7, 0], sizes = [1, 32], strides = [1, 1]} : vector<8x32xf32> to vector<1x32xf32>
    %cst_175 = arith.constant dense<0.000000e+00> : vector<1x32xf32>
    %562 = tpu.matmul %550, %311, %cst_175 {dimension_numbers = #tpu.dot_dimension_numbers<[1], [0], [0], [1], [0, 0, 1, 1], [], []>} : vector<1x32xf32>, vector<32x32xf32>, vector<1x32xf32> -> vector<1x32xf32>
    %563 = arith.addf %561, %562 : vector<1x32xf32>
    %564 = arith.negf %554 : vector<1x32xf32>
    %565 = math.exp %564 : vector<1x32xf32>
    %cst_176 = arith.constant 1.000000e+00 : f32
    %566 = vector.broadcast %cst_176 : f32 to vector<1x32xf32>
    %567 = arith.addf %566, %565 : vector<1x32xf32>
    %568 = arith.divf %566, %567 : vector<1x32xf32>
    %569 = arith.negf %557 : vector<1x32xf32>
    %570 = math.exp %569 : vector<1x32xf32>
    %cst_177 = arith.constant 1.000000e+00 : f32
    %571 = vector.broadcast %cst_177 : f32 to vector<1x32xf32>
    %572 = arith.addf %571, %570 : vector<1x32xf32>
    %573 = arith.divf %571, %572 : vector<1x32xf32>
    %574 = math.tanh %560 : vector<1x32xf32>
    %575 = arith.negf %563 : vector<1x32xf32>
    %576 = math.exp %575 : vector<1x32xf32>
    %cst_178 = arith.constant 1.000000e+00 : f32
    %577 = vector.broadcast %cst_178 : f32 to vector<1x32xf32>
    %578 = arith.addf %577, %576 : vector<1x32xf32>
    %579 = arith.divf %577, %578 : vector<1x32xf32>
    %580 = arith.mulf %573, %548 : vector<1x32xf32>
    %581 = arith.mulf %568, %574 : vector<1x32xf32>
    %582 = arith.addf %580, %581 : vector<1x32xf32>
    %583 = math.tanh %582 : vector<1x32xf32>
    %584 = arith.mulf %579, %583 : vector<1x32xf32>
    %c7_179 = arith.constant 7 : index
    %c0_180 = arith.constant 0 : index
    %585 = vector.load %arg14[%c7_179, %c0_180] : memref<8x32xf32, #tpu.memory_space<vmem>>, vector<1x32xf32>
    tpu.vector_store %arg14[%c7_179, %c0_180], %584 {strides = array<i32>} : memref<8x32xf32, #tpu.memory_space<vmem>>, vector<1x32xf32>,
    %c0_181 = arith.constant 0 : index
    %c0_182 = arith.constant 0 : index
    %586 = vector.load %arg14[%c0_181, %c0_182] : memref<8x32xf32, #tpu.memory_space<vmem>>, vector<8x32xf32>
    %587 = tpu.concatenate %291, %584 in 0 : vector<1x32xf32>, vector<1x32xf32> -> vector<2x32xf32>
    %c0_183 = arith.constant 0 : index
    %c0_184 = arith.constant 0 : index
    %588 = vector.load %arg12[%c0_183, %c0_184] : memref<2x32xf32, #tpu.memory_space<vmem>>, vector<2x32xf32>
    tpu.vector_store %arg12[%c0_183, %c0_184], %587 {strides = array<i32>} : memref<2x32xf32, #tpu.memory_space<vmem>>, vector<2x32xf32>,
    %589 = tpu.concatenate %289, %582 in 0 : vector<1x32xf32>, vector<1x32xf32> -> vector<2x32xf32>
    %c0_185 = arith.constant 0 : index
    %c0_186 = arith.constant 0 : index
    %590 = vector.load %arg13[%c0_185, %c0_186] : memref<2x32xf32, #tpu.memory_space<vmem>>, vector<2x32xf32>
    tpu.vector_store %arg13[%c0_185, %c0_186], %589 {strides = array<i32>} : memref<2x32xf32, #tpu.memory_space<vmem>>, vector<2x32xf32>,
    %591 = arith.truncf %586 : vector<8x32xf32> to vector<8x32xbf16>
    %c0_187 = arith.constant 0 : index
    %c0_188 = arith.constant 0 : index
    %592 = vector.load %arg7[%c0_187, %c0_188] : memref<32x128xbf16, #tpu.memory_space<vmem>>, vector<32x128xbf16>
    %cst_189 = arith.constant dense<0.000000e+00> : vector<8x128xf32>
    %593 = tpu.matmul %591, %592, %cst_189 {dimension_numbers = #tpu.dot_dimension_numbers<[1], [0], [0], [1], [0, 0, 1, 1], [], []>} : vector<8x32xbf16>, vector<32x128xbf16>, vector<8x128xf32> -> vector<8x128xf32>
    %c0_190 = arith.constant 0 : index
    %c0_191 = arith.constant 0 : index
    %594 = vector.load %arg8[%c0_190, %c0_191] : memref<1x128xf32, #tpu.memory_space<vmem>>, vector<1x128xf32>
    %595 = vector.broadcast %594 : vector<1x128xf32> to vector<8x128xf32>
    %596 = arith.addf %593, %595 : vector<8x128xf32>
    %cst_192 = arith.constant dense<0xFF800000> : vector<8xf32>
    %597 = vector.multi_reduction <maximumf>, %596, %cst_192 [1] : vector<8x128xf32> to vector<8xf32>
    %598 = vector.shape_cast %597 : vector<8xf32> to vector<8x1xf32>
    %599 = vector.broadcast %598 : vector<8x1xf32> to vector<8x128xf32>
    %600 = arith.subf %596, %599 : vector<8x128xf32>
    %601 = math.exp %600 : vector<8x128xf32>
    %cst_193 = arith.constant dense<0.000000e+00> : vector<8xf32>
    %602 = vector.multi_reduction <add>, %601, %cst_193 [1] : vector<8x128xf32> to vector<8xf32>
    %603 = vector.shape_cast %602 : vector<8xf32> to vector<8x1xf32>
    %604 = vector.broadcast %603 : vector<8x1xf32> to vector<8x128xf32>
    %605 = arith.divf %601, %604 : vector<8x128xf32>
    %c0_194 = arith.constant 0 : index
    %c0_195 = arith.constant 0 : index
    %606 = vector.load %arg11[%c0_194, %c0_195] : memref<8x128xf32, #tpu.memory_space<vmem>>, vector<8x128xf32>
    tpu.vector_store %arg11[%c0_194, %c0_195], %605 {strides = array<i32>} : memref<8x128xf32, #tpu.memory_space<vmem>>, vector<8x128xf32>,
    return
  }
}

</mosaic_0001>

<bundles_post_ra>
// kernel: lstm_model_forward.1
= control target key start
LH: loop header
LB: loop body
LE: loop exit
PB: predicated region body
PF: predicated region fallthrough
CT: control target
= control target key end

     0   :  { %19 = vsyncpa [#allocation4], 0  ;;  %s9157_s0 = inlined_call_operand.hbm [shape: f32[8,16], index: 0, kind: input, shape index: {}]   ;;  %s9158_s1 = inlined_call_operand.hbm [shape: bf16[16,128], index: 1, kind: input, shape index: {}]   ;;  %s9159_s2 = inlined_call_operand.hbm [shape: f32[4,32,32], index: 2, kind: input, shape index: {}]   ;;  %s9160_s3 = inlined_call_operand.hbm [shape: f32[1,128], index: 3, kind: input, shape index: {}]   ;;  %s9161_s4 = inlined_call_operand.hbm [shape: bf16[32,128], index: 4, kind: input, shape index: {}]   ;;  %s9162_s5 = inlined_call_operand.hbm [shape: f32[4,32,32], index: 5, kind: input, shape index: {}]   ;;  %s9163_s6 = inlined_call_operand.hbm [shape: f32[1,128], index: 6, kind: input, shape index: {}]   ;;  %s9164_s7 = inlined_call_operand.vmem [shape: bf16[32,128], index: 7, kind: input, shape index: {}]   ;;  %s9165_s8 = inlined_call_operand.vmem [shape: f32[1,128], index: 8, kind: input, shape index: {}]   ;;  %s9166_s9 = inlined_call_operand.hbm [shape: f32[2,32], index: 9, kind: input, shape index: {}]   ;;  %s9167_s10 = inlined_call_operand.hbm [shape: f32[2,32], index: 10, kind: input, shape index: {}]   ;;  %s9168_s11 = inlined_call_operand.hbm [shape: f32[8,128], index: 11, kind: output, shape index: {0}]   ;;  %s9169_s12 = inlined_call_operand.hbm [shape: f32[2,32], index: 12, kind: output, shape index: {1}]   ;;  %s9170_s13 = inlined_call_operand.hbm [shape: f32[2,32], index: 13, kind: output, shape index: {2}]  }
   0x1   :  { %20 = vsyncpa [#allocation7], 0 }
   0x2   :  { %21 = vsyncpa [#allocation10], 0 }
   0x3   :  { %22 = vsyncpa [#allocation13], 0 }
   0x4   :  { %23 = vsyncpa [#allocation16], 0 }
   0x5   :  { %24 = vsyncpa [#allocation5], 0 }
   0x6   :  { %25 = vsyncpa [#allocation20], 0  ;;  %s7828_s25 = smov [#allocation6]  }
   0x7   :  { %s41_s26 = sshll.u32 %s7828_s25, 4  ;;  %s42_s26 = int_to_ptr.vmem [resolvable:$true] %s41_s26 }
   0x8   :  { %s7582_s27 = scalar_lea.vmem %s42_s26, 128  ;;  %p7587_p1 = scmp.lt.s32.totalorder %s42_s26, %s42_s26 }
   0x9   :  { %p7583_p0 = scmp.ne.s32.totalorder %s42_s26, %s7582_s27  ;;  %p7588_p2 = scmp.lt.s32.totalorder %s7582_s27, %s7582_s27 }
   0xb   :  { %p7589_p3 = por %p7588_p2, %p7587_p1 }
   0xd   :  { %p7590_p4 = pnand %p7589_p3, %p7583_p0 }
   0xf   :  { %7593 = shalt.err (!%p7590_p4)
}
  0x10   :  { %s7829_s28 = smov 64   ;;  %s7830_s29 = smov 4  }
  0x11   :  { %47 = dma.hbm_to_vmem [thread:$0]  %s9158_s1, 128, %s42_s26, [#allocation7], %s7829_s28, %s7829_s28, %s7830_s29  }
  0x12   :  { %s7831_s15 = smov [#allocation9]  }
  0x13   :  { %s66_s16 = sshll.u32 %s7831_s15, 4  ;;  %s67_s16 = int_to_ptr.vmem [resolvable:$true] %s66_s16 }
  0x14   :  { %s7602_s17 = scalar_lea.vmem %s67_s16, 16  ;;  %s7606_s18 = scalar_lea.vmem %s67_s16, 32 }
  0x15   :  { %p7603_p5 = scmp.ne.s32.totalorder %s67_s16, %s7602_s17  ;;  %p7607_p6 = scmp.lt.s32.totalorder %s67_s16, %s67_s16 }
  0x16   :  { %p7608_p7 = scmp.lt.s32.totalorder %s7606_s18, %s7602_s17 }
  0x18   :  { %p7609_p8 = por %p7608_p7, %p7607_p6 }
  0x1a   :  { %p7610_p9 = pnand %p7609_p8, %p7603_p5 }
  0x1c   :  { %7613 = shalt.err (!%p7610_p9)
}
  0x1d   :  { %69 = dma.hbm_to_vmem [thread:$0]  %s9160_s3, 16, %s67_s16, [#allocation10]  }
  0x1e   :  { %s7832_s21 = smov [#allocation12]   ;;  %s7833_s23 = smov [#allocation15]  }
  0x1f   :  { %s87_s22 = sshll.u32 %s7832_s21, 4  ;;  %s114_s24 = sshll.u32 %s7833_s23, 4  ;;  %s88_s22 = int_to_ptr.vmem [resolvable:$true] %s87_s22  ;;  %s115_s24 = int_to_ptr.vmem [resolvable:$true] %s114_s24 }
  0x20   :  { %s7622_s1 = scalar_lea.vmem %s88_s22, 2048  ;;  %p7627_p11 = scmp.lt.s32.totalorder %s88_s22, %s88_s22 }
  0x21   :  { %p7623_p10 = scmp.ne.s32.totalorder %s88_s22, %s7622_s1  ;;  %p7628_p12 = scmp.lt.s32.totalorder %s7622_s1, %s7622_s1 }
  0x23   :  { %p7629_p13 = por %p7628_p12, %p7627_p11 }
  0x25   :  { %p7630_p0 = pnand %p7629_p13, %p7623_p10 }
  0x27   :  { %7633 = shalt.err (!%p7630_p0)
}
  0x28   :  { %s7834_s25 = smov 128   ;;  %s7835_s26 = smov 8  }
  0x29   :  { %93 = dma.hbm_to_vmem [thread:$0]  %s9162_s5, 2048, %s88_s22, [#allocation13], %s7834_s25, %s7834_s25, %s7835_s26  }
  0x2a   :  { %s7642_s30 = scalar_lea.vmem %s115_s24, 32  ;;  %p7647_p2 = scmp.lt.s32.totalorder %s115_s24, %s115_s24 }
  0x2b   :  { %p7643_p1 = scmp.ne.s32.totalorder %s115_s24, %s7642_s30  ;;  %p7648_p3 = scmp.lt.s32.totalorder %s7642_s30, %s7642_s30 }
  0x2d   :  { %p7649_p4 = por %p7648_p3, %p7647_p2 }
  0x2f   :  { %p7650_p5 = pnand %p7649_p4, %p7643_p1 }
  0x31   :  { %7653 = shalt.err (!%p7650_p5)
}
  0x32   :  { %117 = dma.hbm_to_vmem [thread:$0]  %s9166_s9, 32, %s115_s24, [#allocation16]  }
  0x33   :  { %s7836_s16 = smov [#allocation3]   ;;  %s7837_s18 = smov [#allocation8]  }
  0x34   :  { %s32_s17 = sshll.u32 %s7836_s16, 4  ;;  %s53_s19 = sshll.u32 %s7837_s18, 4  ;;  %s33_s17 = int_to_ptr.vmem [resolvable:$true] %s32_s17  ;;  %s54_s19 = int_to_ptr.vmem [resolvable:$true] %s53_s19 }
  0x35   :  { %s7662_s20 = scalar_lea.vmem %s33_s17, 128  ;;  %p7667_p7 = scmp.lt.s32.totalorder %s33_s17, %s33_s17 }
  0x36   :  { %p7663_p6 = scmp.ne.s32.totalorder %s33_s17, %s7662_s20  ;;  %p7668_p8 = scmp.lt.s32.totalorder %s7662_s20, %s7662_s20 }
  0x38   :  { %p7669_p9 = por %p7668_p8, %p7667_p7 }
  0x3a   :  { %p7670_p10 = pnand %p7669_p9, %p7663_p6 }
  0x3c   :  { %7673 = shalt.err (!%p7670_p10)
}
  0x3d   :  { %35 = dma.hbm_to_vmem [thread:$0]  %s9157_s0, 128, %s33_s17, [#allocation4]  }
  0x3e   :  { %s7682_s22 = scalar_lea.vmem %s54_s19, 2048  ;;  %p7687_p12 = scmp.lt.s32.totalorder %s54_s19, %s54_s19 }
  0x3f   :  { %p7683_p11 = scmp.ne.s32.totalorder %s54_s19, %s7682_s22  ;;  %p7688_p13 = scmp.lt.s32.totalorder %s7682_s22, %s7682_s22 }
  0x41   :  { %p7689_p0 = por %p7688_p13, %p7687_p12 }
  0x43   :  { %p7690_p1 = pnand %p7689_p0, %p7683_p11 }
  0x45   :  { %7693 = shalt.err (!%p7690_p1)
}
  0x46   :  { %59 = dma.hbm_to_vmem [thread:$0]  %s9159_s2, 2048, %s54_s19, [#allocation7], %s7834_s25, %s7834_s25, %s7835_s26  }
  0x47   :  { %s7838_s24 = smov [#allocation11]   ;;  %s7839_s27 = smov [#allocation14]  }
  0x48   :  { %s75_s1 = sshll.u32 %s7838_s24, 4  ;;  %s100_s3 = sshll.u32 %s7839_s27, 4  ;;  %s76_s1 = int_to_ptr.vmem [resolvable:$true] %s75_s1  ;;  %s101_s3 = int_to_ptr.vmem [resolvable:$true] %s100_s3 }
  0x49   :  { %s7702_s0 = scalar_lea.vmem %s76_s1, 256  ;;  %p7707_p3 = scmp.lt.s32.totalorder %s76_s1, %s76_s1 }
  0x4a   :  { %p7703_p2 = scmp.ne.s32.totalorder %s76_s1, %s7702_s0  ;;  %p7708_p4 = scmp.lt.s32.totalorder %s7702_s0, %s7702_s0 }
  0x4c   :  { %p7709_p5 = por %p7708_p4, %p7707_p3 }
  0x4e   :  { %p7710_p6 = pnand %p7709_p5, %p7703_p2 }
  0x50   :  { %7713 = shalt.err (!%p7710_p6)
}
  0x51   :  { %81 = dma.hbm_to_vmem [thread:$0]  %s9161_s4, 256, %s76_s1, [#allocation10], %s7829_s28, %s7829_s28, %s7830_s29  }
  0x52   :  { %s7722_s2 = scalar_lea.vmem %s101_s3, 16  ;;  %s7726_s25 = scalar_lea.vmem %s101_s3, 32 }
  0x53   :  { %p7723_p7 = scmp.ne.s32.totalorder %s101_s3, %s7722_s2  ;;  %p7727_p8 = scmp.lt.s32.totalorder %s101_s3, %s101_s3 }
  0x54   :  { %p7728_p9 = scmp.lt.s32.totalorder %s7726_s25, %s7722_s2 }
  0x56   :  { %p7729_p10 = por %p7728_p9, %p7727_p8 }
  0x58   :  { %p7730_p11 = pnand %p7729_p10, %p7723_p7 }
  0x5a   :  { %7733 = shalt.err (!%p7730_p11)
}
  0x5b   :  { %103 = dma.hbm_to_vmem [thread:$0]  %s9163_s6, 16, %s101_s3, [#allocation13]  }
  0x5c   :  { %s7840_s16 = smov [#allocation17]  }
  0x5d   :  { %s124_s17 = sshll.u32 %s7840_s16, 4  ;;  %s125_s17 = int_to_ptr.vmem [resolvable:$true] %s124_s17 }
  0x5e   :  { %s7742_s18 = scalar_lea.vmem %s125_s17, 32  ;;  %p7747_p13 = scmp.lt.s32.totalorder %s125_s17, %s125_s17 }
  0x5f   :  { %p7743_p12 = scmp.ne.s32.totalorder %s125_s17, %s7742_s18  ;;  %p7748_p0 = scmp.lt.s32.totalorder %s7742_s18, %s7742_s18 }
  0x61   :  { %p7749_p1 = por %p7748_p0, %p7747_p13 }
  0x63   :  { %p7750_p2 = pnand %p7749_p1, %p7743_p12 }
  0x65   :  { %7753 = shalt.err (!%p7750_p2)
}
  0x66   :  { %127 = dma.hbm_to_vmem [thread:$0]  %s9167_s10, 32, %s125_s17, [#allocation16]  }
  0x67   :  { %7814 = dma.done.wait [#allocation4], 128  }
  0x68   :  { %7815 = vsyncadd [#allocation4], 4294967168 }
  0x69   :  { %7816 = dma.done.wait [#allocation7], 2176  }
  0x6a   :  { %7817 = vsyncadd [#allocation7], 4294965120 }
  0x6b   :  { %7818 = dma.done.wait [#allocation10], 272  }
  0x6c   :  { %7819 = vsyncadd [#allocation10], 4294967024 }
  0x6d   :  { %7820 = dma.done.wait [#allocation13], 2064  }
  0x6e   :  { %7821 = vsyncadd [#allocation13], 4294965232 }
  0x6f   :  { %7822 = dma.done.wait [#allocation16], 64  }
  0x70   :  { %7823 = vsyncadd [#allocation16], 4294967232  ;;  %v7841_v0 = vmov 0.0   ;;  %vm7842_vm0 = vmmov 0   ;;  %v7963_v1 = vld [vmem:[#allocation8 + $0x38] sm:$0xff]  ;;  %v7966_v3 = vld [vmem:[#allocation8 + $0x30] sm:$0xff] }
  0x71   :  { %6548 = vmatprep.subr.mxu0 %v7841_v0  ;;  %6531 = vmatprep.subr.bf16.mxu1 %v7841_v0  ;;  %v7277_v2 = vld [vmem:[#allocation6] sm:$0xff]   ;;  %v7969_v4 = vld [vmem:[#allocation8 + $0x28] sm:$0xff]  ;;  %v156_v5 = vld [vmem:[#allocation3] sm:$0xff]  ;;  %vm173_vm1 = vcmask 130048   ;;  %vm238_vm2 = vcmask 261120   ;;  %s7843_s6 = smov 32  }
  0x72   :  { %6533 = vmatprep.mubr.msk.bf16.mxu1 %vm7842_vm0, %v7841_v0  ;;  %6556 = vmatprep.mubr.msk.f32.mxu0 %vm7842_vm0, %v7841_v0  ;;  %v160_v6 = vpack.c.bf16 %v156_v5, %v156_v5  ;;  %v7974_v7 = vld [vmem:[#allocation8 + $0x18] sm:$0xff]  ;;  %v7976_v8 = vld [vmem:[#allocation8 + $0x20] sm:$0xff]  ;;  %v236_v9 = vld [vmem:[#allocation15] sm:$0x1]  ;;  %s7844_s10 = smov 96   ;;  %vm582_vm3 = vcmask 253952  }
  0x73   :  { %6549 = vmatpush3.msra.mxu0 %v7963_v1  ;;  %6532 = vmatpush3.bf16.msra.mxu1 %v7277_v2  ;;  %v7980_v10 = vld [vmem:[#allocation8 + $0x10] sm:$0xff]  ;;  %v7982_v11 = vld [vmem:[#allocation8 + $0x78] sm:$0xff]  ;;  %v7984_v12 = vld [vmem:[#allocation8 + $0x8] sm:$0xff]  ;;  %vm931_vm4 = vcmask 254977   ;;  %vm1635_vm5 = vcmask 257027   ;;  %vm2339_vm6 = vcmask 259077  }
  0x74   :  { %6550 = vmatprep.subr.mxu0 %v7841_v0  ;;  %6537 = vmatprep.subr.mxu1 %v7841_v0  ;;  %v7988_v13 = vld [vmem:[#allocation8 + $0x70] sm:$0xff]  ;;  %v7996_v14 = vld [vmem:[#allocation8] sm:$0xff]  ;;  %v8000_v15 = vld [vmem:[#allocation8 + $0x68] sm:$0xff]  ;;  %vm1283_vm7 = vcmask 256002   ;;  %vm1987_vm8 = vcmask 258052   ;;  %vm2691_vm9 = vcmask 260102  }
  0x75   :  { %6551 = vmatpush3.msra.mxu0 %v7966_v3  ;;  %v8006_v16 = vld [vmem:[#allocation8 + $0x58] sm:$0xff]  ;;  %v8011_v17 = vld [vmem:[#allocation8 + $0x60] sm:$0xff]  ;;  %v8017_v18 = vld [vmem:[#allocation8 + $0x50] sm:$0xff]  ;;  %vm3043_vm10 = vcmask 261127   ;;  %vm5937_vm11 = vcmask 1040384   ;;  %vm5943_vm12 = vcmask 254976  }
  0x76   :  { %6552 = vmatprep.subr.mxu0 %v7841_v0  ;;  %6534 = vmatmul.mubr.msk.bf16.vlgmr.msra.gmra.mxu1 %vm173_vm1, %v160_v6  ;;  %v8024_v19 = vld [vmem:[#allocation8 + $0x48] sm:$0xff]  ;;  %v8030_v20 = vld [vmem:[#allocation8 + $0x40] sm:$0xff]  ;;  %v237_v25 = vld [vmem:[#allocation17] sm:$0x1]  ;;  %s7845_s22 = smov [#allocation19]  }
  0x77   :  { %6553 = vmatpush3.msra.mxu0 %v7969_v4  ;;  %6538 = vmatpush3.msra.mxu1 %v7974_v7  ;;  %v6080_v34 = vld [vmem:[#allocation9] ss:$0 sm:$0xff] }
  0x78   :  { %6554 = vmatprep.subr.mxu0 %v7841_v0  ;;  %6539 = vmatprep.subr.mxu1 %v7841_v0 }
  0x79   :  { %6555 = vmatpush3.msra.mxu0 %v7976_v8  ;;  %6540 = vmatpush3.msra.mxu1 %v7980_v10 }
  0x7a   :  { %6557 = vmatmul.mubr.msk.f32.vlgmr.msra.gmra.mxu0 %vm238_vm2, %v236_v9  ;;  %6570 = vmatprep.subr.mxu0 %v7841_v0 }
  0x7b   :  { %6571 = vmatpush3.msra.mxu0 %v7982_v11  ;;  %6541 = vmatprep.subr.mxu1 %v7841_v0 }
  0x7c   :  { %6572 = vmatprep.subr.mxu0 %v7841_v0  ;;  %6542 = vmatpush3.msra.mxu1 %v7984_v12 }
  0x7d   :  { %6573 = vmatpush3.msra.mxu0 %v7988_v13  ;;  %6543 = vmatprep.subr.mxu1 %v7841_v0 }
  0x7e   :  { %6574 = vmatprep.subr.mxu0 %v7841_v0  ;;  %6544 = vmatpush3.msra.mxu1 %v7996_v14 }
  0x7f   :  { %6545 = vmatprep.mubr.msk.f32.mxu1 %vm7842_vm0, %v7841_v0  ;;  %6575 = vmatpush3.msra.mxu0 %v8000_v15 }
  0x80   :  { %6546 = vmatmul.mubr.msk.f32.vlgmr.msra.gmra.mxu1 %vm238_vm2, %v236_v9  ;;  %6559 = vmatprep.subr.mxu1 %v7841_v0 }
  0x81   :  { %6576 = vmatprep.subr.mxu0 %v7841_v0  ;;  %6560 = vmatpush3.msra.mxu1 %v8006_v16 }
  0x82   :  { %6577 = vmatpush3.msra.mxu0 %v8011_v17  ;;  %6578 = vmatprep.mubr.msk.f32.mxu0 %vm7842_vm0, %v7841_v0 }
  0x83   :  { %6561 = vmatprep.subr.mxu1 %v7841_v0  ;;  %6579 = vmatmul.mubr.msk.f32.vlgmr.msra.gmra.mxu0 %vm238_vm2, %v236_v9 }
  0x84   :  { %6562 = vmatpush3.msra.mxu1 %v8017_v18  ;;  %6567 = vmatprep.mubr.msk.f32.mxu1 %vm7842_vm0, %v7841_v0 }
  0x85   :  { %6563 = vmatprep.subr.mxu1 %v7841_v0  ;;  %6592 = vmatprep.subr.mxu0 %v7841_v0 }
  0x86   :  { %6564 = vmatpush3.msra.mxu1 %v8024_v19  ;;  %6593 = vmatpush3.msra.mxu0 %v7963_v1 }
  0x87   :  { %6565 = vmatprep.subr.mxu1 %v7841_v0  ;;  %6594 = vmatprep.subr.mxu0 %v7841_v0 }
  0x88   :  { %6566 = vmatpush3.msra.mxu1 %v8030_v20  ;;  %6595 = vmatpush3.msra.mxu0 %v7966_v3 }
  0x89   :  { %6568 = vmatmul.mubr.msk.f32.vlgmr.msra.gmra.mxu1 %vm238_vm2, %v236_v9  ;;  %6581 = vmatprep.subr.mxu1 %v7841_v0 }
  0x8a   :  { %6582 = vmatpush3.msra.mxu1 %v7974_v7  ;;  %6596 = vmatprep.subr.mxu0 %v7841_v0 }
  0x8b   :  { %6583 = vmatprep.subr.mxu1 %v7841_v0  ;;  %6597 = vmatpush3.msra.mxu0 %v7969_v4 }
  0x8c   :  { %6584 = vmatpush3.msra.mxu1 %v7980_v10  ;;  %6598 = vmatprep.subr.mxu0 %v7841_v0 }
  0x8d   :  { %6585 = vmatprep.subr.mxu1 %v7841_v0  ;;  %6599 = vmatpush3.msra.mxu0 %v7976_v8 }
  0x8e   :  { %6586 = vmatpush3.msra.mxu1 %v7984_v12  ;;  %6589 = vmatprep.mubr.msk.f32.mxu1 %vm7842_vm0, %v7841_v0 }
  0x8f   :  { %6587 = vmatprep.subr.mxu1 %v7841_v0  ;;  %6600 = vmatprep.mubr.msk.f32.mxu0 %vm7842_vm0, %v7841_v0 }
  0x90   :  { %6588 = vmatpush3.msra.mxu1 %v7996_v14  ;;  %6614 = vmatprep.subr.mxu0 %v7841_v0 }
  0x91   :  { %6603 = vmatprep.subr.mxu1 %v7841_v0 }
 0x136   :  { %v211_v21 = vpop.f32.mrf.mxu1 }
 0x137   :  { %v8062_v35 = vadd.f32 %v6080_v34, %v211_v21 }
 0x138   :  { %v6535_v22 = vpop.f32.mrf.mxu1 }
 0x13a   :  { %v379_v23 = vpop.f32.mrf.mxu0  ;;  %v214_v24 = vpop.f32.mrf.mxu1 }
 0x13b   :  { %384 = vrot.lane.b32.xlu1 %v379_v23, %s7843_s6 }
 0x13c   :  { %v6558_v26 = vpop.f32.mrf.mxu0  ;;  %v6536_v27 = vpop.f32.mrf.mxu1 }
 0x13f   :  { %558 = vrot.lane.b32.xlu1 %v237_v25, %s7843_s6 }
 0x140   :  { %v308_v28 = vpop.f32.mrf.mxu1 }
 0x141   :  { %v312_v39 = vadd.f32 %v308_v28, %v8062_v35 }
 0x142   :  { %v6547_v29 = vpop.f32.mrf.mxu1 }
 0x143   :  { %v529_v30 = vpop.f32.mrf.mxu0  ;;  %v6087_v40 = vmul.f32 -1.442695, %v312_v39 }
 0x144   :  { %534 = vrot.lane.b32.xlu1 %v529_v30, %s7844_s10 }
 0x145   :  { %v6580_v31 = vpop.f32.mrf.mxu0 }
 0x149   :  { %v454_v32 = vpop.f32.mrf.mxu1 }
 0x14a   :  { %459 = vrot.lane.b32.xlu0 %v454_v32, %s7829_s28 }
 0x14b   :  { %v6569_v33 = vpop.f32.mrf.mxu1 }
 0x1ad   :  { %v385_v46 = vpop.permute.xlu1 %384 }
 0x1ae   :  { %v387_v47 = vadd.f32 %v385_v46, %v8062_v35 }
 0x1b0   :  { %v6088_v48 = vmul.f32 -1.442695, %v387_v47 }
 0x1b1   :  { %v559_v52 = vpop.permute.xlu1 %558 }
 0x1b6   :  { %v535_v57 = vpop.permute.xlu1 %534 }
 0x1b7   :  { %v537_v58 = vadd.f32 %v535_v57, %v8062_v35 }
 0x1b9   :  { %v6089_v59 = vmul.f32 -1.442695, %v537_v58 }
 0x1bc   :  { %v460_v36 = vpop.permute.xlu0 %459 }
 0x1bd   :  { %v462_v37 = vadd.f32 %v460_v36, %v8062_v35 }
 0x1bf   :  { %7282 = vtanh.f32 %v462_v37 }
 0x1c0   :  { %7284 = vpow2.f32 %v6087_v40 }
 0x1cc   :  { %v7283_v38 = vpop.eup %7282 }
 0x1cd   :  { %563 = vrot.lane.b32.xlu0 %v7283_v38, %s7829_s28  ;;  %v7285_v41 = vpop.eup %7284 }
 0x1ce   :  { %v541_v42 = vadd.f32 1.0, %v7285_v41 }
 0x1d0   :  { %7286 = vrcp.f32 %v541_v42 }
 0x1d1   :  { %7288 = vpow2.f32 %v6088_v48 }
 0x1dd   :  { %v7287_v43 = vpop.eup %7286 }
 0x1de   :  { %v7289_v49 = vpop.eup %7288 }
 0x1df   :  { %v547_v50 = vadd.f32 1.0, %v7289_v49 }
 0x1e1   :  { %7290 = vrcp.f32 %v547_v50 }
 0x1ee   :  { %v7291_v51 = vpop.eup %7290 }
 0x1ef   :  { %v561_v53 = vmul.f32 %v7291_v51, %v559_v52 }
 0x23f   :  { %v564_v44 = vpop.permute.xlu0 %563 }
 0x240   :  { %v566_v45 = vmul.f32 %v7287_v43, %v564_v44 }
 0x242   :  { %568 = vrot.lane.b32.xlu0 %v566_v45, %s7843_s6 }
 0x2b4   :  { %v569_v54 = vpop.permute.xlu0 %568 }
 0x2b5   :  { %v8069_v55 = vadd.f32 %v569_v54, %v561_v53 }
 0x2b7   :  { %7292 = vtanh.f32 %v8069_v55  ;;  %v908_v48 = vrot.slane %v8069_v55, 7 }
 0x2b8   :  { %7294 = vpow2.f32 %v6089_v59 }
 0x2c4   :  { %v7293_v56 = vpop.eup %7292 }
 0x2c5   :  { %574 = vrot.lane.b32.xlu0 %v7293_v56, %s7829_s28  ;;  %v7295_v60 = vpop.eup %7294 }
 0x2c6   :  { %v554_v61 = vadd.f32 1.0, %v7295_v60 }
 0x2c8   :  { %7296 = vrcp.f32 %v554_v61 }
 0x2d5   :  { %v7297_v62 = vpop.eup %7296 }
 0x337   :  { %v575_v63 = vpop.permute.xlu0 %574 }
 0x338   :  { %v577_v2 = vmul.f32 %v7297_v62, %v575_v63 }
 0x33a   :  { %579 = vrot.lane.b32.xlu1 %v577_v2, %s7843_s6 }
 0x3ac   :  { %v580_v5 = vpop.permute.xlu1 %579 }
 0x3ad   :  { %583 = vst.msk [vmem:[#allocation2] sm:$0x1] %vm582_vm3, %v580_v5  ;;  %6590 = vmatmul.mubr.msk.f32.vlgmr.msra.gmra.mxu1 %vm238_vm2, %v580_v5  ;;  %6601 = vmatmul.mubr.msk.f32.vlgmr.msra.gmra.mxu0 %vm238_vm2, %v580_v5 }
 0x3ae   :  { %6604 = vmatpush3.msra.mxu1 %v8006_v16  ;;  %6615 = vmatpush3.msra.mxu0 %v7982_v11 }
 0x3af   :  { %6605 = vmatprep.subr.mxu1 %v7841_v0  ;;  %6616 = vmatprep.subr.mxu0 %v7841_v0 }
 0x3b0   :  { %6606 = vmatpush3.msra.mxu1 %v8017_v18  ;;  %6617 = vmatpush3.msra.mxu0 %v7988_v13 }
 0x3b1   :  { %6607 = vmatprep.subr.mxu1 %v7841_v0  ;;  %6618 = vmatprep.subr.mxu0 %v7841_v0 }
 0x3b2   :  { %6608 = vmatpush3.msra.mxu1 %v8024_v19  ;;  %6619 = vmatpush3.msra.mxu0 %v8000_v15 }
 0x3b3   :  { %6609 = vmatprep.subr.mxu1 %v7841_v0  ;;  %6620 = vmatprep.subr.mxu0 %v7841_v0 }
 0x3b4   :  { %6610 = vmatpush3.msra.mxu1 %v8030_v20  ;;  %6611 = vmatprep.mubr.msk.f32.mxu1 %vm7842_vm0, %v7841_v0 }
 0x3b5   :  { %6621 = vmatpush3.msra.mxu0 %v8011_v17  ;;  %6622 = vmatprep.mubr.msk.f32.mxu0 %vm7842_vm0, %v7841_v0 }
 0x3b6   :  { %6612 = vmatmul.mubr.msk.f32.vlgmr.msra.gmra.mxu1 %vm238_vm2, %v580_v5  ;;  %6623 = vmatmul.mubr.msk.f32.vlgmr.msra.gmra.mxu0 %vm238_vm2, %v580_v5 }
 0x3b7   :  { %6625 = vmatprep.subr.mxu1 %v7841_v0  ;;  %6636 = vmatprep.subr.mxu0 %v7841_v0 }
 0x3b8   :  { %6626 = vmatpush3.msra.mxu1 %v7974_v7  ;;  %6637 = vmatpush3.msra.mxu0 %v7963_v1 }
 0x3b9   :  { %6627 = vmatprep.subr.mxu1 %v7841_v0  ;;  %6638 = vmatprep.subr.mxu0 %v7841_v0 }
 0x3ba   :  { %6628 = vmatpush3.msra.mxu1 %v7980_v10  ;;  %6639 = vmatpush3.msra.mxu0 %v7966_v3 }
 0x3bb   :  { %6629 = vmatprep.subr.mxu1 %v7841_v0  ;;  %6640 = vmatprep.subr.mxu0 %v7841_v0 }
 0x3bc   :  { %6630 = vmatpush3.msra.mxu1 %v7984_v12  ;;  %6641 = vmatpush3.msra.mxu0 %v7969_v4 }
 0x3bd   :  { %6631 = vmatprep.subr.mxu1 %v7841_v0  ;;  %6642 = vmatprep.subr.mxu0 %v7841_v0 }
 0x3be   :  { %6632 = vmatpush3.msra.mxu1 %v7996_v14  ;;  %6643 = vmatpush3.msra.mxu0 %v7976_v8 }
 0x3bf   :  { %6633 = vmatprep.mubr.msk.f32.mxu1 %vm7842_vm0, %v7841_v0  ;;  %6644 = vmatprep.mubr.msk.f32.mxu0 %vm7842_vm0, %v7841_v0 }
 0x3c0   :  { %6647 = vmatprep.subr.mxu1 %v7841_v0  ;;  %6658 = vmatprep.subr.mxu0 %v7841_v0 }
 0x46d   :  { %v652_v6 = vpop.f32.mrf.mxu1  ;;  %v726_v9 = vpop.f32.mrf.mxu0 }
 0x46e   :  { %v731_v28 = vrot.slane %v726_v9, 7  ;;  %v657_v33 = vrot.slane %v652_v6, 7 }
 0x46f   :  { %v6591_v21 = vpop.f32.mrf.mxu1  ;;  %v6602_v22 = vpop.f32.mrf.mxu0 }
 0x470   :  { %v659_v34 = vadd.f32 %v657_v33, %v8062_v35 }
 0x472   :  { %v6094_v36 = vmul.f32 -1.442695, %v659_v34 }
 0x476   :  { %v802_v23 = vpop.f32.mrf.mxu1  ;;  %v878_v24 = vpop.f32.mrf.mxu0 }
 0x477   :  { %v807_v25 = vrot.slane %v802_v23, 7  ;;  %v883_v29 = vrot.slane %v878_v24, 7 }
 0x478   :  { %v6613_v26 = vpop.f32.mrf.mxu1  ;;  %v6624_v27 = vpop.f32.mrf.mxu0 }
 0x479   :  { %808 = vrot.lane.b32.xlu0 %v807_v25, %s7829_s28 }
 0x47d   :  { %732 = vrot.lane.b32.xlu0 %v731_v28, %s7843_s6 }
 0x481   :  { %884 = vrot.lane.b32.xlu0 %v883_v29, %s7844_s10 }
 0x4eb   :  { %v809_v30 = vpop.permute.xlu0 %808 }
 0x4ec   :  { %v811_v31 = vadd.f32 %v809_v30, %v8062_v35 }
 0x4ee   :  { %7298 = vtanh.f32 %v811_v31 }
 0x4ef   :  { %7300 = vpow2.f32 %v6094_v36  ;;  %v733_v42 = vpop.permute.xlu0 %732 }
 0x4f0   :  { %v735_v43 = vadd.f32 %v733_v42, %v8062_v35 }
 0x4f2   :  { %v6095_v44 = vmul.f32 -1.442695, %v735_v43 }
 0x4f3   :  { %v885_v53 = vpop.permute.xlu0 %884 }
 0x4f4   :  { %v887_v54 = vadd.f32 %v885_v53, %v8062_v35 }
 0x4f6   :  { %v6096_v56 = vmul.f32 -1.442695, %v887_v54 }
 0x4fb   :  { %v7299_v32 = vpop.eup %7298 }
 0x4fc   :  { %912 = vrot.lane.b32.xlu1 %v7299_v32, %s7829_s28  ;;  %v7301_v37 = vpop.eup %7300 }
 0x4fd   :  { %v891_v38 = vadd.f32 1.0, %v7301_v37 }
 0x4ff   :  { %7302 = vrcp.f32 %v891_v38 }
 0x500   :  { %7304 = vpow2.f32 %v6095_v44 }
 0x50c   :  { %v7303_v39 = vpop.eup %7302 }
 0x50d   :  { %v7305_v45 = vpop.eup %7304 }
 0x50e   :  { %v897_v46 = vadd.f32 1.0, %v7305_v45 }
 0x510   :  { %7306 = vrcp.f32 %v897_v46 }
 0x51d   :  { %v7307_v47 = vpop.eup %7306 }
 0x51e   :  { %v910_v49 = vmul.f32 %v7307_v47, %v908_v48 }
 0x56e   :  { %v913_v40 = vpop.permute.xlu1 %912 }
 0x56f   :  { %v915_v41 = vmul.f32 %v7303_v39, %v913_v40 }
 0x571   :  { %917 = vrot.lane.b32.xlu1 %v915_v41, %s7843_s6 }
 0x5e3   :  { %v918_v50 = vpop.permute.xlu1 %917 }
 0x5e4   :  { %v8129_v51 = vadd.f32 %v918_v50, %v910_v49 }
 0x5e6   :  { %7308 = vtanh.f32 %v8129_v51  ;;  %v1260_v45 = vrot.slane %v8129_v51, 7 }
 0x5e7   :  { %7310 = vpow2.f32 %v6096_v56 }
 0x5f3   :  { %v7309_v52 = vpop.eup %7308 }
 0x5f4   :  { %923 = vrot.lane.b32.xlu1 %v7309_v52, %s7829_s28  ;;  %v7311_v57 = vpop.eup %7310 }
 0x5f5   :  { %v904_v58 = vadd.f32 1.0, %v7311_v57 }
 0x5f7   :  { %7312 = vrcp.f32 %v904_v58 }
 0x604   :  { %v7313_v59 = vpop.eup %7312 }
 0x666   :  { %v924_v60 = vpop.permute.xlu1 %923 }
 0x667   :  { %v8134_v55 = vmul.f32 %v7313_v59, %v924_v60 }
 0x669   :  { %v933_v61 = vrot.slane %v8134_v55, 1 }
 0x66b   :  { %934 = vrot.lane.b32.xlu0 %v933_v61, %s7843_s6 }
 0x6dd   :  { %v935_v62 = vpop.permute.xlu0 %934 }
 0x6de   :  { %6634 = vmatmul.mubr.msk.f32.vlgmr.msra.gmra.mxu1 %vm238_vm2, %v935_v62  ;;  %6645 = vmatmul.mubr.msk.f32.vlgmr.msra.gmra.mxu0 %vm238_vm2, %v935_v62 }
 0x6df   :  { %6648 = vmatpush3.msra.mxu1 %v8006_v16  ;;  %6659 = vmatpush3.msra.mxu0 %v7982_v11 }
 0x6e0   :  { %6649 = vmatprep.subr.mxu1 %v7841_v0  ;;  %6660 = vmatprep.subr.mxu0 %v7841_v0 }
 0x6e1   :  { %6650 = vmatpush3.msra.mxu1 %v8017_v18  ;;  %6661 = vmatpush3.msra.mxu0 %v7988_v13 }
 0x6e2   :  { %6651 = vmatprep.subr.mxu1 %v7841_v0  ;;  %6662 = vmatprep.subr.mxu0 %v7841_v0 }
 0x6e3   :  { %6652 = vmatpush3.msra.mxu1 %v8024_v19  ;;  %6663 = vmatpush3.msra.mxu0 %v8000_v15 }
 0x6e4   :  { %6653 = vmatprep.subr.mxu1 %v7841_v0  ;;  %6664 = vmatprep.subr.mxu0 %v7841_v0 }
 0x6e5   :  { %6654 = vmatpush3.msra.mxu1 %v8030_v20  ;;  %6655 = vmatprep.mubr.msk.f32.mxu1 %vm7842_vm0, %v7841_v0 }
 0x6e6   :  { %6665 = vmatpush3.msra.mxu0 %v8011_v17  ;;  %6666 = vmatprep.mubr.msk.f32.mxu0 %vm7842_vm0, %v7841_v0 }
 0x6e7   :  { %6656 = vmatmul.mubr.msk.f32.vlgmr.msra.gmra.mxu1 %vm238_vm2, %v935_v62  ;;  %6667 = vmatmul.mubr.msk.f32.vlgmr.msra.gmra.mxu0 %vm238_vm2, %v935_v62 }
 0x6e8   :  { %6669 = vmatprep.subr.mxu1 %v7841_v0  ;;  %6680 = vmatprep.subr.mxu0 %v7841_v0 }
 0x6e9   :  { %6670 = vmatpush3.msra.mxu1 %v7974_v7  ;;  %6681 = vmatpush3.msra.mxu0 %v7963_v1 }
 0x6ea   :  { %6671 = vmatprep.subr.mxu1 %v7841_v0  ;;  %6682 = vmatprep.subr.mxu0 %v7841_v0 }
 0x6eb   :  { %6672 = vmatpush3.msra.mxu1 %v7980_v10  ;;  %6683 = vmatpush3.msra.mxu0 %v7966_v3 }
 0x6ec   :  { %6673 = vmatprep.subr.mxu1 %v7841_v0  ;;  %6684 = vmatprep.subr.mxu0 %v7841_v0 }
 0x6ed   :  { %6674 = vmatpush3.msra.mxu1 %v7984_v12  ;;  %6685 = vmatpush3.msra.mxu0 %v7969_v4 }
 0x6ee   :  { %6675 = vmatprep.subr.mxu1 %v7841_v0  ;;  %6686 = vmatprep.subr.mxu0 %v7841_v0 }
 0x6ef   :  { %6676 = vmatpush3.msra.mxu1 %v7996_v14  ;;  %6687 = vmatpush3.msra.mxu0 %v7976_v8 }
 0x6f0   :  { %6677 = vmatprep.mubr.msk.f32.mxu1 %vm7842_vm0, %v7841_v0  ;;  %6688 = vmatprep.mubr.msk.f32.mxu0 %vm7842_vm0, %v7841_v0 }
 0x6f1   :  { %6691 = vmatprep.subr.mxu1 %v7841_v0  ;;  %6702 = vmatprep.subr.mxu0 %v7841_v0 }
 0x79e   :  { %v1004_v63 = vpop.f32.mrf.mxu1  ;;  %v1078_v2 = vpop.f32.mrf.mxu0 }
 0x79f   :  { %v1083_v25 = vrot.slane %v1078_v2, 6  ;;  %v1009_v30 = vrot.slane %v1004_v63, 6 }
 0x7a0   :  { %v6635_v5 = vpop.f32.mrf.mxu1  ;;  %v6646_v6 = vpop.f32.mrf.mxu0 }
 0x7a1   :  { %v1011_v31 = vadd.f32 %v1009_v30, %v8062_v35 }
 0x7a3   :  { %v6101_v32 = vmul.f32 -1.442695, %v1011_v31 }
 0x7a7   :  { %v1154_v9 = vpop.f32.mrf.mxu1  ;;  %v1230_v21 = vpop.f32.mrf.mxu0 }
 0x7a8   :  { %v1159_v22 = vrot.slane %v1154_v9, 6  ;;  %v1235_v26 = vrot.slane %v1230_v21, 6 }
 0x7a9   :  { %v6657_v23 = vpop.f32.mrf.mxu1  ;;  %v6668_v24 = vpop.f32.mrf.mxu0 }
 0x7aa   :  { %1160 = vrot.lane.b32.xlu1 %v1159_v22, %s7829_s28 }
 0x7ae   :  { %1084 = vrot.lane.b32.xlu1 %v1083_v25, %s7843_s6 }
 0x7b2   :  { %1236 = vrot.lane.b32.xlu1 %v1235_v26, %s7844_s10 }
 0x81c   :  { %v1161_v27 = vpop.permute.xlu1 %1160 }
 0x81d   :  { %v1163_v28 = vadd.f32 %v1161_v27, %v8062_v35 }
 0x81f   :  { %7314 = vtanh.f32 %v1163_v28 }
 0x820   :  { %7316 = vpow2.f32 %v6101_v32  ;;  %v1085_v39 = vpop.permute.xlu1 %1084 }
 0x821   :  { %v1087_v40 = vadd.f32 %v1085_v39, %v8062_v35 }
 0x823   :  { %v6102_v41 = vmul.f32 -1.442695, %v1087_v40 }
 0x824   :  { %v1237_v50 = vpop.permute.xlu1 %1236 }
 0x825   :  { %v1239_v52 = vadd.f32 %v1237_v50, %v8062_v35 }
 0x827   :  { %v6103_v53 = vmul.f32 -1.442695, %v1239_v52 }
 0x82c   :  { %v7315_v29 = vpop.eup %7314 }
 0x82d   :  { %1264 = vrot.lane.b32.xlu0 %v7315_v29, %s7829_s28  ;;  %v7317_v33 = vpop.eup %7316 }
 0x82e   :  { %v1243_v34 = vadd.f32 1.0, %v7317_v33 }
 0x830   :  { %7318 = vrcp.f32 %v1243_v34 }
 0x831   :  { %7320 = vpow2.f32 %v6102_v41 }
 0x83d   :  { %v7319_v36 = vpop.eup %7318 }
 0x83e   :  { %v7321_v42 = vpop.eup %7320 }
 0x83f   :  { %v1249_v43 = vadd.f32 1.0, %v7321_v42 }
 0x841   :  { %7322 = vrcp.f32 %v1249_v43 }
 0x84e   :  { %v7323_v44 = vpop.eup %7322 }
 0x84f   :  { %v1262_v46 = vmul.f32 %v7323_v44, %v1260_v45 }
 0x89f   :  { %v1265_v37 = vpop.permute.xlu0 %1264 }
 0x8a0   :  { %v1267_v38 = vmul.f32 %v7319_v36, %v1265_v37 }
 0x8a2   :  { %1269 = vrot.lane.b32.xlu0 %v1267_v38, %s7843_s6 }
 0x914   :  { %v1270_v47 = vpop.permute.xlu0 %1269 }
 0x915   :  { %v8191_v48 = vadd.f32 %v1270_v47, %v1262_v46 }
 0x917   :  { %7324 = vtanh.f32 %v8191_v48  ;;  %v1612_v43 = vrot.slane %v8191_v48, 7 }
 0x918   :  { %7326 = vpow2.f32 %v6103_v53 }
 0x924   :  { %v7325_v49 = vpop.eup %7324 }
 0x925   :  { %1275 = vrot.lane.b32.xlu0 %v7325_v49, %s7829_s28  ;;  %v7327_v54 = vpop.eup %7326 }
 0x926   :  { %v1256_v56 = vadd.f32 1.0, %v7327_v54 }
 0x928   :  { %7328 = vrcp.f32 %v1256_v56 }
 0x935   :  { %v7329_v57 = vpop.eup %7328 }
 0x997   :  { %v1276_v58 = vpop.permute.xlu0 %1275 }
 0x998   :  { %v8196_v51 = vmul.f32 %v7329_v57, %v1276_v58 }
 0x99a   :  { %v1285_v59 = vrot.slane %v8196_v51, 2 }
 0x99c   :  { %1286 = vrot.lane.b32.xlu1 %v1285_v59, %s7843_s6 }
 0xa0e   :  { %v1287_v60 = vpop.permute.xlu1 %1286 }
 0xa0f   :  { %6678 = vmatmul.mubr.msk.f32.vlgmr.msra.gmra.mxu1 %vm238_vm2, %v1287_v60  ;;  %6689 = vmatmul.mubr.msk.f32.vlgmr.msra.gmra.mxu0 %vm238_vm2, %v1287_v60 }
 0xa10   :  { %6692 = vmatpush3.msra.mxu1 %v8006_v16  ;;  %6703 = vmatpush3.msra.mxu0 %v7982_v11 }
 0xa11   :  { %6693 = vmatprep.subr.mxu1 %v7841_v0  ;;  %6704 = vmatprep.subr.mxu0 %v7841_v0 }
 0xa12   :  { %6694 = vmatpush3.msra.mxu1 %v8017_v18  ;;  %6705 = vmatpush3.msra.mxu0 %v7988_v13 }
 0xa13   :  { %6695 = vmatprep.subr.mxu1 %v7841_v0  ;;  %6706 = vmatprep.subr.mxu0 %v7841_v0 }
 0xa14   :  { %6696 = vmatpush3.msra.mxu1 %v8024_v19  ;;  %6707 = vmatpush3.msra.mxu0 %v8000_v15 }
 0xa15   :  { %6697 = vmatprep.subr.mxu1 %v7841_v0  ;;  %6708 = vmatprep.subr.mxu0 %v7841_v0 }
 0xa16   :  { %6698 = vmatpush3.msra.mxu1 %v8030_v20  ;;  %6699 = vmatprep.mubr.msk.f32.mxu1 %vm7842_vm0, %v7841_v0 }
 0xa17   :  { %6709 = vmatpush3.msra.mxu0 %v8011_v17  ;;  %6710 = vmatprep.mubr.msk.f32.mxu0 %vm7842_vm0, %v7841_v0 }
 0xa18   :  { %6700 = vmatmul.mubr.msk.f32.vlgmr.msra.gmra.mxu1 %vm238_vm2, %v1287_v60  ;;  %6711 = vmatmul.mubr.msk.f32.vlgmr.msra.gmra.mxu0 %vm238_vm2, %v1287_v60 }
 0xa19   :  { %6713 = vmatprep.subr.mxu1 %v7841_v0  ;;  %6724 = vmatprep.subr.mxu0 %v7841_v0 }
 0xa1a   :  { %6714 = vmatpush3.msra.mxu1 %v7974_v7  ;;  %6725 = vmatpush3.msra.mxu0 %v7963_v1 }
 0xa1b   :  { %6715 = vmatprep.subr.mxu1 %v7841_v0  ;;  %6726 = vmatprep.subr.mxu0 %v7841_v0 }
 0xa1c   :  { %6716 = vmatpush3.msra.mxu1 %v7980_v10  ;;  %6727 = vmatpush3.msra.mxu0 %v7966_v3 }
 0xa1d   :  { %6717 = vmatprep.subr.mxu1 %v7841_v0  ;;  %6728 = vmatprep.subr.mxu0 %v7841_v0 }
 0xa1e   :  { %6718 = vmatpush3.msra.mxu1 %v7984_v12  ;;  %6729 = vmatpush3.msra.mxu0 %v7969_v4 }
 0xa1f   :  { %6719 = vmatprep.subr.mxu1 %v7841_v0  ;;  %6730 = vmatprep.subr.mxu0 %v7841_v0 }
 0xa20   :  { %6720 = vmatpush3.msra.mxu1 %v7996_v14  ;;  %6731 = vmatpush3.msra.mxu0 %v7976_v8 }
 0xa21   :  { %6721 = vmatprep.mubr.msk.f32.mxu1 %vm7842_vm0, %v7841_v0  ;;  %6732 = vmatprep.mubr.msk.f32.mxu0 %vm7842_vm0, %v7841_v0 }
 0xa22   :  { %6735 = vmatprep.subr.mxu1 %v7841_v0  ;;  %6746 = vmatprep.subr.mxu0 %v7841_v0 }
 0xacf   :  { %v1356_v61 = vpop.f32.mrf.mxu1  ;;  %v1430_v62 = vpop.f32.mrf.mxu0 }
 0xad0   :  { %v1435_v23 = vrot.slane %v1430_v62, 5  ;;  %v1361_v28 = vrot.slane %v1356_v61, 5 }
 0xad1   :  { %v6679_v63 = vpop.f32.mrf.mxu1  ;;  %v6690_v2 = vpop.f32.mrf.mxu0 }
 0xad2   :  { %v1363_v29 = vadd.f32 %v1361_v28, %v8062_v35 }
 0xad4   :  { %v6108_v30 = vmul.f32 -1.442695, %v1363_v29 }
 0xad8   :  { %v1506_v5 = vpop.f32.mrf.mxu1  ;;  %v1582_v6 = vpop.f32.mrf.mxu0 }
 0xad9   :  { %v1511_v9 = vrot.slane %v1506_v5, 5  ;;  %v1587_v24 = vrot.slane %v1582_v6, 5 }
 0xada   :  { %v6701_v21 = vpop.f32.mrf.mxu1  ;;  %v6712_v22 = vpop.f32.mrf.mxu0 }
 0xadb   :  { %1512 = vrot.lane.b32.xlu0 %v1511_v9, %s7829_s28 }
 0xadf   :  { %1436 = vrot.lane.b32.xlu0 %v1435_v23, %s7843_s6 }
 0xae3   :  { %1588 = vrot.lane.b32.xlu0 %v1587_v24, %s7844_s10 }
 0xb4d   :  { %v1513_v25 = vpop.permute.xlu0 %1512 }
 0xb4e   :  { %v1515_v26 = vadd.f32 %v1513_v25, %v8062_v35 }
 0xb50   :  { %7330 = vtanh.f32 %v1515_v26 }
 0xb51   :  { %7332 = vpow2.f32 %v6108_v30  ;;  %v1437_v37 = vpop.permute.xlu0 %1436 }
 0xb52   :  { %v1439_v38 = vadd.f32 %v1437_v37, %v8062_v35 }
 0xb54   :  { %v6109_v39 = vmul.f32 -1.442695, %v1439_v38 }
 0xb55   :  { %v1589_v49 = vpop.permute.xlu0 %1588 }
 0xb56   :  { %v1591_v50 = vadd.f32 %v1589_v49, %v8062_v35  ;;  %v8367_v49 = vld [vmem:[#allocation8 + $0x30] sm:$0xff] }
 0xb58   :  { %v6110_v52 = vmul.f32 -1.442695, %v1591_v50  ;;  %v8372_v50 = vld [vmem:[#allocation8 + $0x8] sm:$0xff] }
 0xb5d   :  { %v7331_v27 = vpop.eup %7330 }
 0xb5e   :  { %1616 = vrot.lane.b32.xlu1 %v7331_v27, %s7829_s28  ;;  %v7333_v31 = vpop.eup %7332 }
 0xb5f   :  { %v1595_v32 = vadd.f32 1.0, %v7333_v31 }
 0xb61   :  { %7334 = vrcp.f32 %v1595_v32 }
 0xb62   :  { %7336 = vpow2.f32 %v6109_v39 }
 0xb6e   :  { %v7335_v33 = vpop.eup %7334 }
 0xb6f   :  { %v7337_v40 = vpop.eup %7336 }
 0xb70   :  { %v1601_v41 = vadd.f32 1.0, %v7337_v40 }
 0xb72   :  { %7338 = vrcp.f32 %v1601_v41 }
 0xb7f   :  { %v7339_v42 = vpop.eup %7338 }
 0xb80   :  { %v1614_v44 = vmul.f32 %v7339_v42, %v1612_v43 }
 0xbd0   :  { %v1617_v34 = vpop.permute.xlu1 %1616 }
 0xbd1   :  { %v1619_v36 = vmul.f32 %v7335_v33, %v1617_v34 }
 0xbd3   :  { %1621 = vrot.lane.b32.xlu1 %v1619_v36, %s7843_s6 }
 0xc45   :  { %v1622_v45 = vpop.permute.xlu1 %1621 }
 0xc46   :  { %v8253_v46 = vadd.f32 %v1622_v45, %v1614_v44  ;;  %v8327_v45 = vld [vmem:[#allocation8 + $0x78] sm:$0xff] }
 0xc48   :  { %7340 = vtanh.f32 %v8253_v46  ;;  %v1964_v29 = vrot.slane %v8253_v46, 7  ;;  %v8333_v46 = vld [vmem:[#allocation8 + $0x70] sm:$0xff] }
 0xc49   :  { %7342 = vpow2.f32 %v6110_v52  ;;  %v8375_v52 = vld [vmem:[#allocation8 + $0x28] sm:$0xff] }
 0xc55   :  { %v7341_v47 = vpop.eup %7340 }
 0xc56   :  { %1627 = vrot.lane.b32.xlu1 %v7341_v47, %s7829_s28  ;;  %v7343_v53 = vpop.eup %7342  ;;  %v8364_v47 = vld [vmem:[#allocation8 + $0x10] sm:$0xff] }
 0xc57   :  { %v1608_v54 = vadd.f32 1.0, %v7343_v53  ;;  %v8380_v53 = vld [vmem:[#allocation8] sm:$0xff] }
 0xc59   :  { %7344 = vrcp.f32 %v1608_v54  ;;  %v8383_v54 = vld [vmem:[#allocation8 + $0x20] sm:$0xff] }
 0xc66   :  { %v7345_v56 = vpop.eup %7344 }
 0xcc8   :  { %v1628_v57 = vpop.permute.xlu1 %1627 }
 0xcc9   :  { %v8258_v48 = vmul.f32 %v7345_v56, %v1628_v57 }
 0xccb   :  { %v1637_v58 = vrot.slane %v8258_v48, 3 }
 0xccd   :  { %1638 = vrot.lane.b32.xlu0 %v1637_v58, %s7843_s6 }
 0xd3f   :  { %v1639_v59 = vpop.permute.xlu0 %1638 }
 0xd40   :  { %6722 = vmatmul.mubr.msk.f32.vlgmr.msra.gmra.mxu1 %vm238_vm2, %v1639_v59  ;;  %6733 = vmatmul.mubr.msk.f32.vlgmr.msra.gmra.mxu0 %vm238_vm2, %v1639_v59 }
 0xd41   :  { %6736 = vmatpush3.msra.mxu1 %v8006_v16  ;;  %6747 = vmatpush3.msra.mxu0 %v7982_v11 }
 0xd42   :  { %6737 = vmatprep.subr.mxu1 %v7841_v0  ;;  %6748 = vmatprep.subr.mxu0 %v7841_v0 }
 0xd43   :  { %6738 = vmatpush3.msra.mxu1 %v8017_v18  ;;  %6749 = vmatpush3.msra.mxu0 %v7988_v13 }
 0xd44   :  { %6739 = vmatprep.subr.mxu1 %v7841_v0  ;;  %6750 = vmatprep.subr.mxu0 %v7841_v0 }
 0xd45   :  { %6740 = vmatpush3.msra.mxu1 %v8024_v19  ;;  %6751 = vmatpush3.msra.mxu0 %v8000_v15 }
 0xd46   :  { %6741 = vmatprep.subr.mxu1 %v7841_v0  ;;  %6752 = vmatprep.subr.mxu0 %v7841_v0 }
 0xd47   :  { %6742 = vmatpush3.msra.mxu1 %v8030_v20  ;;  %6743 = vmatprep.mubr.msk.f32.mxu1 %vm7842_vm0, %v7841_v0 }
 0xd48   :  { %6753 = vmatpush3.msra.mxu0 %v8011_v17  ;;  %6754 = vmatprep.mubr.msk.f32.mxu0 %vm7842_vm0, %v7841_v0 }
 0xd49   :  { %6744 = vmatmul.mubr.msk.f32.vlgmr.msra.gmra.mxu1 %vm238_vm2, %v1639_v59  ;;  %6755 = vmatmul.mubr.msk.f32.vlgmr.msra.gmra.mxu0 %vm238_vm2, %v1639_v59 }
 0xd4a   :  { %6757 = vmatprep.subr.mxu1 %v7841_v0  ;;  %6768 = vmatprep.subr.mxu0 %v7841_v0 }
 0xd4b   :  { %6758 = vmatpush3.msra.mxu1 %v7974_v7  ;;  %6769 = vmatpush3.msra.mxu0 %v7963_v1 }
 0xd4c   :  { %6759 = vmatprep.subr.mxu1 %v7841_v0  ;;  %6770 = vmatprep.subr.mxu0 %v7841_v0 }
 0xd4d   :  { %6760 = vmatpush3.msra.mxu1 %v7980_v10  ;;  %6771 = vmatpush3.msra.mxu0 %v7966_v3 }
 0xd4e   :  { %6761 = vmatprep.subr.mxu1 %v7841_v0  ;;  %6772 = vmatprep.subr.mxu0 %v7841_v0 }
 0xd4f   :  { %6762 = vmatpush3.msra.mxu1 %v7984_v12  ;;  %6773 = vmatpush3.msra.mxu0 %v7969_v4 }
 0xd50   :  { %6763 = vmatprep.subr.mxu1 %v7841_v0  ;;  %6774 = vmatprep.subr.mxu0 %v7841_v0 }
 0xd51   :  { %6764 = vmatpush3.msra.mxu1 %v7996_v14  ;;  %6775 = vmatpush3.msra.mxu0 %v7976_v8 }
 0xd52   :  { %6765 = vmatprep.mubr.msk.f32.mxu1 %vm7842_vm0, %v7841_v0  ;;  %6776 = vmatprep.mubr.msk.f32.mxu0 %vm7842_vm0, %v7841_v0 }
 0xd53   :  { %6779 = vmatprep.subr.mxu1 %v7841_v0  ;;  %6790 = vmatprep.subr.mxu0 %v7841_v0 }
 0xe00   :  { %v1708_v1 = vpop.f32.mrf.mxu1  ;;  %v1782_v3 = vpop.f32.mrf.mxu0 }
 0xe01   :  { %v1787_v8 = vrot.slane %v1782_v3, 4  ;;  %v1713_v62 = vrot.slane %v1708_v1, 4 }
 0xe02   :  { %v6723_v4 = vpop.f32.mrf.mxu1  ;;  %v6734_v7 = vpop.f32.mrf.mxu0 }
 0xe03   :  { %v1715_v63 = vadd.f32 %v1713_v62, %v8062_v35 }
 0xe05   :  { %v6115_v2 = vmul.f32 -1.442695, %v1715_v63 }
 0xe09   :  { %v1858_v10 = vpop.f32.mrf.mxu1  ;;  %v1934_v11 = vpop.f32.mrf.mxu0 }
 0xe0a   :  { %v1863_v12 = vrot.slane %v1858_v10, 4  ;;  %v1939_v15 = vrot.slane %v1934_v11, 4 }
 0xe0b   :  { %v6745_v13 = vpop.f32.mrf.mxu1  ;;  %v6756_v14 = vpop.f32.mrf.mxu0 }
 0xe0c   :  { %1864 = vrot.lane.b32.xlu1 %v1863_v12, %s7829_s28 }
 0xe10   :  { %1788 = vrot.lane.b32.xlu1 %v1787_v8, %s7843_s6 }
 0xe14   :  { %1940 = vrot.lane.b32.xlu1 %v1939_v15, %s7844_s10 }
 0xe7e   :  { %v1865_v17 = vpop.permute.xlu1 %1864 }
 0xe7f   :  { %v1867_v60 = vadd.f32 %v1865_v17, %v8062_v35 }
 0xe81   :  { %7346 = vtanh.f32 %v1867_v60 }
 0xe82   :  { %7348 = vpow2.f32 %v6115_v2  ;;  %v1789_v23 = vpop.permute.xlu1 %1788 }
 0xe83   :  { %v1791_v24 = vadd.f32 %v1789_v23, %v8062_v35 }
 0xe85   :  { %v6116_v25 = vmul.f32 -1.442695, %v1791_v24 }
 0xe86   :  { %v1941_v34 = vpop.permute.xlu1 %1940 }
 0xe87   :  { %v1943_v36 = vadd.f32 %v1941_v34, %v8062_v35 }
 0xe89   :  { %v6117_v37 = vmul.f32 -1.442695, %v1943_v36 }
 0xe8e   :  { %v7347_v61 = vpop.eup %7346 }
 0xe8f   :  { %1968 = vrot.lane.b32.xlu0 %v7347_v61, %s7829_s28  ;;  %v7349_v5 = vpop.eup %7348 }
 0xe90   :  { %v1947_v6 = vadd.f32 1.0, %v7349_v5 }
 0xe92   :  { %7350 = vrcp.f32 %v1947_v6 }
 0xe93   :  { %7352 = vpow2.f32 %v6116_v25 }
 0xe9f   :  { %v7351_v9 = vpop.eup %7350 }
 0xea0   :  { %v7353_v26 = vpop.eup %7352 }
 0xea1   :  { %v1953_v27 = vadd.f32 1.0, %v7353_v26 }
 0xea3   :  { %7354 = vrcp.f32 %v1953_v27 }
 0xeb0   :  { %v7355_v28 = vpop.eup %7354 }
 0xeb1   :  { %v1966_v30 = vmul.f32 %v7355_v28, %v1964_v29 }
 0xf01   :  { %v1969_v21 = vpop.permute.xlu0 %1968 }
 0xf02   :  { %v1971_v22 = vmul.f32 %v7351_v9, %v1969_v21 }
 0xf04   :  { %1973 = vrot.lane.b32.xlu0 %v1971_v22, %s7843_s6 }
 0xf76   :  { %v1974_v31 = vpop.permute.xlu0 %1973 }
 0xf77   :  { %v8315_v32 = vadd.f32 %v1974_v31, %v1966_v30 }
 0xf79   :  { %7356 = vtanh.f32 %v8315_v32  ;;  %v2316_v25 = vrot.slane %v8315_v32, 7 }
 0xf7a   :  { %7358 = vpow2.f32 %v6117_v37 }
 0xf86   :  { %v7357_v33 = vpop.eup %7356 }
 0xf87   :  { %1979 = vrot.lane.b32.xlu0 %v7357_v33, %s7829_s28  ;;  %v7359_v38 = vpop.eup %7358 }
 0xf88   :  { %v1960_v39 = vadd.f32 1.0, %v7359_v38 }
 0xf8a   :  { %7360 = vrcp.f32 %v1960_v39 }
 0xf97   :  { %v7361_v40 = vpop.eup %7360 }
 0xff9   :  { %v1980_v41 = vpop.permute.xlu0 %1979 }
 0xffa   :  { %v8320_v42 = vmul.f32 %v7361_v40, %v1980_v41  ;;  %v8412_v41 = vld [vmem:[#allocation8 + $0x58] sm:$0xff] }
 0xffc   :  { %v1989_v43 = vrot.slane %v8320_v42, 4 }
 0xffe   :  { %1990 = vrot.lane.b32.xlu1 %v1989_v43, %s7843_s6  ;;  %v8418_v43 = vld [vmem:[#allocation8 + $0x50] sm:$0xff] }
0x1070   :  { %v1991_v44 = vpop.permute.xlu1 %1990 }
0x1071   :  { %6766 = vmatmul.mubr.msk.f32.vlgmr.msra.gmra.mxu1 %vm238_vm2, %v1991_v44  ;;  %6777 = vmatmul.mubr.msk.f32.vlgmr.msra.gmra.mxu0 %vm238_vm2, %v1991_v44 }
0x1072   :  { %6780 = vmatpush3.msra.mxu1 %v8006_v16  ;;  %6791 = vmatpush3.msra.mxu0 %v8327_v45  ;;  %v8339_v16 = vld [vmem:[#allocation8 + $0x68] sm:$0xff] }
0x1073   :  { %6781 = vmatprep.subr.mxu1 %v7841_v0  ;;  %6792 = vmatprep.subr.mxu0 %v7841_v0 }
0x1074   :  { %6782 = vmatpush3.msra.mxu1 %v8017_v18  ;;  %6793 = vmatpush3.msra.mxu0 %v8333_v46  ;;  %v8347_v18 = vld [vmem:[#allocation8 + $0x60] sm:$0xff] }
0x1075   :  { %6783 = vmatprep.subr.mxu1 %v7841_v0  ;;  %6794 = vmatprep.subr.mxu0 %v7841_v0 }
0x1076   :  { %6784 = vmatpush3.msra.mxu1 %v8024_v19  ;;  %6795 = vmatpush3.msra.mxu0 %v8339_v16  ;;  %v8356_v19 = vld [vmem:[#allocation8 + $0x18] sm:$0xff] }
0x1077   :  { %6785 = vmatprep.subr.mxu1 %v7841_v0  ;;  %6796 = vmatprep.subr.mxu0 %v7841_v0 }
0x1078   :  { %6786 = vmatpush3.msra.mxu1 %v8030_v20  ;;  %6787 = vmatprep.mubr.msk.f32.mxu1 %vm7842_vm0, %v7841_v0  ;;  %v8359_v20 = vld [vmem:[#allocation8 + $0x38] sm:$0xff] }
0x1079   :  { %6797 = vmatpush3.msra.mxu0 %v8347_v18  ;;  %6798 = vmatprep.mubr.msk.f32.mxu0 %vm7842_vm0, %v7841_v0 }
0x107a   :  { %6788 = vmatmul.mubr.msk.f32.vlgmr.msra.gmra.mxu1 %vm238_vm2, %v1991_v44  ;;  %6799 = vmatmul.mubr.msk.f32.vlgmr.msra.gmra.mxu0 %vm238_vm2, %v1991_v44  ;;  %v8424_v44 = vld [vmem:[#allocation8 + $0x48] sm:$0xff] }
0x107b   :  { %6801 = vmatprep.subr.mxu1 %v7841_v0  ;;  %6812 = vmatprep.subr.mxu0 %v7841_v0 }
0x107c   :  { %6802 = vmatpush3.msra.mxu1 %v8356_v19  ;;  %6813 = vmatpush3.msra.mxu0 %v8359_v20 }
0x107d   :  { %6803 = vmatprep.subr.mxu1 %v7841_v0  ;;  %6814 = vmatprep.subr.mxu0 %v7841_v0 }
0x107e   :  { %6804 = vmatpush3.msra.mxu1 %v8364_v47  ;;  %6815 = vmatpush3.msra.mxu0 %v8367_v49 }
0x107f   :  { %6805 = vmatprep.subr.mxu1 %v7841_v0  ;;  %6816 = vmatprep.subr.mxu0 %v7841_v0 }
0x1080   :  { %6806 = vmatpush3.msra.mxu1 %v8372_v50  ;;  %6817 = vmatpush3.msra.mxu0 %v8375_v52 }
0x1081   :  { %6807 = vmatprep.subr.mxu1 %v7841_v0  ;;  %6818 = vmatprep.subr.mxu0 %v7841_v0 }
0x1082   :  { %6808 = vmatpush3.msra.mxu1 %v8380_v53  ;;  %6819 = vmatpush3.msra.mxu0 %v8383_v54 }
0x1083   :  { %6809 = vmatprep.mubr.msk.f32.mxu1 %vm7842_vm0, %v7841_v0  ;;  %6820 = vmatprep.mubr.msk.f32.mxu0 %vm7842_vm0, %v7841_v0 }
0x1084   :  { %6823 = vmatprep.subr.mxu1 %v7841_v0  ;;  %6834 = vmatprep.subr.mxu0 %v7841_v0 }
0x1131   :  { %v2060_v56 = vpop.f32.mrf.mxu1  ;;  %v2134_v57 = vpop.f32.mrf.mxu0 }
0x1132   :  { %v2139_v11 = vrot.slane %v2134_v57, 3  ;;  %v2065_v15 = vrot.slane %v2060_v56, 3  ;;  %v8430_v56 = vld [vmem:[#allocation8 + $0x40] sm:$0xff] }
0x1133   :  { %v6767_v58 = vpop.f32.mrf.mxu1  ;;  %v6778_v59 = vpop.f32.mrf.mxu0 }
0x1134   :  { %v2067_v17 = vadd.f32 %v2065_v15, %v8062_v35 }
0x1136   :  { %v6122_v60 = vmul.f32 -1.442695, %v2067_v17 }
0x113a   :  { %v2210_v1 = vpop.f32.mrf.mxu1  ;;  %v2286_v3 = vpop.f32.mrf.mxu0 }
0x113b   :  { %v2215_v4 = vrot.slane %v2210_v1, 3  ;;  %v2291_v12 = vrot.slane %v2286_v3, 3 }
0x113c   :  { %v6789_v7 = vpop.f32.mrf.mxu1  ;;  %v6800_v10 = vpop.f32.mrf.mxu0 }
0x113d   :  { %2216 = vrot.lane.b32.xlu0 %v2215_v4, %s7829_s28 }
0x1141   :  { %2140 = vrot.lane.b32.xlu0 %v2139_v11, %s7843_s6 }
0x1145   :  { %2292 = vrot.lane.b32.xlu0 %v2291_v12, %s7844_s10 }
0x11af   :  { %v2217_v13 = vpop.permute.xlu0 %2216 }
0x11b0   :  { %v2219_v14 = vadd.f32 %v2217_v13, %v8062_v35 }
0x11b2   :  { %7362 = vtanh.f32 %v2219_v14 }
0x11b3   :  { %7364 = vpow2.f32 %v6122_v60  ;;  %v2141_v6 = vpop.permute.xlu0 %2140 }
0x11b4   :  { %v2143_v9 = vadd.f32 %v2141_v6, %v8062_v35 }
0x11b6   :  { %v6123_v21 = vmul.f32 -1.442695, %v2143_v9 }
0x11b7   :  { %v2293_v30 = vpop.permute.xlu0 %2292 }
0x11b8   :  { %v2295_v31 = vadd.f32 %v2293_v30, %v8062_v35 }
0x11ba   :  { %v6124_v33 = vmul.f32 -1.442695, %v2295_v31 }
0x11bf   :  { %v7363_v8 = vpop.eup %7362 }
0x11c0   :  { %2320 = vrot.lane.b32.xlu1 %v7363_v8, %s7829_s28  ;;  %v7365_v61 = vpop.eup %7364 }
0x11c1   :  { %v2299_v62 = vadd.f32 1.0, %v7365_v61 }
0x11c3   :  { %7366 = vrcp.f32 %v2299_v62 }
0x11c4   :  { %7368 = vpow2.f32 %v6123_v21 }
0x11d0   :  { %v7367_v63 = vpop.eup %7366 }
0x11d1   :  { %v7369_v22 = vpop.eup %7368 }
0x11d2   :  { %v2305_v23 = vadd.f32 1.0, %v7369_v22 }
0x11d4   :  { %7370 = vrcp.f32 %v2305_v23 }
0x11e1   :  { %v7371_v24 = vpop.eup %7370 }
0x11e2   :  { %v2318_v26 = vmul.f32 %v7371_v24, %v2316_v25 }
0x1232   :  { %v2321_v2 = vpop.permute.xlu1 %2320 }
0x1233   :  { %v2323_v5 = vmul.f32 %v7367_v63, %v2321_v2 }
0x1235   :  { %2325 = vrot.lane.b32.xlu1 %v2323_v5, %s7843_s6 }
0x12a7   :  { %v2326_v27 = vpop.permute.xlu1 %2325 }
0x12a8   :  { %v8401_v28 = vadd.f32 %v2326_v27, %v2318_v26 }
0x12aa   :  { %7372 = vtanh.f32 %v8401_v28  ;;  %v2668_v5 = vrot.slane %v8401_v28, 7 }
0x12ab   :  { %7374 = vpow2.f32 %v6124_v33 }
0x12b7   :  { %v7373_v29 = vpop.eup %7372 }
0x12b8   :  { %2331 = vrot.lane.b32.xlu1 %v7373_v29, %s7829_s28  ;;  %v7375_v34 = vpop.eup %7374 }
0x12b9   :  { %v2312_v36 = vadd.f32 1.0, %v7375_v34 }
0x12bb   :  { %7376 = vrcp.f32 %v2312_v36 }
0x12c8   :  { %v7377_v37 = vpop.eup %7376 }
0x132a   :  { %v2332_v38 = vpop.permute.xlu1 %2331 }
0x132b   :  { %v8406_v32 = vmul.f32 %v7377_v37, %v2332_v38 }
0x132d   :  { %v2341_v39 = vrot.slane %v8406_v32, 5 }
0x132f   :  { %2342 = vrot.lane.b32.xlu0 %v2341_v39, %s7843_s6 }
0x13a1   :  { %v2343_v40 = vpop.permute.xlu0 %2342 }
0x13a2   :  { %6810 = vmatmul.mubr.msk.f32.vlgmr.msra.gmra.mxu1 %vm238_vm2, %v2343_v40  ;;  %6821 = vmatmul.mubr.msk.f32.vlgmr.msra.gmra.mxu0 %vm238_vm2, %v2343_v40 }
0x13a3   :  { %6824 = vmatpush3.msra.mxu1 %v8412_v41  ;;  %6835 = vmatpush3.msra.mxu0 %v8327_v45 }
0x13a4   :  { %6825 = vmatprep.subr.mxu1 %v7841_v0  ;;  %6836 = vmatprep.subr.mxu0 %v7841_v0 }
0x13a5   :  { %6826 = vmatpush3.msra.mxu1 %v8418_v43  ;;  %6837 = vmatpush3.msra.mxu0 %v8333_v46 }
0x13a6   :  { %6827 = vmatprep.subr.mxu1 %v7841_v0  ;;  %6838 = vmatprep.subr.mxu0 %v7841_v0 }
0x13a7   :  { %6828 = vmatpush3.msra.mxu1 %v8424_v44  ;;  %6839 = vmatpush3.msra.mxu0 %v8339_v16 }
0x13a8   :  { %6829 = vmatprep.subr.mxu1 %v7841_v0  ;;  %6840 = vmatprep.subr.mxu0 %v7841_v0 }
0x13a9   :  { %6830 = vmatpush3.msra.mxu1 %v8430_v56  ;;  %6831 = vmatprep.mubr.msk.f32.mxu1 %vm7842_vm0, %v7841_v0 }
0x13aa   :  { %6841 = vmatpush3.msra.mxu0 %v8347_v18  ;;  %6842 = vmatprep.mubr.msk.f32.mxu0 %vm7842_vm0, %v7841_v0 }
0x13ab   :  { %6832 = vmatmul.mubr.msk.f32.vlgmr.msra.gmra.mxu1 %vm238_vm2, %v2343_v40  ;;  %6843 = vmatmul.mubr.msk.f32.vlgmr.msra.gmra.mxu0 %vm238_vm2, %v2343_v40 }
0x13ac   :  { %6845 = vmatprep.subr.mxu1 %v7841_v0  ;;  %6856 = vmatprep.subr.mxu0 %v7841_v0 }
0x13ad   :  { %6846 = vmatpush3.msra.mxu1 %v8356_v19  ;;  %6857 = vmatpush3.msra.mxu0 %v8359_v20 }
0x13ae   :  { %6847 = vmatprep.subr.mxu1 %v7841_v0  ;;  %6858 = vmatprep.subr.mxu0 %v7841_v0 }
0x13af   :  { %6848 = vmatpush3.msra.mxu1 %v8364_v47  ;;  %6859 = vmatpush3.msra.mxu0 %v8367_v49 }
0x13b0   :  { %6849 = vmatprep.subr.mxu1 %v7841_v0  ;;  %6860 = vmatprep.subr.mxu0 %v7841_v0 }
0x13b1   :  { %6850 = vmatpush3.msra.mxu1 %v8372_v50  ;;  %6861 = vmatpush3.msra.mxu0 %v8375_v52 }
0x13b2   :  { %6851 = vmatprep.subr.mxu1 %v7841_v0  ;;  %6862 = vmatprep.subr.mxu0 %v7841_v0 }
0x13b3   :  { %6852 = vmatpush3.msra.mxu1 %v8380_v53  ;;  %6863 = vmatpush3.msra.mxu0 %v8383_v54 }
0x13b4   :  { %6853 = vmatprep.mubr.msk.f32.mxu1 %vm7842_vm0, %v7841_v0  ;;  %6864 = vmatprep.mubr.msk.f32.mxu0 %vm7842_vm0, %v7841_v0 }
0x13b5   :  { %6867 = vmatprep.subr.mxu1 %v7841_v0  ;;  %6878 = vmatprep.subr.mxu0 %v7841_v0 }
0x1462   :  { %v2412_v19 = vpop.f32.mrf.mxu1  ;;  %v2486_v20 = vpop.f32.mrf.mxu0 }
0x1463   :  { %v2491_v54 = vrot.slane %v2486_v20, 2  ;;  %v2417_v7 = vrot.slane %v2412_v19, 2 }
0x1464   :  { %v6811_v47 = vpop.f32.mrf.mxu1  ;;  %v6822_v49 = vpop.f32.mrf.mxu0 }
0x1465   :  { %v2419_v10 = vadd.f32 %v2417_v7, %v8062_v35 }
0x1467   :  { %v6129_v11 = vmul.f32 -1.442695, %v2419_v10 }
0x146b   :  { %v2562_v50 = vpop.f32.mrf.mxu1  ;;  %v2638_v52 = vpop.f32.mrf.mxu0 }
0x146c   :  { %v2567_v57 = vrot.slane %v2562_v50, 2  ;;  %v2643_v59 = vrot.slane %v2638_v52, 2 }
0x146d   :  { %v6833_v53 = vpop.f32.mrf.mxu1  ;;  %v6844_v58 = vpop.f32.mrf.mxu0 }
0x146e   :  { %2568 = vrot.lane.b32.xlu1 %v2567_v57, %s7829_s28 }
0x1472   :  { %2492 = vrot.lane.b32.xlu1 %v2491_v54, %s7843_s6 }
0x1476   :  { %2644 = vrot.lane.b32.xlu1 %v2643_v59, %s7844_s10 }
0x14e0   :  { %v2569_v1 = vpop.permute.xlu1 %2568 }
0x14e1   :  { %v2571_v3 = vadd.f32 %v2569_v1, %v8062_v35 }
0x14e3   :  { %7378 = vtanh.f32 %v2571_v3 }
0x14e4   :  { %7380 = vpow2.f32 %v6129_v11  ;;  %v2493_v17 = vpop.permute.xlu1 %2492 }
0x14e5   :  { %v2495_v60 = vadd.f32 %v2493_v17, %v8062_v35  ;;  %v8543_v17 = vld [vmem:[#allocation12] sm:$0xff] }
0x14e7   :  { %v6130_v61 = vmul.f32 -1.442695, %v2495_v60  ;;  %v8547_v60 = vld [vmem:[#allocation15 + $0x1] sm:$0x1] }
0x14e8   :  { %v2645_v23 = vpop.permute.xlu1 %2644 }
0x14e9   :  { %v2647_v24 = vadd.f32 %v2645_v23, %v8062_v35  ;;  %v7279_v23 = vld [vmem:[#allocation11] sm:$0xff]  }
0x14eb   :  { %v6131_v25 = vmul.f32 -1.442695, %v2647_v24 }
0x14f0   :  { %v7379_v4 = vpop.eup %7378 }
0x14f1   :  { %2672 = vrot.lane.b32.xlu0 %v7379_v4, %s7829_s28  ;;  %v7381_v12 = vpop.eup %7380 }
0x14f2   :  { %v2651_v13 = vadd.f32 1.0, %v7381_v12  ;;  %v8528_v12 = vld [vmem:[#allocation12 + $0x18] sm:$0xff] }
0x14f4   :  { %7382 = vrcp.f32 %v2651_v13  ;;  %v8530_v13 = vld [vmem:[#allocation12 + $0x10] sm:$0xff] }
0x14f5   :  { %7384 = vpow2.f32 %v6130_v61  ;;  %v8549_v61 = vld [vmem:[#allocation12 + $0x58] sm:$0xff] }
0x1501   :  { %v7383_v14 = vpop.eup %7382 }
0x1502   :  { %v7385_v62 = vpop.eup %7384 }
0x1503   :  { %v2657_v63 = vadd.f32 1.0, %v7385_v62  ;;  %v8553_v62 = vld [vmem:[#allocation12 + $0x50] sm:$0xff] }
0x1505   :  { %7386 = vrcp.f32 %v2657_v63  ;;  %v8560_v63 = vld [vmem:[#allocation12 + $0x48] sm:$0xff] }
0x1512   :  { %v7387_v2 = vpop.eup %7386 }
0x1513   :  { %v2670_v6 = vmul.f32 %v7387_v2, %v2668_v5  ;;  %v8563_v2 = vld [vmem:[#allocation12 + $0x40] sm:$0xff] }
0x1563   :  { %v2673_v8 = vpop.permute.xlu0 %2672 }
0x1564   :  { %v2675_v15 = vmul.f32 %v7383_v14, %v2673_v8 }
0x1566   :  { %2677 = vrot.lane.b32.xlu0 %v2675_v15, %s7843_s6  ;;  %v8539_v15 = vld [vmem:[#allocation12 + $0x8] sm:$0xff] }
0x15d8   :  { %v2678_v9 = vpop.permute.xlu0 %2677 }
0x15d9   :  { %v8471_v21 = vadd.f32 %v2678_v9, %v2670_v6 }
0x15db   :  { %7388 = vtanh.f32 %v8471_v21  ;;  %v3020_v57 = vrot.slane %v8471_v21, 7 }
0x15dc   :  { %7390 = vpow2.f32 %v6131_v25 }
0x15e8   :  { %v7389_v22 = vpop.eup %7388 }
0x15e9   :  { %2683 = vrot.lane.b32.xlu0 %v7389_v22, %s7829_s28  ;;  %v7391_v26 = vpop.eup %7390  ;;  %v7278_v22 = vld [vmem:[#allocation11 + $0x8] sm:$0xff]  }
0x15ea   :  { %v2664_v27 = vadd.f32 1.0, %v7391_v26 }
0x15ec   :  { %7392 = vrcp.f32 %v2664_v27 }
0x15f9   :  { %v7393_v29 = vpop.eup %7392 }
0x165b   :  { %v2684_v30 = vpop.permute.xlu0 %2683 }
0x165c   :  { %v8476_v28 = vmul.f32 %v7393_v29, %v2684_v30 }
0x165e   :  { %v2693_v31 = vrot.slane %v8476_v28, 6 }
0x1660   :  { %2694 = vrot.lane.b32.xlu1 %v2693_v31, %s7843_s6 }
0x16d2   :  { %v2695_v33 = vpop.permute.xlu1 %2694 }
0x16d3   :  { %6854 = vmatmul.mubr.msk.f32.vlgmr.msra.gmra.mxu1 %vm238_vm2, %v2695_v33  ;;  %6865 = vmatmul.mubr.msk.f32.vlgmr.msra.gmra.mxu0 %vm238_vm2, %v2695_v33 }
0x16d4   :  { %6868 = vmatpush3.msra.mxu1 %v8412_v41  ;;  %6879 = vmatpush3.msra.mxu0 %v8327_v45 }
0x16d5   :  { %6869 = vmatprep.subr.mxu1 %v7841_v0  ;;  %6880 = vmatprep.subr.mxu0 %v7841_v0 }
0x16d6   :  { %6870 = vmatpush3.msra.mxu1 %v8418_v43  ;;  %6881 = vmatpush3.msra.mxu0 %v8333_v46 }
0x16d7   :  { %6871 = vmatprep.subr.mxu1 %v7841_v0  ;;  %6882 = vmatprep.subr.mxu0 %v7841_v0 }
0x16d8   :  { %6872 = vmatpush3.msra.mxu1 %v8424_v44  ;;  %6883 = vmatpush3.msra.mxu0 %v8339_v16 }
0x16d9   :  { %6873 = vmatprep.subr.mxu1 %v7841_v0  ;;  %6884 = vmatprep.subr.mxu0 %v7841_v0 }
0x16da   :  { %6874 = vmatpush3.msra.mxu1 %v8430_v56  ;;  %6875 = vmatprep.mubr.msk.f32.mxu1 %vm7842_vm0, %v7841_v0 }
0x16db   :  { %6885 = vmatpush3.msra.mxu0 %v8347_v18  ;;  %6886 = vmatprep.mubr.msk.f32.mxu0 %vm7842_vm0, %v7841_v0 }
0x16dc   :  { %6876 = vmatmul.mubr.msk.f32.vlgmr.msra.gmra.mxu1 %vm238_vm2, %v2695_v33  ;;  %6887 = vmatmul.mubr.msk.f32.vlgmr.msra.gmra.mxu0 %vm238_vm2, %v2695_v33 }
0x16dd   :  { %6897 = vmatprep.subr.mxu0 %v7841_v0  ;;  %6905 = vmatprep.mubr.msk.f32.mxu0 %vm7842_vm0, %v7841_v0 }
0x16de   :  { %6889 = vmatprep.subr.bf16.mxu1 %v7841_v0  ;;  %6893 = vmatprep.mubr.msk.bf16.mxu1 %vm7842_vm0, %v7841_v0 }
0x16df   :  { %6898 = vmatpush3.msra.mxu0 %v8528_v12  ;;  %6890 = vmatpush3.bf16.msra.mxu1 %v7278_v22 }
0x16e0   :  { %6899 = vmatprep.subr.mxu0 %v7841_v0  ;;  %6891 = vmatprep.subr.bf16.mxu1 %v7841_v0 }
0x16e1   :  { %6900 = vmatpush3.msra.mxu0 %v8530_v13 }
0x16e2   :  { %6901 = vmatprep.subr.mxu0 %v7841_v0 }
0x16e3   :  { %6902 = vmatpush3.msra.mxu0 %v8539_v15  ;;  %6892 = vmatpush3.bf16.msra.mxu1 %v7279_v23 }
0x16e4   :  { %6903 = vmatprep.subr.mxu0 %v7841_v0  ;;  %6908 = vmatprep.subr.mxu1 %v7841_v0 }
0x16e5   :  { %6904 = vmatpush3.msra.mxu0 %v8543_v17 }
0x16e6   :  { %6919 = vmatprep.subr.mxu0 %v7841_v0  ;;  %6906 = vmatmul.mubr.msk.f32.vlgmr.msra.gmra.mxu0 %vm238_vm2, %v8547_v60 }
0x16e7   :  { %6920 = vmatpush3.msra.mxu0 %v8549_v61  ;;  %6927 = vmatprep.mubr.msk.f32.mxu0 %vm7842_vm0, %v7841_v0 }
0x16e8   :  { %6921 = vmatprep.subr.mxu0 %v7841_v0 }
0x16e9   :  { %6922 = vmatpush3.msra.mxu0 %v8553_v62 }
0x16ea   :  { %6923 = vmatprep.subr.mxu0 %v7841_v0 }
0x16eb   :  { %6924 = vmatpush3.msra.mxu0 %v8560_v63 }
0x16ec   :  { %6925 = vmatprep.subr.mxu0 %v7841_v0 }
0x16ed   :  { %6926 = vmatpush3.msra.mxu0 %v8563_v2 }
0x16ee   :  { %6928 = vmatmul.mubr.msk.f32.vlgmr.msra.gmra.mxu0 %vm238_vm2, %v8547_v60  ;;  %6941 = vmatprep.subr.mxu0 %v7841_v0 }
0x16ef   :  { %6949 = vmatprep.mubr.msk.f32.mxu0 %vm7842_vm0, %v7841_v0  ;;  %6942 = vmatpush3.msra.mxu0 %v8528_v12 }
0x16f0   :  { %6943 = vmatprep.subr.mxu0 %v7841_v0 }
0x16f1   :  { %6944 = vmatpush3.msra.mxu0 %v8530_v13 }
0x16f2   :  { %6945 = vmatprep.subr.mxu0 %v7841_v0 }
0x16f3   :  { %6946 = vmatpush3.msra.mxu0 %v8539_v15 }
0x16f4   :  { %6947 = vmatprep.subr.mxu0 %v7841_v0 }
0x16f5   :  { %6948 = vmatpush3.msra.mxu0 %v8543_v17 }
0x16f6   :  { %6963 = vmatprep.subr.mxu0 %v7841_v0 }
0x1793   :  { %v2764_v45 = vpop.f32.mrf.mxu1  ;;  %v2838_v46 = vpop.f32.mrf.mxu0 }
0x1794   :  { %v2843_v40 = vrot.slane %v2838_v46, 1  ;;  %v2769_v54 = vrot.slane %v2764_v45, 1 }
0x1795   :  { %v6855_v16 = vpop.f32.mrf.mxu1  ;;  %v6866_v18 = vpop.f32.mrf.mxu0 }
0x1796   :  { %v2771_v59 = vadd.f32 %v2769_v54, %v8062_v35  ;;  %v8603_v16 = vld [vmem:[#allocation12 + $0x38] sm:$0xff]  ;;  %v8606_v18 = vld [vmem:[#allocation12 + $0x30] sm:$0xff] }
0x1798   :  { %v6136_v1 = vmul.f32 -1.442695, %v2771_v59 }
0x179c   :  { %v2914_v34 = vpop.f32.mrf.mxu1  ;;  %v2990_v36 = vpop.f32.mrf.mxu0 }
0x179d   :  { %v2919_v37 = vrot.slane %v2914_v34, 1  ;;  %v2995_v41 = vrot.slane %v2990_v36, 1  ;;  %v8612_v34 = vld [vmem:[#allocation12 + $0x28] sm:$0xff]  ;;  %v8616_v36 = vld [vmem:[#allocation12 + $0x20] sm:$0xff] }
0x179e   :  { %v6877_v38 = vpop.f32.mrf.mxu1  ;;  %v6888_v39 = vpop.f32.mrf.mxu0 }
0x179f   :  { %2920 = vrot.lane.b32.xlu0 %v2919_v37, %s7829_s28  ;;  %v8620_v37 = vld [vmem:[#allocation12 + $0x78] sm:$0xff]  ;;  %v8626_v38 = vld [vmem:[#allocation12 + $0x70] sm:$0xff]  ;;  %v8632_v39 = vld [vmem:[#allocation12 + $0x68] sm:$0xff] }
0x17a3   :  { %2844 = vrot.lane.b32.xlu0 %v2843_v40, %s7843_s6  ;;  %v8636_v40 = vld [vmem:[#allocation12 + $0x60] sm:$0xff] }
0x17a6   :  { %v8599_v29 = vpop.f32.mrf.mxu0 }
0x17a7   :  { %2996 = vrot.lane.b32.xlu0 %v2995_v41, %s7844_s10  ;;  %v6139_v41 = vld [vmem:[#allocation14] ss:$0 sm:$0xff] }
0x17a8   :  { %v6907_v30 = vpop.f32.mrf.mxu0 }
0x17ab   :  { %928 = vrot.lane.b32.xlu0 %v8134_v55, %s7843_s6 }
0x17af   :  { %1632 = vrot.lane.b32.xlu0 %v8258_v48, %s7843_s6 }
0x17b3   :  { %2336 = vrot.lane.b32.xlu0 %v8406_v32, %s7843_s6 }
0x1811   :  { %v2921_v43 = vpop.permute.xlu0 %2920 }
0x1812   :  { %v2923_v44 = vadd.f32 %v2921_v43, %v8062_v35 }
0x1814   :  { %7394 = vtanh.f32 %v2923_v44 }
0x1815   :  { %v2845_v56 = vpop.permute.xlu0 %2844 }
0x1816   :  { %v2847_v19 = vadd.f32 %v2845_v56, %v8062_v35 }
0x1818   :  { %v6137_v20 = vmul.f32 -1.442695, %v2847_v19 }
0x1819   :  { %v8519_v47 = vpop.permute.xlu0 %2996 }
0x181a   :  { %7396 = vpow2.f32 %v6137_v20 }
0x181d   :  { %v929_v49 = vpop.permute.xlu0 %928 }
0x181e   :  { %932 = vst.msk [vmem:[#allocation2] sm:$0x2] %vm931_vm4, %v929_v49 }
0x1821   :  { %v7395_v55 = vpop.eup %7394  ;;  %v1633_v48 = vpop.permute.xlu0 %1632 }
0x1822   :  { %1636 = vst.msk [vmem:[#allocation2] sm:$0x8] %vm1635_vm5, %v1633_v48  ;;  %3024 = vrot.lane.b32.xlu1 %v7395_v55, %s7829_s28 }
0x1825   :  { %v2337_v32 = vpop.permute.xlu0 %2336 }
0x1826   :  { %2340 = vst.msk [vmem:[#allocation2] sm:$0x20] %vm2339_vm6, %v2337_v32 }
0x1827   :  { %v7397_v50 = vpop.eup %7396 }
0x1828   :  { %v3009_v52 = vadd.f32 1.0, %v7397_v50 }
0x182a   :  { %7398 = vrcp.f32 %v3009_v52 }
0x182b   :  { %7400 = vpow2.f32 %v6136_v1 }
0x1837   :  { %v7399_v53 = vpop.eup %7398 }
0x1838   :  { %v3022_v58 = vmul.f32 %v7399_v53, %v3020_v57  ;;  %v7401_v3 = vpop.eup %7400  ;;  %v3133_v57 = vld [vmem:[#allocation17 + $0x1] sm:$0x1] }
0x1839   :  { %v3003_v4 = vadd.f32 1.0, %v7401_v3 }
0x183b   :  { %7402 = vrcp.f32 %v3003_v4 }
0x1848   :  { %v7403_v7 = vpop.eup %7402 }
0x1894   :  { %v3025_v10 = vpop.permute.xlu1 %3024 }
0x1895   :  { %v3027_v11 = vmul.f32 %v7403_v7, %v3025_v10 }
0x1897   :  { %3029 = vrot.lane.b32.xlu1 %v3027_v11, %s7843_s6 }
0x1909   :  { %v3030_v14 = vpop.permute.xlu1 %3029 }
0x190a   :  { %v8536_v8 = vadd.f32 %v3030_v14, %v3022_v58 }
0x190c   :  { %7404 = vtanh.f32 %v8536_v8 }
0x1919   :  { %v7405_v5 = vpop.eup %7404 }
0x191a   :  { %3035 = vrot.lane.b32.xlu1 %v7405_v5, %s7829_s28 }
0x191e   :  { %1280 = vrot.lane.b32.xlu1 %v8196_v51, %s7843_s6  ;;  %v2999_v51 = vadd.f32 %v8519_v47, %v8062_v35 }
0x1920   :  { %v6138_v6 = vmul.f32 -1.442695, %v2999_v51 }
0x1922   :  { %1984 = vrot.lane.b32.xlu1 %v8320_v42, %s7843_s6  ;;  %7406 = vpow2.f32 %v6138_v6 }
0x1926   :  { %2688 = vrot.lane.b32.xlu1 %v8476_v28, %s7843_s6  ;;  %v3349_v28 = vpop.f32.mrf.mxu0 }
0x1928   :  { %v6929_v31 = vpop.f32.mrf.mxu0 }
0x192a   :  { %3354 = vrot.lane.b32.xlu1 %v3349_v28, %s7829_s28 }
0x192f   :  { %v7407_v9 = vpop.eup %7406 }
0x1930   :  { %v3016_v21 = vadd.f32 1.0, %v7407_v9 }
0x1932   :  { %7408 = vrcp.f32 %v3016_v21 }
0x193f   :  { %v7409_v42 = vpop.eup %7408 }
0x198c   :  { %v3036_v24 = vpop.permute.xlu1 %3035 }
0x198d   :  { %v8592_v25 = vmul.f32 %v7409_v42, %v3036_v24 }
0x198f   :  { %3040 = vrot.lane.b32.xlu0 %v8592_v25, %s7843_s6 }
0x1990   :  { %v1281_v35 = vpop.permute.xlu1 %1280 }
0x1991   :  { %1284 = vst.msk [vmem:[#allocation2] sm:$0x4] %vm1283_vm7, %v1281_v35 }
0x1994   :  { %v1985_v26 = vpop.permute.xlu1 %1984 }
0x1995   :  { %1988 = vst.msk [vmem:[#allocation2] sm:$0x10] %vm1987_vm8, %v1985_v26 }
0x1998   :  { %v2689_v27 = vpop.permute.xlu1 %2688 }
0x1999   :  { %2692 = vst.msk [vmem:[#allocation2] sm:$0x40] %vm2691_vm9, %v2689_v27 }
0x199c   :  { %v3355_v44 = vpop.permute.xlu1 %3354 }
0x1a01   :  { %v3041_v33 = vpop.permute.xlu0 %3040 }
0x1a02   :  { %3044 = vst.msk [vmem:[#allocation2] sm:$0x80] %vm3043_vm10, %v3041_v33 }
0x1a09   :  { %v3045_v45 = vld [vmem:[#allocation2] sm:$0xff] }
0x1a0a   :  { %v3051_v46 = vpack.c.bf16 %v3045_v45, %v3045_v45 }
0x1a0c   :  { %6894 = vmatmul.mubr.msk.bf16.vlgmr.msra.gmra.mxu1 %vm238_vm2, %v3051_v46 }
0x1a0d   :  { %6909 = vmatpush3.msra.mxu1 %v8603_v16  ;;  %6916 = vmatprep.mubr.msk.f32.mxu1 %vm7842_vm0, %v7841_v0 }
0x1a0e   :  { %6910 = vmatprep.subr.mxu1 %v7841_v0 }
0x1a0f   :  { %6911 = vmatpush3.msra.mxu1 %v8606_v18 }
0x1a10   :  { %6912 = vmatprep.subr.mxu1 %v7841_v0 }
0x1a11   :  { %6913 = vmatpush3.msra.mxu1 %v8612_v34 }
0x1a12   :  { %6914 = vmatprep.subr.mxu1 %v7841_v0 }
0x1a13   :  { %6915 = vmatpush3.msra.mxu1 %v8616_v36 }
0x1a14   :  { %6917 = vmatmul.mubr.msk.f32.vlgmr.msra.gmra.mxu1 %vm238_vm2, %v8547_v60  ;;  %6930 = vmatprep.subr.mxu1 %v7841_v0 }
0x1a15   :  { %6931 = vmatpush3.msra.mxu1 %v8620_v37  ;;  %6938 = vmatprep.mubr.msk.f32.mxu1 %vm7842_vm0, %v7841_v0 }
0x1a16   :  { %6932 = vmatprep.subr.mxu1 %v7841_v0 }
0x1a17   :  { %6933 = vmatpush3.msra.mxu1 %v8626_v38 }
0x1a18   :  { %6934 = vmatprep.subr.mxu1 %v7841_v0 }
0x1a19   :  { %6935 = vmatpush3.msra.mxu1 %v8632_v39 }
0x1a1a   :  { %6936 = vmatprep.subr.mxu1 %v7841_v0 }
0x1a1b   :  { %6937 = vmatpush3.msra.mxu1 %v8636_v40 }
0x1a1c   :  { %6939 = vmatmul.mubr.msk.f32.vlgmr.msra.gmra.mxu1 %vm238_vm2, %v8547_v60  ;;  %6952 = vmatprep.subr.mxu1 %v7841_v0 }
0x1a1d   :  { %6953 = vmatpush3.msra.mxu1 %v8603_v16  ;;  %6960 = vmatprep.mubr.msk.f32.mxu1 %vm7842_vm0, %v7841_v0 }
0x1a1e   :  { %6954 = vmatprep.subr.mxu1 %v7841_v0 }
0x1a1f   :  { %6955 = vmatpush3.msra.mxu1 %v8606_v18 }
0x1a20   :  { %6956 = vmatprep.subr.mxu1 %v7841_v0 }
0x1a21   :  { %6957 = vmatpush3.msra.mxu1 %v8612_v34 }
0x1a22   :  { %6958 = vmatprep.subr.mxu1 %v7841_v0 }
0x1a23   :  { %6959 = vmatpush3.msra.mxu1 %v8616_v36 }
0x1a24   :  { %6974 = vmatprep.subr.mxu1 %v7841_v0 }
0x1acc   :  { %v3107_v43 = vpop.f32.mrf.mxu1 }
0x1acd   :  { %v8654_v56 = vadd.f32 %v6139_v41, %v3107_v43 }
0x1ace   :  { %v6895_v19 = vpop.f32.mrf.mxu1 }
0x1acf   :  { %v3357_v20 = vadd.f32 %v3355_v44, %v8654_v56  ;;  %v3207_v53 = vadd.f32 %v8599_v29, %v8654_v56 }
0x1ad0   :  { %v3110_v47 = vpop.f32.mrf.mxu1 }
0x1ad1   :  { %7410 = vtanh.f32 %v3357_v20  ;;  %v6147_v58 = vmul.f32 -1.442695, %v3207_v53 }
0x1ad2   :  { %v6896_v49 = vpop.f32.mrf.mxu1 }
0x1ad3   :  { %7412 = vpow2.f32 %v6147_v58 }
0x1ad4   :  { %v3274_v55 = vpop.f32.mrf.mxu1 }
0x1ad5   :  { %3279 = vrot.lane.b32.xlu1 %v3274_v55, %s7843_s6 }
0x1ad6   :  { %v6918_v48 = vpop.f32.mrf.mxu1 }
0x1adc   :  { %v3424_v32 = vpop.f32.mrf.mxu1 }
0x1ade   :  { %v7411_v50 = vpop.eup %7410  ;;  %v6940_v52 = vpop.f32.mrf.mxu1 }
0x1adf   :  { %3458 = vrot.lane.b32.xlu0 %v7411_v50, %s7829_s28 }
0x1ae0   :  { %v7413_v54 = vpop.eup %7412 }
0x1ae1   :  { %v3436_v59 = vadd.f32 1.0, %v7413_v54 }
0x1ae3   :  { %3453 = vrot.lane.b32.xlu0 %v3133_v57, %s7843_s6  ;;  %7414 = vrcp.f32 %v3436_v59 }
0x1ae7   :  { %3429 = vrot.lane.b32.xlu0 %v3424_v32, %s7844_s10 }
0x1af0   :  { %v7415_v1 = vpop.eup %7414 }
0x1b47   :  { %v3280_v7 = vpop.permute.xlu1 %3279 }
0x1b48   :  { %v3282_v10 = vadd.f32 %v3280_v7, %v8654_v56 }
0x1b4a   :  { %v6148_v11 = vmul.f32 -1.442695, %v3282_v10 }
0x1b4c   :  { %7416 = vpow2.f32 %v6148_v11 }
0x1b51   :  { %v3459_v3 = vpop.permute.xlu0 %3458 }
0x1b52   :  { %v3461_v4 = vmul.f32 %v7415_v1, %v3459_v3 }
0x1b54   :  { %3463 = vrot.lane.b32.xlu1 %v3461_v4, %s7843_s6 }
0x1b55   :  { %v3454_v51 = vpop.permute.xlu0 %3453 }
0x1b59   :  { %v7417_v14 = vpop.eup %7416  ;;  %v3430_v23 = vpop.permute.xlu0 %3429 }
0x1b5a   :  { %v3442_v60 = vadd.f32 1.0, %v7417_v14  ;;  %v3432_v42 = vadd.f32 %v3430_v23, %v8654_v56 }
0x1b5c   :  { %7418 = vrcp.f32 %v3442_v60  ;;  %v6149_v24 = vmul.f32 -1.442695, %v3432_v42 }
0x1b69   :  { %v7419_v5 = vpop.eup %7418 }
0x1b6a   :  { %v3456_v6 = vmul.f32 %v7419_v5, %v3454_v51 }
0x1bc6   :  { %v3464_v9 = vpop.permute.xlu1 %3463 }
0x1bc7   :  { %v8665_v21 = vadd.f32 %v3464_v9, %v3456_v6 }
0x1bc9   :  { %7420 = vtanh.f32 %v8665_v21  ;;  %v3802_v60 = vrot.slane %v8665_v21, 7 }
0x1bca   :  { %7422 = vpow2.f32 %v6149_v24 }
0x1bd6   :  { %v7421_v22 = vpop.eup %7420 }
0x1bd7   :  { %3469 = vrot.lane.b32.xlu1 %v7421_v22, %s7829_s28  ;;  %v7423_v35 = vpop.eup %7422 }
0x1bd8   :  { %v3449_v26 = vadd.f32 1.0, %v7423_v35 }
0x1bda   :  { %7424 = vrcp.f32 %v3449_v26 }
0x1be7   :  { %v7425_v27 = vpop.eup %7424 }
0x1c49   :  { %v3470_v29 = vpop.permute.xlu1 %3469 }
0x1c4a   :  { %v3472_v30 = vmul.f32 %v7425_v27, %v3470_v29 }
0x1c4c   :  { %3474 = vrot.lane.b32.xlu0 %v3472_v30, %s7843_s6 }
0x1cbe   :  { %v3475_v28 = vpop.permute.xlu0 %3474 }
0x1cbf   :  { %3477 = vst.msk [vmem:[#allocation2] sm:$0x1] %vm582_vm3, %v3475_v28  ;;  %6950 = vmatmul.mubr.msk.f32.vlgmr.msra.gmra.mxu0 %vm238_vm2, %v3475_v28  ;;  %6961 = vmatmul.mubr.msk.f32.vlgmr.msra.gmra.mxu1 %vm238_vm2, %v3475_v28 }
0x1cc0   :  { %6964 = vmatpush3.msra.mxu0 %v8549_v61  ;;  %6975 = vmatpush3.msra.mxu1 %v8620_v37 }
0x1cc1   :  { %6965 = vmatprep.subr.mxu0 %v7841_v0  ;;  %6976 = vmatprep.subr.mxu1 %v7841_v0 }
0x1cc2   :  { %6966 = vmatpush3.msra.mxu0 %v8553_v62  ;;  %6977 = vmatpush3.msra.mxu1 %v8626_v38 }
0x1cc3   :  { %6967 = vmatprep.subr.mxu0 %v7841_v0  ;;  %6978 = vmatprep.subr.mxu1 %v7841_v0 }
0x1cc4   :  { %6968 = vmatpush3.msra.mxu0 %v8560_v63  ;;  %6979 = vmatpush3.msra.mxu1 %v8632_v39 }
0x1cc5   :  { %6969 = vmatprep.subr.mxu0 %v7841_v0  ;;  %6980 = vmatprep.subr.mxu1 %v7841_v0 }
0x1cc6   :  { %6970 = vmatpush3.msra.mxu0 %v8563_v2  ;;  %6971 = vmatprep.mubr.msk.f32.mxu0 %vm7842_vm0, %v7841_v0 }
0x1cc7   :  { %6981 = vmatpush3.msra.mxu1 %v8636_v40  ;;  %6982 = vmatprep.mubr.msk.f32.mxu1 %vm7842_vm0, %v7841_v0 }
0x1cc8   :  { %6972 = vmatmul.mubr.msk.f32.vlgmr.msra.gmra.mxu0 %vm238_vm2, %v3475_v28  ;;  %6983 = vmatmul.mubr.msk.f32.vlgmr.msra.gmra.mxu1 %vm238_vm2, %v3475_v28 }
0x1cc9   :  { %6985 = vmatprep.subr.mxu0 %v7841_v0  ;;  %6996 = vmatprep.subr.mxu1 %v7841_v0 }
0x1cca   :  { %6986 = vmatpush3.msra.mxu0 %v8528_v12  ;;  %6997 = vmatpush3.msra.mxu1 %v8603_v16 }
0x1ccb   :  { %6987 = vmatprep.subr.mxu0 %v7841_v0  ;;  %6998 = vmatprep.subr.mxu1 %v7841_v0 }
0x1ccc   :  { %6988 = vmatpush3.msra.mxu0 %v8530_v13  ;;  %6999 = vmatpush3.msra.mxu1 %v8606_v18 }
0x1ccd   :  { %6989 = vmatprep.subr.mxu0 %v7841_v0  ;;  %7000 = vmatprep.subr.mxu1 %v7841_v0 }
0x1cce   :  { %6990 = vmatpush3.msra.mxu0 %v8539_v15  ;;  %7001 = vmatpush3.msra.mxu1 %v8612_v34 }
0x1ccf   :  { %6991 = vmatprep.subr.mxu0 %v7841_v0  ;;  %7002 = vmatprep.subr.mxu1 %v7841_v0 }
0x1cd0   :  { %6992 = vmatpush3.msra.mxu0 %v8543_v17  ;;  %7003 = vmatpush3.msra.mxu1 %v8616_v36 }
0x1cd1   :  { %6993 = vmatprep.mubr.msk.f32.mxu0 %vm7842_vm0, %v7841_v0  ;;  %7004 = vmatprep.mubr.msk.f32.mxu1 %vm7842_vm0, %v7841_v0 }
0x1cd2   :  { %7007 = vmatprep.subr.mxu0 %v7841_v0  ;;  %7018 = vmatprep.subr.mxu1 %v7841_v0 }
0x1d7f   :  { %v3546_v31 = vpop.f32.mrf.mxu0  ;;  %v3620_v33 = vpop.f32.mrf.mxu1 }
0x1d80   :  { %v3625_v47 = vrot.slane %v3620_v33, 7  ;;  %v3551_v50 = vrot.slane %v3546_v31, 7 }
0x1d81   :  { %v6951_v45 = vpop.f32.mrf.mxu0  ;;  %v6962_v46 = vpop.f32.mrf.mxu1 }
0x1d82   :  { %v3553_v52 = vadd.f32 %v3551_v50, %v8654_v56 }
0x1d84   :  { %v6154_v57 = vmul.f32 -1.442695, %v3553_v52 }
0x1d88   :  { %v3696_v41 = vpop.f32.mrf.mxu0  ;;  %v3772_v43 = vpop.f32.mrf.mxu1 }
0x1d89   :  { %v3701_v44 = vrot.slane %v3696_v41, 7  ;;  %v3777_v49 = vrot.slane %v3772_v43, 7 }
0x1d8a   :  { %v6973_v19 = vpop.f32.mrf.mxu0  ;;  %v6984_v20 = vpop.f32.mrf.mxu1 }
0x1d8b   :  { %3702 = vrot.lane.b32.xlu1 %v3701_v44, %s7829_s28 }
0x1d8f   :  { %3626 = vrot.lane.b32.xlu1 %v3625_v47, %s7843_s6 }
0x1d93   :  { %3778 = vrot.lane.b32.xlu1 %v3777_v49, %s7844_s10 }
0x1dfd   :  { %v3703_v55 = vpop.permute.xlu1 %3702 }
0x1dfe   :  { %v3705_v48 = vadd.f32 %v3703_v55, %v8654_v56 }
0x1e00   :  { %7426 = vtanh.f32 %v3705_v48 }
0x1e01   :  { %7428 = vpow2.f32 %v6154_v57  ;;  %v3627_v3 = vpop.permute.xlu1 %3626 }
0x1e02   :  { %v3629_v4 = vadd.f32 %v3627_v3, %v8654_v56 }
0x1e04   :  { %v6155_v7 = vmul.f32 -1.442695, %v3629_v4 }
0x1e05   :  { %v3779_v22 = vpop.permute.xlu1 %3778 }
0x1e06   :  { %v3781_v23 = vadd.f32 %v3779_v22, %v8654_v56 }
0x1e08   :  { %v6156_v42 = vmul.f32 -1.442695, %v3781_v23 }
0x1e0d   :  { %v7427_v32 = vpop.eup %7426 }
0x1e0e   :  { %3806 = vrot.lane.b32.xlu0 %v7427_v32, %s7829_s28  ;;  %v7429_v53 = vpop.eup %7428 }
0x1e0f   :  { %v3785_v58 = vadd.f32 1.0, %v7429_v53 }
0x1e11   :  { %7430 = vrcp.f32 %v3785_v58 }
0x1e12   :  { %7432 = vpow2.f32 %v6155_v7 }
0x1e1e   :  { %v7431_v54 = vpop.eup %7430 }
0x1e1f   :  { %v7433_v10 = vpop.eup %7432 }
0x1e20   :  { %v3791_v11 = vadd.f32 1.0, %v7433_v10 }
0x1e22   :  { %7434 = vrcp.f32 %v3791_v11 }
0x1e2f   :  { %v7435_v14 = vpop.eup %7434 }
0x1e30   :  { %v3804_v5 = vmul.f32 %v7435_v14, %v3802_v60 }
0x1e80   :  { %v3807_v59 = vpop.permute.xlu0 %3806 }
0x1e81   :  { %v3809_v1 = vmul.f32 %v7431_v54, %v3807_v59 }
0x1e83   :  { %3811 = vrot.lane.b32.xlu0 %v3809_v1, %s7843_s6 }
0x1ef5   :  { %v3812_v51 = vpop.permute.xlu0 %3811 }
0x1ef6   :  { %v8725_v6 = vadd.f32 %v3812_v51, %v3804_v5 }
0x1ef8   :  { %7436 = vtanh.f32 %v8725_v6  ;;  %v4153_v14 = vrot.slane %v8725_v6, 7 }
0x1ef9   :  { %7438 = vpow2.f32 %v6156_v42 }
0x1f05   :  { %v7437_v9 = vpop.eup %7436 }
0x1f06   :  { %3817 = vrot.lane.b32.xlu0 %v7437_v9, %s7829_s28  ;;  %v7439_v24 = vpop.eup %7438 }
0x1f07   :  { %v3798_v35 = vadd.f32 1.0, %v7439_v24 }
0x1f09   :  { %7440 = vrcp.f32 %v3798_v35 }
0x1f16   :  { %v7441_v26 = vpop.eup %7440 }
0x1f78   :  { %v3818_v27 = vpop.permute.xlu0 %3817 }
0x1f79   :  { %v8730_v21 = vmul.f32 %v7441_v26, %v3818_v27 }
0x1f7b   :  { %v3826_v29 = vrot.slane %v8730_v21, 1 }
0x1f7d   :  { %3827 = vrot.lane.b32.xlu1 %v3826_v29, %s7843_s6 }
0x1fef   :  { %v3828_v30 = vpop.permute.xlu1 %3827 }
0x1ff0   :  { %6994 = vmatmul.mubr.msk.f32.vlgmr.msra.gmra.mxu0 %vm238_vm2, %v3828_v30  ;;  %7005 = vmatmul.mubr.msk.f32.vlgmr.msra.gmra.mxu1 %vm238_vm2, %v3828_v30 }
0x1ff1   :  { %7008 = vmatpush3.msra.mxu0 %v8549_v61  ;;  %7019 = vmatpush3.msra.mxu1 %v8620_v37 }
0x1ff2   :  { %7009 = vmatprep.subr.mxu0 %v7841_v0  ;;  %7020 = vmatprep.subr.mxu1 %v7841_v0 }
0x1ff3   :  { %7010 = vmatpush3.msra.mxu0 %v8553_v62  ;;  %7021 = vmatpush3.msra.mxu1 %v8626_v38 }
0x1ff4   :  { %7011 = vmatprep.subr.mxu0 %v7841_v0  ;;  %7022 = vmatprep.subr.mxu1 %v7841_v0 }
0x1ff5   :  { %7012 = vmatpush3.msra.mxu0 %v8560_v63  ;;  %7023 = vmatpush3.msra.mxu1 %v8632_v39 }
0x1ff6   :  { %7013 = vmatprep.subr.mxu0 %v7841_v0  ;;  %7024 = vmatprep.subr.mxu1 %v7841_v0 }
0x1ff7   :  { %7014 = vmatpush3.msra.mxu0 %v8563_v2  ;;  %7015 = vmatprep.mubr.msk.f32.mxu0 %vm7842_vm0, %v7841_v0 }
0x1ff8   :  { %7025 = vmatpush3.msra.mxu1 %v8636_v40  ;;  %7026 = vmatprep.mubr.msk.f32.mxu1 %vm7842_vm0, %v7841_v0 }
0x1ff9   :  { %7016 = vmatmul.mubr.msk.f32.vlgmr.msra.gmra.mxu0 %vm238_vm2, %v3828_v30  ;;  %7027 = vmatmul.mubr.msk.f32.vlgmr.msra.gmra.mxu1 %vm238_vm2, %v3828_v30 }
0x1ffa   :  { %7029 = vmatprep.subr.mxu0 %v7841_v0  ;;  %7040 = vmatprep.subr.mxu1 %v7841_v0 }
0x1ffb   :  { %7030 = vmatpush3.msra.mxu0 %v8528_v12  ;;  %7041 = vmatpush3.msra.mxu1 %v8603_v16 }
0x1ffc   :  { %7031 = vmatprep.subr.mxu0 %v7841_v0  ;;  %7042 = vmatprep.subr.mxu1 %v7841_v0 }
0x1ffd   :  { %7032 = vmatpush3.msra.mxu0 %v8530_v13  ;;  %7043 = vmatpush3.msra.mxu1 %v8606_v18 }
0x1ffe   :  { %7033 = vmatprep.subr.mxu0 %v7841_v0  ;;  %7044 = vmatprep.subr.mxu1 %v7841_v0 }
0x1fff   :  { %7034 = vmatpush3.msra.mxu0 %v8539_v15  ;;  %7045 = vmatpush3.msra.mxu1 %v8612_v34 }
0x2000   :  { %7035 = vmatprep.subr.mxu0 %v7841_v0  ;;  %7046 = vmatprep.subr.mxu1 %v7841_v0 }
0x2001   :  { %7036 = vmatpush3.msra.mxu0 %v8543_v17  ;;  %7047 = vmatpush3.msra.mxu1 %v8616_v36 }
0x2002   :  { %7037 = vmatprep.mubr.msk.f32.mxu0 %vm7842_vm0, %v7841_v0  ;;  %7048 = vmatprep.mubr.msk.f32.mxu1 %vm7842_vm0, %v7841_v0 }
0x2003   :  { %7051 = vmatprep.subr.mxu0 %v7841_v0  ;;  %7062 = vmatprep.subr.mxu1 %v7841_v0 }
0x20b0   :  { %v3897_v28 = vpop.f32.mrf.mxu0  ;;  %v3971_v31 = vpop.f32.mrf.mxu1 }
0x20b1   :  { %v3976_v20 = vrot.slane %v3971_v31, 6  ;;  %v3902_v32 = vrot.slane %v3897_v28, 6 }
0x20b2   :  { %v6995_v33 = vpop.f32.mrf.mxu0  ;;  %v7006_v45 = vpop.f32.mrf.mxu1 }
0x20b3   :  { %v3904_v50 = vadd.f32 %v3902_v32, %v8654_v56 }
0x20b5   :  { %v6161_v52 = vmul.f32 -1.442695, %v3904_v50 }
0x20b9   :  { %v4047_v46 = vpop.f32.mrf.mxu0  ;;  %v4123_v41 = vpop.f32.mrf.mxu1 }
0x20ba   :  { %v4052_v43 = vrot.slane %v4047_v46, 6  ;;  %v4128_v47 = vrot.slane %v4123_v41, 6 }
0x20bb   :  { %v7017_v44 = vpop.f32.mrf.mxu0  ;;  %v7028_v19 = vpop.f32.mrf.mxu1 }
0x20bc   :  { %4053 = vrot.lane.b32.xlu0 %v4052_v43, %s7829_s28 }
0x20c0   :  { %3977 = vrot.lane.b32.xlu0 %v3976_v20, %s7843_s6 }
0x20c4   :  { %4129 = vrot.lane.b32.xlu0 %v4128_v47, %s7844_s10 }
0x212e   :  { %v4054_v49 = vpop.permute.xlu0 %4053 }
0x212f   :  { %v4056_v55 = vadd.f32 %v4054_v49, %v8654_v56 }
0x2131   :  { %7442 = vtanh.f32 %v4056_v55 }
0x2132   :  { %7444 = vpow2.f32 %v6161_v52  ;;  %v3978_v1 = vpop.permute.xlu0 %3977 }
0x2133   :  { %v3980_v3 = vadd.f32 %v3978_v1, %v8654_v56 }
0x2135   :  { %v6162_v4 = vmul.f32 -1.442695, %v3980_v3 }
0x2136   :  { %v4130_v22 = vpop.permute.xlu0 %4129 }
0x2137   :  { %v4132_v23 = vadd.f32 %v4130_v22, %v8654_v56 }
0x2139   :  { %v6163_v42 = vmul.f32 -1.442695, %v4132_v23 }
0x213e   :  { %v7443_v48 = vpop.eup %7442 }
0x213f   :  { %4157 = vrot.lane.b32.xlu1 %v7443_v48, %s7829_s28  ;;  %v7445_v57 = vpop.eup %7444 }
0x2140   :  { %v4136_v53 = vadd.f32 1.0, %v7445_v57 }
0x2142   :  { %7446 = vrcp.f32 %v4136_v53 }
0x2143   :  { %7448 = vpow2.f32 %v6162_v4 }
0x214f   :  { %v7447_v58 = vpop.eup %7446 }
0x2150   :  { %v7449_v7 = vpop.eup %7448 }
0x2151   :  { %v4142_v10 = vadd.f32 1.0, %v7449_v7 }
0x2153   :  { %7450 = vrcp.f32 %v4142_v10 }
0x2160   :  { %v7451_v11 = vpop.eup %7450 }
0x2161   :  { %v4155_v60 = vmul.f32 %v7451_v11, %v4153_v14 }
0x21b1   :  { %v4158_v54 = vpop.permute.xlu1 %4157 }
0x21b2   :  { %v4160_v59 = vmul.f32 %v7447_v58, %v4158_v54 }
0x21b4   :  { %4162 = vrot.lane.b32.xlu1 %v4160_v59, %s7843_s6 }
0x2226   :  { %v4163_v5 = vpop.permute.xlu1 %4162 }
0x2227   :  { %v8787_v51 = vadd.f32 %v4163_v5, %v4155_v60 }
0x2229   :  { %7452 = vtanh.f32 %v8787_v51  ;;  %v4504_v14 = vrot.slane %v8787_v51, 7 }
0x222a   :  { %7454 = vpow2.f32 %v6163_v42 }
0x2236   :  { %v7453_v9 = vpop.eup %7452 }
0x2237   :  { %4168 = vrot.lane.b32.xlu1 %v7453_v9, %s7829_s28  ;;  %v7455_v24 = vpop.eup %7454 }
0x2238   :  { %v4149_v35 = vadd.f32 1.0, %v7455_v24 }
0x223a   :  { %7456 = vrcp.f32 %v4149_v35 }
0x2247   :  { %v7457_v26 = vpop.eup %7456 }
0x22a9   :  { %v4169_v27 = vpop.permute.xlu1 %4168 }
0x22aa   :  { %v8792_v6 = vmul.f32 %v7457_v26, %v4169_v27 }
0x22ac   :  { %v4177_v29 = vrot.slane %v8792_v6, 2 }
0x22ae   :  { %4178 = vrot.lane.b32.xlu0 %v4177_v29, %s7843_s6 }
0x2320   :  { %v4179_v30 = vpop.permute.xlu0 %4178 }
0x2321   :  { %7038 = vmatmul.mubr.msk.f32.vlgmr.msra.gmra.mxu0 %vm238_vm2, %v4179_v30  ;;  %7049 = vmatmul.mubr.msk.f32.vlgmr.msra.gmra.mxu1 %vm238_vm2, %v4179_v30 }
0x2322   :  { %7052 = vmatpush3.msra.mxu0 %v8549_v61  ;;  %7063 = vmatpush3.msra.mxu1 %v8620_v37 }
0x2323   :  { %7053 = vmatprep.subr.mxu0 %v7841_v0  ;;  %7064 = vmatprep.subr.mxu1 %v7841_v0 }
0x2324   :  { %7054 = vmatpush3.msra.mxu0 %v8553_v62  ;;  %7065 = vmatpush3.msra.mxu1 %v8626_v38 }
0x2325   :  { %7055 = vmatprep.subr.mxu0 %v7841_v0  ;;  %7066 = vmatprep.subr.mxu1 %v7841_v0 }
0x2326   :  { %7056 = vmatpush3.msra.mxu0 %v8560_v63  ;;  %7067 = vmatpush3.msra.mxu1 %v8632_v39 }
0x2327   :  { %7057 = vmatprep.subr.mxu0 %v7841_v0  ;;  %7068 = vmatprep.subr.mxu1 %v7841_v0 }
0x2328   :  { %7058 = vmatpush3.msra.mxu0 %v8563_v2  ;;  %7059 = vmatprep.mubr.msk.f32.mxu0 %vm7842_vm0, %v7841_v0 }
0x2329   :  { %7069 = vmatpush3.msra.mxu1 %v8636_v40  ;;  %7070 = vmatprep.mubr.msk.f32.mxu1 %vm7842_vm0, %v7841_v0 }
0x232a   :  { %7060 = vmatmul.mubr.msk.f32.vlgmr.msra.gmra.mxu0 %vm238_vm2, %v4179_v30  ;;  %7071 = vmatmul.mubr.msk.f32.vlgmr.msra.gmra.mxu1 %vm238_vm2, %v4179_v30 }
0x232b   :  { %7073 = vmatprep.subr.mxu0 %v7841_v0  ;;  %7084 = vmatprep.subr.mxu1 %v7841_v0 }
0x232c   :  { %7074 = vmatpush3.msra.mxu0 %v8528_v12  ;;  %7085 = vmatpush3.msra.mxu1 %v8603_v16 }
0x232d   :  { %7075 = vmatprep.subr.mxu0 %v7841_v0  ;;  %7086 = vmatprep.subr.mxu1 %v7841_v0 }
0x232e   :  { %7076 = vmatpush3.msra.mxu0 %v8530_v13  ;;  %7087 = vmatpush3.msra.mxu1 %v8606_v18 }
0x232f   :  { %7077 = vmatprep.subr.mxu0 %v7841_v0  ;;  %7088 = vmatprep.subr.mxu1 %v7841_v0 }
0x2330   :  { %7078 = vmatpush3.msra.mxu0 %v8539_v15  ;;  %7089 = vmatpush3.msra.mxu1 %v8612_v34 }
0x2331   :  { %7079 = vmatprep.subr.mxu0 %v7841_v0  ;;  %7090 = vmatprep.subr.mxu1 %v7841_v0 }
0x2332   :  { %7080 = vmatpush3.msra.mxu0 %v8543_v17  ;;  %7091 = vmatpush3.msra.mxu1 %v8616_v36 }
0x2333   :  { %7081 = vmatprep.mubr.msk.f32.mxu0 %vm7842_vm0, %v7841_v0  ;;  %7092 = vmatprep.mubr.msk.f32.mxu1 %vm7842_vm0, %v7841_v0 }
0x2334   :  { %7095 = vmatprep.subr.mxu0 %v7841_v0  ;;  %7106 = vmatprep.subr.mxu1 %v7841_v0 }
0x23e1   :  { %v4248_v28 = vpop.f32.mrf.mxu0  ;;  %v4322_v31 = vpop.f32.mrf.mxu1 }
0x23e2   :  { %v4327_v20 = vrot.slane %v4322_v31, 5  ;;  %v4253_v32 = vrot.slane %v4248_v28, 5 }
0x23e3   :  { %v7039_v33 = vpop.f32.mrf.mxu0  ;;  %v7050_v45 = vpop.f32.mrf.mxu1 }
0x23e4   :  { %v4255_v50 = vadd.f32 %v4253_v32, %v8654_v56 }
0x23e6   :  { %v6168_v52 = vmul.f32 -1.442695, %v4255_v50 }
0x23ea   :  { %v4398_v46 = vpop.f32.mrf.mxu0  ;;  %v4474_v41 = vpop.f32.mrf.mxu1 }
0x23eb   :  { %v4403_v43 = vrot.slane %v4398_v46, 5  ;;  %v4479_v47 = vrot.slane %v4474_v41, 5 }
0x23ec   :  { %v7061_v44 = vpop.f32.mrf.mxu0  ;;  %v7072_v19 = vpop.f32.mrf.mxu1 }
0x23ed   :  { %4404 = vrot.lane.b32.xlu1 %v4403_v43, %s7829_s28 }
0x23f1   :  { %4328 = vrot.lane.b32.xlu1 %v4327_v20, %s7843_s6 }
0x23f5   :  { %4480 = vrot.lane.b32.xlu1 %v4479_v47, %s7844_s10 }
0x245f   :  { %v4405_v49 = vpop.permute.xlu1 %4404 }
0x2460   :  { %v4407_v55 = vadd.f32 %v4405_v49, %v8654_v56 }
0x2462   :  { %7458 = vtanh.f32 %v4407_v55 }
0x2463   :  { %7460 = vpow2.f32 %v6168_v52  ;;  %v4329_v1 = vpop.permute.xlu1 %4328 }
0x2464   :  { %v4331_v3 = vadd.f32 %v4329_v1, %v8654_v56 }
0x2466   :  { %v6169_v4 = vmul.f32 -1.442695, %v4331_v3 }
0x2467   :  { %v4481_v23 = vpop.permute.xlu1 %4480 }
0x2468   :  { %v4483_v42 = vadd.f32 %v4481_v23, %v8654_v56  ;;  %v8922_v23 = vld [vmem:[#allocation12 + $0x58] sm:$0xff] }
0x246a   :  { %v6170_v24 = vmul.f32 -1.442695, %v4483_v42  ;;  %v8928_v42 = vld [vmem:[#allocation12 + $0x50] sm:$0xff] }
0x246f   :  { %v7459_v48 = vpop.eup %7458 }
0x2470   :  { %4508 = vrot.lane.b32.xlu0 %v7459_v48, %s7829_s28  ;;  %v7461_v57 = vpop.eup %7460 }
0x2471   :  { %v4487_v53 = vadd.f32 1.0, %v7461_v57 }
0x2473   :  { %7462 = vrcp.f32 %v4487_v53 }
0x2474   :  { %7464 = vpow2.f32 %v6169_v4 }
0x2480   :  { %v7463_v58 = vpop.eup %7462 }
0x2481   :  { %v7465_v7 = vpop.eup %7464 }
0x2482   :  { %v4493_v10 = vadd.f32 1.0, %v7465_v7 }
0x2484   :  { %7466 = vrcp.f32 %v4493_v10 }
0x2491   :  { %v7467_v11 = vpop.eup %7466 }
0x2492   :  { %v4506_v60 = vmul.f32 %v7467_v11, %v4504_v14 }
0x24e2   :  { %v4509_v54 = vpop.permute.xlu0 %4508 }
0x24e3   :  { %v4511_v59 = vmul.f32 %v7463_v58, %v4509_v54 }
0x24e5   :  { %4513 = vrot.lane.b32.xlu0 %v4511_v59, %s7843_s6 }
0x2557   :  { %v4514_v5 = vpop.permute.xlu0 %4513 }
0x2558   :  { %v8849_v9 = vadd.f32 %v4514_v5, %v4506_v60 }
0x255a   :  { %7468 = vtanh.f32 %v8849_v9  ;;  %v4855_v53 = vrot.slane %v8849_v9, 7 }
0x255b   :  { %7470 = vpow2.f32 %v6170_v24  ;;  %v8934_v24 = vld [vmem:[#allocation12 + $0x48] sm:$0xff] }
0x2567   :  { %v7469_v22 = vpop.eup %7468 }
0x2568   :  { %4519 = vrot.lane.b32.xlu0 %v7469_v22, %s7829_s28  ;;  %v7471_v35 = vpop.eup %7470 }
0x2569   :  { %v4500_v26 = vadd.f32 1.0, %v7471_v35  ;;  %v8966_v35 = vld [vmem:[#allocation12 + $0x8] sm:$0xff] }
0x256b   :  { %7472 = vrcp.f32 %v4500_v26  ;;  %v8974_v26 = vld [vmem:[#allocation12] sm:$0xff] }
0x2578   :  { %v7473_v27 = vpop.eup %7472 }
0x25da   :  { %v4520_v29 = vpop.permute.xlu0 %4519 }
0x25db   :  { %v8854_v51 = vmul.f32 %v7473_v27, %v4520_v29  ;;  %v8977_v27 = vld [vmem:[#allocation12 + $0x20] sm:$0xff] }
0x25dd   :  { %v4528_v30 = vrot.slane %v8854_v51, 3 }
0x25df   :  { %4529 = vrot.lane.b32.xlu1 %v4528_v30, %s7843_s6 }
0x2651   :  { %v4530_v28 = vpop.permute.xlu1 %4529 }
0x2652   :  { %7082 = vmatmul.mubr.msk.f32.vlgmr.msra.gmra.mxu0 %vm238_vm2, %v4530_v28  ;;  %7093 = vmatmul.mubr.msk.f32.vlgmr.msra.gmra.mxu1 %vm238_vm2, %v4530_v28 }
0x2653   :  { %7096 = vmatpush3.msra.mxu0 %v8549_v61  ;;  %7107 = vmatpush3.msra.mxu1 %v8620_v37 }
0x2654   :  { %7097 = vmatprep.subr.mxu0 %v7841_v0  ;;  %7108 = vmatprep.subr.mxu1 %v7841_v0 }
0x2655   :  { %7098 = vmatpush3.msra.mxu0 %v8553_v62  ;;  %7109 = vmatpush3.msra.mxu1 %v8626_v38 }
0x2656   :  { %7099 = vmatprep.subr.mxu0 %v7841_v0  ;;  %7110 = vmatprep.subr.mxu1 %v7841_v0 }
0x2657   :  { %7100 = vmatpush3.msra.mxu0 %v8560_v63  ;;  %7111 = vmatpush3.msra.mxu1 %v8632_v39 }
0x2658   :  { %7101 = vmatprep.subr.mxu0 %v7841_v0  ;;  %7112 = vmatprep.subr.mxu1 %v7841_v0 }
0x2659   :  { %7102 = vmatpush3.msra.mxu0 %v8563_v2  ;;  %7103 = vmatprep.mubr.msk.f32.mxu0 %vm7842_vm0, %v7841_v0 }
0x265a   :  { %7113 = vmatpush3.msra.mxu1 %v8636_v40  ;;  %7114 = vmatprep.mubr.msk.f32.mxu1 %vm7842_vm0, %v7841_v0 }
0x265b   :  { %7104 = vmatmul.mubr.msk.f32.vlgmr.msra.gmra.mxu0 %vm238_vm2, %v4530_v28  ;;  %7115 = vmatmul.mubr.msk.f32.vlgmr.msra.gmra.mxu1 %vm238_vm2, %v4530_v28 }
0x265c   :  { %7117 = vmatprep.subr.mxu0 %v7841_v0  ;;  %7128 = vmatprep.subr.mxu1 %v7841_v0 }
0x265d   :  { %7118 = vmatpush3.msra.mxu0 %v8528_v12  ;;  %7129 = vmatpush3.msra.mxu1 %v8603_v16 }
0x265e   :  { %7119 = vmatprep.subr.mxu0 %v7841_v0  ;;  %7130 = vmatprep.subr.mxu1 %v7841_v0 }
0x265f   :  { %7120 = vmatpush3.msra.mxu0 %v8530_v13  ;;  %7131 = vmatpush3.msra.mxu1 %v8606_v18 }
0x2660   :  { %7121 = vmatprep.subr.mxu0 %v7841_v0  ;;  %7132 = vmatprep.subr.mxu1 %v7841_v0 }
0x2661   :  { %7122 = vmatpush3.msra.mxu0 %v8539_v15  ;;  %7133 = vmatpush3.msra.mxu1 %v8612_v34 }
0x2662   :  { %7123 = vmatprep.subr.mxu0 %v7841_v0  ;;  %7134 = vmatprep.subr.mxu1 %v7841_v0 }
0x2663   :  { %7124 = vmatpush3.msra.mxu0 %v8543_v17  ;;  %7135 = vmatpush3.msra.mxu1 %v8616_v36 }
0x2664   :  { %7125 = vmatprep.mubr.msk.f32.mxu0 %vm7842_vm0, %v7841_v0  ;;  %7136 = vmatprep.mubr.msk.f32.mxu1 %vm7842_vm0, %v7841_v0 }
0x2665   :  { %7139 = vmatprep.subr.mxu0 %v7841_v0  ;;  %7150 = vmatprep.subr.mxu1 %v7841_v0 }
0x2712   :  { %v4599_v12 = vpop.f32.mrf.mxu0  ;;  %v4673_v13 = vpop.f32.mrf.mxu1 }
0x2713   :  { %v4678_v34 = vrot.slane %v4673_v13, 4  ;;  %v4604_v46 = vrot.slane %v4599_v12, 4 }
0x2714   :  { %v7083_v15 = vpop.f32.mrf.mxu0  ;;  %v7094_v61 = vpop.f32.mrf.mxu1 }
0x2715   :  { %v4606_v41 = vadd.f32 %v4604_v46, %v8654_v56 }
0x2717   :  { %v6175_v43 = vmul.f32 -1.442695, %v4606_v41 }
0x271b   :  { %v4749_v62 = vpop.f32.mrf.mxu0  ;;  %v4825_v63 = vpop.f32.mrf.mxu1 }
0x271c   :  { %v4754_v2 = vrot.slane %v4749_v62, 4  ;;  %v4830_v36 = vrot.slane %v4825_v63, 4 }
0x271d   :  { %v7105_v17 = vpop.f32.mrf.mxu0  ;;  %v7116_v18 = vpop.f32.mrf.mxu1 }
0x271e   :  { %4755 = vrot.lane.b32.xlu0 %v4754_v2, %s7829_s28 }
0x2722   :  { %4679 = vrot.lane.b32.xlu0 %v4678_v34, %s7843_s6 }
0x2726   :  { %4831 = vrot.lane.b32.xlu0 %v4830_v36, %s7844_s10 }
0x2790   :  { %v4756_v31 = vpop.permute.xlu0 %4755 }
0x2791   :  { %v4758_v33 = vadd.f32 %v4756_v31, %v8654_v56 }
0x2793   :  { %7474 = vtanh.f32 %v4758_v33 }
0x2794   :  { %7476 = vpow2.f32 %v6175_v43  ;;  %v4680_v55 = vpop.permute.xlu0 %4679 }
0x2795   :  { %v4682_v48 = vadd.f32 %v4680_v55, %v8654_v56 }
0x2797   :  { %v6176_v32 = vmul.f32 -1.442695, %v4682_v48 }
0x2798   :  { %v4832_v3 = vpop.permute.xlu0 %4831 }
0x2799   :  { %v4834_v4 = vadd.f32 %v4832_v3, %v8654_v56 }
0x279b   :  { %v6177_v7 = vmul.f32 -1.442695, %v4834_v4 }
0x27a0   :  { %v7475_v45 = vpop.eup %7474 }
0x27a1   :  { %4859 = vrot.lane.b32.xlu1 %v7475_v45, %s7829_s28  ;;  %v7477_v44 = vpop.eup %7476 }
0x27a2   :  { %v4838_v19 = vadd.f32 1.0, %v7477_v44 }
0x27a4   :  { %7478 = vrcp.f32 %v4838_v19 }
0x27a5   :  { %7480 = vpow2.f32 %v6176_v32 }
0x27b1   :  { %v7479_v20 = vpop.eup %7478 }
0x27b2   :  { %v7481_v50 = vpop.eup %7480 }
0x27b3   :  { %v4844_v52 = vadd.f32 1.0, %v7481_v50 }
0x27b5   :  { %7482 = vrcp.f32 %v4844_v52 }
0x27c2   :  { %v7483_v57 = vpop.eup %7482 }
0x27c3   :  { %v4857_v58 = vmul.f32 %v7483_v57, %v4855_v53 }
0x2813   :  { %v4860_v47 = vpop.permute.xlu1 %4859 }
0x2814   :  { %v4862_v49 = vmul.f32 %v7479_v20, %v4860_v47 }
0x2816   :  { %4864 = vrot.lane.b32.xlu1 %v4862_v49, %s7843_s6 }
0x2888   :  { %v4865_v54 = vpop.permute.xlu1 %4864 }
0x2889   :  { %v8911_v59 = vadd.f32 %v4865_v54, %v4857_v58 }
0x288b   :  { %7484 = vtanh.f32 %v8911_v59  ;;  %v5206_v50 = vrot.slane %v8911_v59, 7 }
0x288c   :  { %7486 = vpow2.f32 %v6177_v7 }
0x2898   :  { %v7485_v1 = vpop.eup %7484 }
0x2899   :  { %4870 = vrot.lane.b32.xlu1 %v7485_v1, %s7829_s28  ;;  %v7487_v10 = vpop.eup %7486 }
0x289a   :  { %v4851_v11 = vadd.f32 1.0, %v7487_v10 }
0x289c   :  { %7488 = vrcp.f32 %v4851_v11 }
0x28a9   :  { %v7489_v14 = vpop.eup %7488 }
0x290b   :  { %v4871_v60 = vpop.permute.xlu1 %4870 }
0x290c   :  { %v8916_v5 = vmul.f32 %v7489_v14, %v4871_v60 }
0x290e   :  { %v4879_v9 = vrot.slane %v8916_v5, 4 }
0x2910   :  { %4880 = vrot.lane.b32.xlu0 %v4879_v9, %s7843_s6  ;;  %v9007_v9 = vld [vmem:[#allocation12 + $0x78] sm:$0xff] }
0x2982   :  { %v4881_v22 = vpop.permute.xlu0 %4880 }
0x2983   :  { %7126 = vmatmul.mubr.msk.f32.vlgmr.msra.gmra.mxu0 %vm238_vm2, %v4881_v22  ;;  %7137 = vmatmul.mubr.msk.f32.vlgmr.msra.gmra.mxu1 %vm238_vm2, %v4881_v22 }
0x2984   :  { %7140 = vmatpush3.msra.mxu0 %v8922_v23  ;;  %7151 = vmatpush3.msra.mxu1 %v8620_v37  ;;  %v8940_v37 = vld [vmem:[#allocation12 + $0x40] sm:$0xff] }
0x2985   :  { %7141 = vmatprep.subr.mxu0 %v7841_v0  ;;  %7152 = vmatprep.subr.mxu1 %v7841_v0 }
0x2986   :  { %7142 = vmatpush3.msra.mxu0 %v8928_v42  ;;  %7153 = vmatpush3.msra.mxu1 %v8626_v38  ;;  %v8952_v38 = vld [vmem:[#allocation12 + $0x18] sm:$0xff] }
0x2987   :  { %7143 = vmatprep.subr.mxu0 %v7841_v0  ;;  %7154 = vmatprep.subr.mxu1 %v7841_v0 }
0x2988   :  { %7144 = vmatpush3.msra.mxu0 %v8934_v24  ;;  %7155 = vmatpush3.msra.mxu1 %v8632_v39  ;;  %v8958_v39 = vld [vmem:[#allocation12 + $0x10] sm:$0xff] }
0x2989   :  { %7145 = vmatprep.subr.mxu0 %v7841_v0  ;;  %7156 = vmatprep.subr.mxu1 %v7841_v0 }
0x298a   :  { %7146 = vmatpush3.msra.mxu0 %v8940_v37  ;;  %7147 = vmatprep.mubr.msk.f32.mxu0 %vm7842_vm0, %v7841_v0 }
0x298b   :  { %7157 = vmatpush3.msra.mxu1 %v8636_v40  ;;  %7158 = vmatprep.mubr.msk.f32.mxu1 %vm7842_vm0, %v7841_v0  ;;  %v8961_v40 = vld [vmem:[#allocation12 + $0x30] sm:$0xff] }
0x298c   :  { %7148 = vmatmul.mubr.msk.f32.vlgmr.msra.gmra.mxu0 %vm238_vm2, %v4881_v22  ;;  %7159 = vmatmul.mubr.msk.f32.vlgmr.msra.gmra.mxu1 %vm238_vm2, %v4881_v22  ;;  %v9013_v22 = vld [vmem:[#allocation12 + $0x70] sm:$0xff] }
0x298d   :  { %7161 = vmatprep.subr.mxu0 %v7841_v0  ;;  %7172 = vmatprep.subr.mxu1 %v7841_v0 }
0x298e   :  { %7162 = vmatpush3.msra.mxu0 %v8952_v38  ;;  %7173 = vmatpush3.msra.mxu1 %v8603_v16  ;;  %v8969_v16 = vld [vmem:[#allocation12 + $0x28] sm:$0xff] }
0x298f   :  { %7163 = vmatprep.subr.mxu0 %v7841_v0  ;;  %7174 = vmatprep.subr.mxu1 %v7841_v0 }
0x2990   :  { %7164 = vmatpush3.msra.mxu0 %v8958_v39  ;;  %7175 = vmatpush3.msra.mxu1 %v8961_v40 }
0x2991   :  { %7165 = vmatprep.subr.mxu0 %v7841_v0  ;;  %7176 = vmatprep.subr.mxu1 %v7841_v0 }
0x2992   :  { %7166 = vmatpush3.msra.mxu0 %v8966_v35  ;;  %7177 = vmatpush3.msra.mxu1 %v8969_v16 }
0x2993   :  { %7167 = vmatprep.subr.mxu0 %v7841_v0  ;;  %7178 = vmatprep.subr.mxu1 %v7841_v0 }
0x2994   :  { %7168 = vmatpush3.msra.mxu0 %v8974_v26  ;;  %7179 = vmatpush3.msra.mxu1 %v8977_v27 }
0x2995   :  { %7169 = vmatprep.mubr.msk.f32.mxu0 %vm7842_vm0, %v7841_v0  ;;  %7180 = vmatprep.mubr.msk.f32.mxu1 %vm7842_vm0, %v7841_v0 }
0x2996   :  { %7183 = vmatprep.subr.mxu0 %v7841_v0  ;;  %7194 = vmatprep.subr.mxu1 %v7841_v0 }
0x2a43   :  { %v4950_v29 = vpop.f32.mrf.mxu0  ;;  %v5024_v30 = vpop.f32.mrf.mxu1 }
0x2a44   :  { %v5029_v2 = vrot.slane %v5024_v30, 3  ;;  %v4955_v31 = vrot.slane %v4950_v29, 3  ;;  %v9019_v29 = vld [vmem:[#allocation12 + $0x68] sm:$0xff]  ;;  %v9027_v30 = vld [vmem:[#allocation12 + $0x60] sm:$0xff] }
0x2a45   :  { %v7127_v28 = vpop.f32.mrf.mxu0  ;;  %v7138_v12 = vpop.f32.mrf.mxu1 }
0x2a46   :  { %v4957_v33 = vadd.f32 %v4955_v31, %v8654_v56  ;;  %v7573_v28 = vld [vmem:[#allocation12 + $0x38] sm:$0xff] }
0x2a48   :  { %v6182_v45 = vmul.f32 -1.442695, %v4957_v33 }
0x2a4c   :  { %v5100_v13 = vpop.f32.mrf.mxu0  ;;  %v5176_v15 = vpop.f32.mrf.mxu1 }
0x2a4d   :  { %v5105_v61 = vrot.slane %v5100_v13, 3  ;;  %v5181_v17 = vrot.slane %v5176_v15, 3 }
0x2a4e   :  { %v7149_v62 = vpop.f32.mrf.mxu0  ;;  %v7160_v63 = vpop.f32.mrf.mxu1 }
0x2a4f   :  { %5106 = vrot.lane.b32.xlu1 %v5105_v61, %s7829_s28 }
0x2a53   :  { %5030 = vrot.lane.b32.xlu1 %v5029_v2, %s7843_s6 }
0x2a57   :  { %5182 = vrot.lane.b32.xlu1 %v5181_v17, %s7844_s10 }
0x2ac1   :  { %v5107_v18 = vpop.permute.xlu1 %5106 }
0x2ac2   :  { %v5109_v34 = vadd.f32 %v5107_v18, %v8654_v56 }
0x2ac4   :  { %7490 = vtanh.f32 %v5109_v34 }
0x2ac5   :  { %7492 = vpow2.f32 %v6182_v45  ;;  %v5031_v20 = vpop.permute.xlu1 %5030 }
0x2ac6   :  { %v5033_v47 = vadd.f32 %v5031_v20, %v8654_v56 }
0x2ac8   :  { %v6183_v49 = vmul.f32 -1.442695, %v5033_v47 }
0x2ac9   :  { %v5183_v54 = vpop.permute.xlu1 %5182 }
0x2aca   :  { %v5185_v1 = vadd.f32 %v5183_v54, %v8654_v56 }
0x2acc   :  { %v6184_v3 = vmul.f32 -1.442695, %v5185_v1 }
0x2ad1   :  { %v7491_v36 = vpop.eup %7490 }
0x2ad2   :  { %5210 = vrot.lane.b32.xlu0 %v7491_v36, %s7829_s28  ;;  %v7493_v46 = vpop.eup %7492 }
0x2ad3   :  { %v5189_v41 = vadd.f32 1.0, %v7493_v46 }
0x2ad5   :  { %7494 = vrcp.f32 %v5189_v41 }
0x2ad6   :  { %7496 = vpow2.f32 %v6183_v49 }
0x2ae2   :  { %v7495_v43 = vpop.eup %7494 }
0x2ae3   :  { %v7497_v55 = vpop.eup %7496 }
0x2ae4   :  { %v5195_v48 = vadd.f32 1.0, %v7497_v55 }
0x2ae6   :  { %7498 = vrcp.f32 %v5195_v48 }
0x2af3   :  { %v7499_v32 = vpop.eup %7498 }
0x2af4   :  { %v5208_v52 = vmul.f32 %v7499_v32, %v5206_v50 }
0x2b44   :  { %v5211_v44 = vpop.permute.xlu0 %5210 }
0x2b45   :  { %v5213_v19 = vmul.f32 %v7495_v43, %v5211_v44 }
0x2b47   :  { %5215 = vrot.lane.b32.xlu0 %v5213_v19, %s7843_s6 }
0x2bb9   :  { %v5216_v57 = vpop.permute.xlu0 %5215 }
0x2bba   :  { %v8995_v53 = vadd.f32 %v5216_v57, %v5208_v52 }
0x2bbc   :  { %7500 = vtanh.f32 %v8995_v53  ;;  %v5557_v49 = vrot.slane %v8995_v53, 7 }
0x2bbd   :  { %7502 = vpow2.f32 %v6184_v3 }
0x2bc9   :  { %v7501_v58 = vpop.eup %7500 }
0x2bca   :  { %5221 = vrot.lane.b32.xlu0 %v7501_v58, %s7829_s28  ;;  %v7503_v4 = vpop.eup %7502 }
0x2bcb   :  { %v5202_v7 = vadd.f32 1.0, %v7503_v4 }
0x2bcd   :  { %7504 = vrcp.f32 %v5202_v7 }
0x2bda   :  { %v7505_v10 = vpop.eup %7504 }
0x2c3c   :  { %v5222_v11 = vpop.permute.xlu0 %5221 }
0x2c3d   :  { %v9000_v59 = vmul.f32 %v7505_v10, %v5222_v11 }
0x2c3f   :  { %v5230_v14 = vrot.slane %v9000_v59, 5 }
0x2c41   :  { %5231 = vrot.lane.b32.xlu1 %v5230_v14, %s7843_s6 }
0x2cb3   :  { %v5232_v60 = vpop.permute.xlu1 %5231 }
0x2cb4   :  { %7170 = vmatmul.mubr.msk.f32.vlgmr.msra.gmra.mxu0 %vm238_vm2, %v5232_v60  ;;  %7181 = vmatmul.mubr.msk.f32.vlgmr.msra.gmra.mxu1 %vm238_vm2, %v5232_v60 }
0x2cb5   :  { %7184 = vmatpush3.msra.mxu0 %v8922_v23  ;;  %7195 = vmatpush3.msra.mxu1 %v9007_v9 }
0x2cb6   :  { %7185 = vmatprep.subr.mxu0 %v7841_v0  ;;  %7196 = vmatprep.subr.mxu1 %v7841_v0 }
0x2cb7   :  { %7186 = vmatpush3.msra.mxu0 %v8928_v42  ;;  %7197 = vmatpush3.msra.mxu1 %v9013_v22 }
0x2cb8   :  { %7187 = vmatprep.subr.mxu0 %v7841_v0  ;;  %7198 = vmatprep.subr.mxu1 %v7841_v0 }
0x2cb9   :  { %7188 = vmatpush3.msra.mxu0 %v8934_v24  ;;  %7199 = vmatpush3.msra.mxu1 %v9019_v29 }
0x2cba   :  { %7189 = vmatprep.subr.mxu0 %v7841_v0  ;;  %7200 = vmatprep.subr.mxu1 %v7841_v0 }
0x2cbb   :  { %7190 = vmatpush3.msra.mxu0 %v8940_v37  ;;  %7191 = vmatprep.mubr.msk.f32.mxu0 %vm7842_vm0, %v7841_v0 }
0x2cbc   :  { %7201 = vmatpush3.msra.mxu1 %v9027_v30  ;;  %7202 = vmatprep.mubr.msk.f32.mxu1 %vm7842_vm0, %v7841_v0 }
0x2cbd   :  { %7192 = vmatmul.mubr.msk.f32.vlgmr.msra.gmra.mxu0 %vm238_vm2, %v5232_v60  ;;  %7203 = vmatmul.mubr.msk.f32.vlgmr.msra.gmra.mxu1 %vm238_vm2, %v5232_v60 }
0x2cbe   :  { %7205 = vmatprep.subr.mxu0 %v7841_v0  ;;  %7216 = vmatprep.subr.mxu1 %v7841_v0 }
0x2cbf   :  { %7206 = vmatpush3.msra.mxu0 %v8952_v38  ;;  %7217 = vmatpush3.msra.mxu1 %v7573_v28 }
0x2cc0   :  { %7207 = vmatprep.subr.mxu0 %v7841_v0  ;;  %7218 = vmatprep.subr.mxu1 %v7841_v0 }
0x2cc1   :  { %7208 = vmatpush3.msra.mxu0 %v8958_v39  ;;  %7219 = vmatpush3.msra.mxu1 %v8961_v40 }
0x2cc2   :  { %7209 = vmatprep.subr.mxu0 %v7841_v0  ;;  %7220 = vmatprep.subr.mxu1 %v7841_v0 }
0x2cc3   :  { %7210 = vmatpush3.msra.mxu0 %v8966_v35  ;;  %7221 = vmatpush3.msra.mxu1 %v8969_v16 }
0x2cc4   :  { %7211 = vmatprep.subr.mxu0 %v7841_v0  ;;  %7222 = vmatprep.subr.mxu1 %v7841_v0 }
0x2cc5   :  { %7212 = vmatpush3.msra.mxu0 %v8974_v26  ;;  %7223 = vmatpush3.msra.mxu1 %v8977_v27 }
0x2cc6   :  { %7213 = vmatprep.mubr.msk.f32.mxu0 %vm7842_vm0, %v7841_v0  ;;  %7224 = vmatprep.mubr.msk.f32.mxu1 %vm7842_vm0, %v7841_v0 }
0x2cc7   :  { %7227 = vmatprep.subr.mxu0 %v7841_v0  ;;  %7238 = vmatprep.subr.mxu1 %v7841_v0 }
0x2d74   :  { %v5301_v38 = vpop.f32.mrf.mxu0  ;;  %v5375_v39 = vpop.f32.mrf.mxu1 }
0x2d75   :  { %v5380_v27 = vrot.slane %v5375_v39, 2  ;;  %v5306_v17 = vrot.slane %v5301_v38, 2 }
0x2d76   :  { %v7171_v40 = vpop.f32.mrf.mxu0  ;;  %v7182_v35 = vpop.f32.mrf.mxu1 }
0x2d77   :  { %v5308_v18 = vadd.f32 %v5306_v17, %v8654_v56 }
0x2d79   :  { %v6189_v34 = vmul.f32 -1.442695, %v5308_v18 }
0x2d7d   :  { %v5451_v16 = vpop.f32.mrf.mxu0  ;;  %v5527_v12 = vpop.f32.mrf.mxu1 }
0x2d7e   :  { %v5456_v13 = vrot.slane %v5451_v16, 2  ;;  %v5532_v61 = vrot.slane %v5527_v12, 2 }
0x2d7f   :  { %v7193_v26 = vpop.f32.mrf.mxu0  ;;  %v7204_v15 = vpop.f32.mrf.mxu1 }
0x2d80   :  { %5457 = vrot.lane.b32.xlu0 %v5456_v13, %s7829_s28 }
0x2d84   :  { %5381 = vrot.lane.b32.xlu0 %v5380_v27, %s7843_s6 }
0x2d88   :  { %5533 = vrot.lane.b32.xlu0 %v5532_v61, %s7844_s10 }
0x2df2   :  { %v5458_v62 = vpop.permute.xlu0 %5457 }
0x2df3   :  { %v5460_v63 = vadd.f32 %v5458_v62, %v8654_v56 }
0x2df5   :  { %7506 = vtanh.f32 %v5460_v63 }
0x2df6   :  { %7508 = vpow2.f32 %v6189_v34  ;;  %v5382_v41 = vpop.permute.xlu0 %5381 }
0x2df7   :  { %v5384_v43 = vadd.f32 %v5382_v41, %v8654_v56 }
0x2df9   :  { %v6190_v44 = vmul.f32 -1.442695, %v5384_v43 }
0x2dfa   :  { %v5534_v52 = vpop.permute.xlu0 %5533 }
0x2dfb   :  { %v5536_v57 = vadd.f32 %v5534_v52, %v8654_v56 }
0x2dfd   :  { %v6191_v58 = vmul.f32 -1.442695, %v5536_v57 }
0x2e02   :  { %v7507_v2 = vpop.eup %7506 }
0x2e03   :  { %5561 = vrot.lane.b32.xlu1 %v7507_v2, %s7829_s28  ;;  %v7509_v36 = vpop.eup %7508 }
0x2e04   :  { %v5540_v31 = vadd.f32 1.0, %v7509_v36 }
0x2e06   :  { %7510 = vrcp.f32 %v5540_v31 }
0x2e07   :  { %7512 = vpow2.f32 %v6190_v44 }
0x2e13   :  { %v7511_v33 = vpop.eup %7510 }
0x2e14   :  { %v7513_v19 = vpop.eup %7512 }
0x2e15   :  { %v5546_v20 = vadd.f32 1.0, %v7513_v19 }
0x2e17   :  { %7514 = vrcp.f32 %v5546_v20 }
0x2e24   :  { %v7515_v47 = vpop.eup %7514 }
0x2e25   :  { %v5559_v55 = vmul.f32 %v7515_v47, %v5557_v49  ;;  %v7280_v49 = vld [vmem:[%s9164_s7 + $0x8] sm:$0xff]  }
0x2e75   :  { %v5562_v45 = vpop.permute.xlu1 %5561 }
0x2e76   :  { %v5564_v46 = vmul.f32 %v7511_v33, %v5562_v45 }
0x2e78   :  { %5566 = vrot.lane.b32.xlu1 %v5564_v46, %s7843_s6  ;;  %v5946_v46 = vrot.slane %v8536_v8, 7 }
0x2eea   :  { %v5567_v48 = vpop.permute.xlu1 %5566 }
0x2eeb   :  { %v9064_v32 = vadd.f32 %v5567_v48, %v5559_v55  ;;  %v5933_v48 = vrot.slane %v8592_v25, 7  ;;  %v6199_v25 = vld [vmem:[%s9165_s8] ss:$0 sm:$0xff]  ;;  %s6050_s8 = sshll.u32 %s7845_s22, 4  ;;  %s6051_s8 = int_to_ptr.vmem [resolvable:$true] %s6050_s8 }
0x2eec   :  { %s7754_s9 = scalar_lea.vmem %s6051_s8, 32  ;;  %p7759_p4 = scmp.lt.s32.totalorder %s6051_s8, %s6051_s8 }
0x2eed   :  { %7516 = vtanh.f32 %v9064_v32  ;;  %v5908_v15 = vrot.slane %v9064_v32, 7  ;;  %p7755_p3 = scmp.ne.s32.totalorder %s6051_s8, %s7754_s9  ;;  %p7760_p5 = scmp.lt.s32.totalorder %s7754_s9, %s7754_s9 }
0x2eee   :  { %7518 = vpow2.f32 %v6191_v58 }
0x2eef   :  { %p7761_p6 = por %p7760_p5, %p7759_p4 }
0x2ef1   :  { %p7762_p7 = pnand %p7761_p6, %p7755_p3 }
0x2efa   :  { %v7517_v50 = vpop.eup %7516 }
0x2efb   :  { %5572 = vrot.lane.b32.xlu1 %v7517_v50, %s7829_s28  ;;  %v7519_v54 = vpop.eup %7518 }
0x2efc   :  { %v5553_v1 = vadd.f32 1.0, %v7519_v54 }
0x2efe   :  { %7520 = vrcp.f32 %v5553_v1 }
0x2f0b   :  { %v7521_v3 = vpop.eup %7520 }
0x2f6d   :  { %v5573_v4 = vpop.permute.xlu1 %5572 }
0x2f6e   :  { %v9069_v53 = vmul.f32 %v7521_v3, %v5573_v4 }
0x2f70   :  { %v5581_v7 = vrot.slane %v9069_v53, 6 }
0x2f72   :  { %5582 = vrot.lane.b32.xlu0 %v5581_v7, %s7843_s6 }
0x2fe4   :  { %v5583_v10 = vpop.permute.xlu0 %5582 }
0x2fe5   :  { %7214 = vmatmul.mubr.msk.f32.vlgmr.msra.gmra.mxu0 %vm238_vm2, %v5583_v10  ;;  %7225 = vmatmul.mubr.msk.f32.vlgmr.msra.gmra.mxu1 %vm238_vm2, %v5583_v10 }
0x2fe6   :  { %7228 = vmatpush3.msra.mxu0 %v8922_v23  ;;  %7239 = vmatpush3.msra.mxu1 %v9007_v9 }
0x2fe7   :  { %7229 = vmatprep.subr.mxu0 %v7841_v0  ;;  %7240 = vmatprep.subr.mxu1 %v7841_v0 }
0x2fe8   :  { %7230 = vmatpush3.msra.mxu0 %v8928_v42  ;;  %7241 = vmatpush3.msra.mxu1 %v9013_v22 }
0x2fe9   :  { %7231 = vmatprep.subr.mxu0 %v7841_v0  ;;  %7242 = vmatprep.subr.mxu1 %v7841_v0 }
0x2fea   :  { %7232 = vmatpush3.msra.mxu0 %v8934_v24  ;;  %7243 = vmatpush3.msra.mxu1 %v9019_v29 }
0x2feb   :  { %7233 = vmatprep.subr.mxu0 %v7841_v0  ;;  %7244 = vmatprep.subr.mxu1 %v7841_v0 }
0x2fec   :  { %7234 = vmatpush3.msra.mxu0 %v8940_v37  ;;  %7235 = vmatprep.mubr.msk.f32.mxu0 %vm7842_vm0, %v7841_v0 }
0x2fed   :  { %7245 = vmatpush3.msra.mxu1 %v9027_v30  ;;  %7246 = vmatprep.mubr.msk.f32.mxu1 %vm7842_vm0, %v7841_v0 }
0x2fee   :  { %7236 = vmatmul.mubr.msk.f32.vlgmr.msra.gmra.mxu0 %vm238_vm2, %v5583_v10  ;;  %7247 = vmatmul.mubr.msk.f32.vlgmr.msra.gmra.mxu1 %vm238_vm2, %v5583_v10 }
0x2fef   :  { %7249 = vmatprep.subr.bf16.mxu0 %v7841_v0  ;;  %7253 = vmatprep.mubr.msk.bf16.mxu0 %vm7842_vm0, %v7841_v0 }
0x2ff0   :  { %7250 = vmatpush3.bf16.msra.mxu0 %v7280_v49 }
0x2ff1   :  { %7251 = vmatprep.subr.bf16.mxu0 %v7841_v0 }
0x30a5   :  { %v5652_v23 = vpop.f32.mrf.mxu0  ;;  %v5726_v42 = vpop.f32.mrf.mxu1 }
0x30a6   :  { %v5731_v29 = vrot.slane %v5726_v42, 1  ;;  %v5657_v62 = vrot.slane %v5652_v23, 1 }
0x30a7   :  { %v7215_v24 = vpop.f32.mrf.mxu0  ;;  %v7226_v37 = vpop.f32.mrf.mxu1 }
0x30a8   :  { %v5659_v63 = vadd.f32 %v5657_v62, %v8654_v56 }
0x30aa   :  { %v6196_v2 = vmul.f32 -1.442695, %v5659_v63 }
0x30ae   :  { %v5802_v11 = vpop.f32.mrf.mxu0  ;;  %v5878_v14 = vpop.f32.mrf.mxu1 }
0x30af   :  { %v5807_v60 = vrot.slane %v5802_v11, 1  ;;  %v5883_v30 = vrot.slane %v5878_v14, 1 }
0x30b0   :  { %v7237_v9 = vpop.f32.mrf.mxu0  ;;  %v7248_v22 = vpop.f32.mrf.mxu1 }
0x30b1   :  { %5808 = vrot.lane.b32.xlu1 %v5807_v60, %s7829_s28 }
0x30b5   :  { %5732 = vrot.lane.b32.xlu1 %v5731_v29, %s7843_s6 }
0x30b9   :  { %5884 = vrot.lane.b32.xlu1 %v5883_v30, %s7844_s10 }
0x30bd   :  { %3822 = vrot.lane.b32.xlu1 %v8730_v21, %s7843_s6 }
0x30c1   :  { %4524 = vrot.lane.b32.xlu1 %v8854_v51, %s7843_s6 }
0x30c5   :  { %5226 = vrot.lane.b32.xlu1 %v9000_v59, %s7843_s6 }
0x3123   :  { %v5809_v28 = vpop.permute.xlu1 %5808 }
0x3124   :  { %v5811_v38 = vadd.f32 %v5809_v28, %v8654_v56 }
0x3126   :  { %7522 = vtanh.f32 %v5811_v38 }
0x3127   :  { %v5733_v39 = vpop.permute.xlu1 %5732 }
0x3128   :  { %v5735_v40 = vadd.f32 %v5733_v39, %v8654_v56 }
0x312a   :  { %v6197_v35 = vmul.f32 -1.442695, %v5735_v40 }
0x312b   :  { %v5885_v16 = vpop.permute.xlu1 %5884 }
0x312c   :  { %7524 = vpow2.f32 %v6197_v35  ;;  %v5887_v19 = vadd.f32 %v5885_v16, %v8654_v56 }
0x312e   :  { %v6198_v20 = vmul.f32 -1.442695, %v5887_v19 }
0x312f   :  { %v3823_v12 = vpop.permute.xlu1 %3822 }
0x3130   :  { %3825 = vst.msk [vmem:[#allocation2] sm:$0x2] %vm931_vm4, %v3823_v12 }
0x3133   :  { %v7523_v21 = vpop.eup %7522  ;;  %v4525_v13 = vpop.permute.xlu1 %4524 }
0x3134   :  { %4527 = vst.msk [vmem:[#allocation2] sm:$0x8] %vm1635_vm5, %v4525_v13  ;;  %5912 = vrot.lane.b32.xlu0 %v7523_v21, %s7829_s28 }
0x3137   :  { %v5227_v51 = vpop.permute.xlu1 %5226 }
0x3138   :  { %5229 = vst.msk [vmem:[#allocation2] sm:$0x20] %vm2339_vm6, %v5227_v51 }
0x3139   :  { %v7525_v59 = vpop.eup %7524 }
0x313a   :  { %v5897_v26 = vadd.f32 1.0, %v7525_v59 }
0x313c   :  { %7526 = vrcp.f32 %v5897_v26 }
0x313d   :  { %7528 = vpow2.f32 %v6196_v2 }
0x3149   :  { %v7527_v27 = vpop.eup %7526 }
0x314a   :  { %v5910_v61 = vmul.f32 %v7527_v27, %v5908_v15  ;;  %v7529_v17 = vpop.eup %7528 }
0x314b   :  { %v5891_v18 = vadd.f32 1.0, %v7529_v17 }
0x314d   :  { %7530 = vrcp.f32 %v5891_v18 }
0x315a   :  { %v7531_v34 = vpop.eup %7530 }
0x31a6   :  { %v5913_v36 = vpop.permute.xlu0 %5912 }
0x31a7   :  { %v5915_v31 = vmul.f32 %v7531_v34, %v5913_v36 }
0x31a9   :  { %5917 = vrot.lane.b32.xlu0 %v5915_v31, %s7843_s6 }
0x321b   :  { %v5918_v33 = vpop.permute.xlu0 %5917 }
0x321c   :  { %v5920_v45 = vadd.f32 %v5918_v33, %v5910_v61 }
0x321e   :  { %7532 = vtanh.f32 %v5920_v45  ;;  %v5949_v41 = vrot.slane %v5920_v45, 6 }
0x321f   :  { %7534 = vpow2.f32 %v6198_v20 }
0x3220   :  { %v5951_v43 = vsel %vm5937_vm11, %v5946_v46, %v5949_v41 }
0x322b   :  { %v7533_v44 = vpop.eup %7532 }
0x322c   :  { %5923 = vrot.lane.b32.xlu0 %v7533_v44, %s7829_s28  ;;  %v7535_v8 = vpop.eup %7534 }
0x322d   :  { %v5904_v47 = vadd.f32 1.0, %v7535_v8 }
0x322f   :  { %7536 = vrcp.f32 %v5904_v47 }
0x3230   :  { %4173 = vrot.lane.b32.xlu0 %v8792_v6, %s7843_s6  ;;  %v7281_v6 = vld [vmem:[%s9164_s7] sm:$0xff]  }
0x3231   :  { %7252 = vmatpush3.bf16.msra.mxu0 %v7281_v6 }
0x3234   :  { %4875 = vrot.lane.b32.xlu0 %v8916_v5, %s7843_s6 }
0x3238   :  { %5577 = vrot.lane.b32.xlu0 %v9069_v53, %s7843_s6 }
0x323c   :  { %v7537_v5 = vpop.eup %7536 }
0x329e   :  { %v5924_v55 = vpop.permute.xlu0 %5923 }
0x329f   :  { %v5926_v56 = vmul.f32 %v7537_v5, %v5924_v55 }
0x32a1   :  { %v5935_v32 = vrot.slane %v5926_v56, 6  ;;  %5928 = vrot.lane.b32.xlu1 %v5926_v56, %s7843_s6 }
0x32a2   :  { %v4174_v50 = vpop.permute.xlu0 %4173 }
0x32a3   :  { %4176 = vst.msk [vmem:[#allocation2] sm:$0x4] %vm1283_vm7, %v4174_v50  ;;  %v5938_v52 = vsel %vm5937_vm11, %v5933_v48, %v5935_v32 }
0x32a6   :  { %v4876_v57 = vpop.permute.xlu0 %4875 }
0x32a7   :  { %4878 = vst.msk [vmem:[#allocation2] sm:$0x10] %vm1987_vm8, %v4876_v57 }
0x32aa   :  { %v5578_v58 = vpop.permute.xlu0 %5577 }
0x32ab   :  { %5580 = vst.msk [vmem:[#allocation2] sm:$0x40] %vm2691_vm9, %v5578_v58 }
0x3313   :  { %v5929_v0 = vpop.permute.xlu1 %5928 }
0x3314   :  { %5931 = vst.msk [vmem:[#allocation2] sm:$0x80] %vm3043_vm10, %v5929_v0 }
0x331b   :  { %v5932_v54 = vld [vmem:[#allocation2] sm:$0xff] }
0x331c   :  { %v5957_v1 = vpack.c.bf16 %v5932_v54, %v5932_v54 }
0x331e   :  { %7254 = vmatmul.mubr.msk.bf16.vlgmr.msra.gmra.mxu0 %vm238_vm2, %v5957_v1 }
0x33de   :  { %v6018_v3 = vpop.f32.mrf.mxu0 }
0x33df   :  { %v6019_v4 = vadd.f32 %v6199_v25, %v6018_v3 }
0x33e0   :  { %v7255_v53 = vpop.f32.mrf.mxu0 }
0x33e1   :  { %6024 = vmax.xlane.f32.xlu0 %v6019_v4 }
0x33e2   :  { %v6021_v7 = vpop.f32.mrf.mxu0 }
0x33e4   :  { %v7256_v10 = vpop.f32.mrf.mxu0 }
0x33f7   :  { %5940 = vrot.lane.b32.xlu0 %v5938_v52, %s7843_s6 }
0x346a   :  { %v6025_v23 = vpop.xlane.xlu0 %6024 }
0x346b   :  { %v6026_v42 = vsub.f32 %v6019_v4, %v6025_v23 }
0x346d   :  { %v6027_v24 = vmul.f32 1.442695, %v6026_v42 }
0x346e   :  { %v5941_v37 = vpop.permute.xlu0 %5940 }
0x346f   :  { %7538 = vpow2.f32 %v6027_v24  ;;  %5944 = vst.msk [vmem:[#allocation19] sm:$0x3] %vm5943_vm12, %v5941_v37 }
0x347c   :  { %v7539_v11 = vpop.eup %7538 }
0x347d   :  { %6029 = vadd.xlane.f32.xlu1 %v7539_v11 }
0x348e   :  { %5953 = vrot.lane.b32.xlu1 %v5951_v43, %s7844_s10 }
0x348f   :  { %7765 = shalt.err (!%p7762_p7)
}
0x3490   :  { %6053 = dma.vmem_to_hbm [thread:$0]  %s6051_s8, 32, %s9169_s12, [#allocation20]  }
0x3491   :  { %s7846_s1 = smov [#allocation21]  }
0x3492   :  { %s6060_s27 = sshll.u32 %s7846_s1, 4  ;;  %s6061_s27 = int_to_ptr.vmem [resolvable:$true] %s6060_s27 }
0x3493   :  { %s7774_s3 = scalar_lea.vmem %s6061_s27, 32  ;;  %p7779_p9 = scmp.lt.s32.totalorder %s6061_s27, %s6061_s27 }
0x3494   :  { %p7775_p8 = scmp.ne.s32.totalorder %s6061_s27, %s7774_s3  ;;  %p7780_p10 = scmp.lt.s32.totalorder %s7774_s3, %s7774_s3 }
0x3496   :  { %p7781_p11 = por %p7780_p10, %p7779_p9 }
0x3498   :  { %p7782_p12 = pnand %p7781_p11, %p7775_p8 }
0x3506   :  { %v6030_v14 = vpop.xlane.xlu1 %6029 }
0x3507   :  { %7540 = vrcp.f32 %v6030_v14 }
0x350a   :  { %v5954_v60 = vpop.permute.xlu1 %5953 }
0x350b   :  { %5956 = vst.msk [vmem:[#allocation21] sm:$0x3] %vm5943_vm12, %v5954_v60 }
0x350c   :  { %7785 = shalt.err (!%p7782_p12)
}
0x350d   :  { %6063 = dma.vmem_to_hbm [thread:$0]  %s6061_s27, 32, %s9170_s13, [#allocation20]  }
0x350e   :  { %s7847_s12 = smov [#allocation18]  }
0x350f   :  { %s6040_s14 = sshll.u32 %s7847_s12, 4  ;;  %s6041_s14 = int_to_ptr.vmem [resolvable:$true] %s6040_s14 }
0x3510   :  { %s7794_s2 = scalar_lea.vmem %s6041_s14, 128  ;;  %p7799_p0 = scmp.lt.s32.totalorder %s6041_s14, %s6041_s14 }
0x3511   :  { %p7795_p13 = scmp.ne.s32.totalorder %s6041_s14, %s7794_s2  ;;  %p7800_p1 = scmp.lt.s32.totalorder %s7794_s2, %s7794_s2 }
0x3513   :  { %p7801_p2 = por %p7800_p1, %p7799_p0 }
0x3514   :  { %v7541_v9 = vpop.eup %7540 }
0x3515   :  { %v6032_v22 = vmul.f32 %v7541_v9, %v7539_v11  ;;  %p7802_p3 = pnand %p7801_p2, %p7795_p13 }
0x3517   :  { %6033 = vst [vmem:[#allocation18] sm:$0xff] %v6032_v22 }
0x3518   :  { %7805 = shalt.err (!%p7802_p3)
}
0x3519   :  { %6043 = dma.vmem_to_hbm [thread:$0]  %s6041_s14, 128, %s9168_s11, [#allocation5]  }
0x351a   :  { %7824 = dma.done.wait [#allocation5], 128  }
0x351b   :  { %7825 = vsyncadd [#allocation5], 4294967168 }
0x351c   :  { %7826 = dma.done.wait [#allocation20], 64  }
0x351d   :  { %7827 = vsyncadd [#allocation20], 4294967232 }
0x351e   :  { %6073 = vsyncpa [#allocation4], 1 }
0x351f   :  { %6074 = vsyncpa [#allocation7], 1 }
0x3520   :  { %6075 = vsyncpa [#allocation10], 1 }
0x3521   :  { %6076 = vsyncpa [#allocation13], 1 }
0x3522   :  { %6077 = vsyncpa [#allocation16], 1 }
0x3523   :  { %6078 = vsyncpa [#allocation5], 1 }
0x3524   :  { %6079 = vsyncpa [#allocation20], 1 }

</bundles_post_ra>
